<compile_context>
chip_gen: v7x
topology: tpu7x:2x2x1
jax: 0.10.0
libtpu: 0.0.40
codegen_flags: <defaults>
</compile_context>

<pallas_src>
import functools

import jax
import jax.numpy as jnp
from jax.experimental import pallas as pl
from jax.experimental.pallas import tpu as pltpu


# ------------------------------ Pallas kernels ------------------------------ #

def _gemm_bias_act_kernel(a_ref, b_ref, bias_ref, o_ref, *, act):
    """o = act(a @ b + bias). bf16 MXU operands, f32 accumulate + epilogue."""
    acc = jnp.dot(a_ref[...], b_ref[...], preferred_element_type=jnp.float32)
    acc = acc + bias_ref[...]                       # bias broadcast ([N,1] or [1,N])
    if act == "leaky_relu":
        acc = jnp.where(acc > 0, acc, 0.01 * acc)   # nn.LeakyReLU default slope
    elif act == "sigmoid":
        acc = pl.reciprocal(1.0 + jnp.exp(-acc), approx=True)   # EUP exp + EUP rcp
    o_ref[...] = acc.astype(o_ref.dtype)


def conv_gemm(w, cols, bias, act, out_dtype):
    """Lane-dense conv GEMM: out[N, M] = act(w[N, K] @ cols[K, M] + bias[:, None]).

    N = C_out(-like), M = B*OH*OW sits on the lane axis of the output."""
    N, K = w.shape
    K2, M = cols.shape
    assert K == K2
    # Big lane-dense tiles.  Split M only when it divides cleanly; this also gives the
    # larger layers a >=2-step "parallel" axis for v7x's two TensorCores.
    tm = 256 if (M % 256 == 0 and M > 256) else M
    grid = (M // tm,)
    bias2 = bias.reshape(N, 1).astype(jnp.float32)
    return pl.pallas_call(
        functools.partial(_gemm_bias_act_kernel, act=act),
        out_shape=jax.ShapeDtypeStruct((N, M), out_dtype),
        grid=grid,
        in_specs=[
            pl.BlockSpec((N, K), lambda i: (0, 0)),      # weights stay resident
            pl.BlockSpec((K, tm), lambda i: (0, i)),
            pl.BlockSpec((N, 1), lambda i: (0, 0)),
        ],
        out_specs=pl.BlockSpec((N, tm), lambda i: (0, i)),
        compiler_params=pltpu.CompilerParams(dimension_semantics=("parallel",)),
    )(w, cols, bias2)


def fc_gemm(x, w, bias, act, out_dtype):
    """out[B, N] = act(x[B, K] @ w[K, N] + bias[None, :])  (small fc layer, one block)."""
    B, K = x.shape
    K2, N = w.shape
    assert K == K2
    bias2 = bias.reshape(1, N).astype(jnp.float32)
    return pl.pallas_call(
        functools.partial(_gemm_bias_act_kernel, act=act),
        out_shape=jax.ShapeDtypeStruct((B, N), out_dtype),
        grid=(1,),
        in_specs=[pl.BlockSpec((B, K), lambda i: (0, 0)),
                  pl.BlockSpec((K, N), lambda i: (0, 0)),
                  pl.BlockSpec((1, N), lambda i: (0, 0))],
        out_specs=pl.BlockSpec((B, N), lambda i: (0, 0)),
    )(x, w, bias2)


def _fc_fused_kernel(h_ref, w1_ref, b1_ref, w2_ref, b2_ref, enc_ref, dec_ref):
    """encoded = h @ w1 + b1 ; d1_out = encoded @ w2 + b2 — fused (M = batch is tiny)."""
    enc = jnp.dot(h_ref[...], w1_ref[...], preferred_element_type=jnp.float32)
    enc = enc + b1_ref[...]
    enc_ref[...] = enc.astype(enc_ref.dtype)
    dec = jnp.dot(enc.astype(w2_ref.dtype), w2_ref[...],
                  preferred_element_type=jnp.float32)
    dec_ref[...] = (dec + b2_ref[...]).astype(dec_ref.dtype)


def fc1_d1_fused(h, w1, b1, w2, b2):
    B, K1 = h.shape
    L = w1.shape[1]
    N2 = w2.shape[1]
    b1r = b1.reshape(1, L).astype(jnp.float32)
    b2r = b2.reshape(1, N2).astype(jnp.float32)
    return pl.pallas_call(
        _fc_fused_kernel,
        out_shape=(jax.ShapeDtypeStruct((B, L), jnp.float32),
                   jax.ShapeDtypeStruct((B, N2), jnp.bfloat16)),
        grid=(1,),
        in_specs=[pl.BlockSpec((B, K1), lambda i: (0, 0)),
                  pl.BlockSpec((K1, L), lambda i: (0, 0)),
                  pl.BlockSpec((1, L), lambda i: (0, 0)),
                  pl.BlockSpec((L, N2), lambda i: (0, 0)),
                  pl.BlockSpec((1, N2), lambda i: (0, 0))],
        out_specs=(pl.BlockSpec((B, L), lambda i: (0, 0)),
                   pl.BlockSpec((B, N2), lambda i: (0, 0))),
    )(h, w1, b1r, w2, b2r)


# ------------------------- conv glue (channel-major) ------------------------ #

def _im2col_cm(x_cm, K, stride, padding, cin_pad=0):
    """Channel-major im2col.  x_cm: [C, B, H, W] -> cols [(C+cin_pad)*K*K, B*OH*OW].

    Row order = c-major, then kh, then kw (matches torch weight.reshape(Cout, Cin*K*K)).
    No transposes — only pad / strided slice / stack / reshape."""
    C, B, H, W = x_cm.shape
    xp = jnp.pad(x_cm, ((0, cin_pad), (0, 0), (padding, padding), (padding, padding)))
    OH = (H + 2 * padding - K) // stride + 1
    OW = (W + 2 * padding - K) // stride + 1
    patches = []
    for kh in range(K):
        for kw in range(K):
            patches.append(
                xp[:, :, kh:kh + stride * OH:stride, kw:kw + stride * OW:stride])
    cols = jnp.stack(patches, axis=1)                      # [C+pad, K*K, B, OH, OW]
    return cols.reshape((C + cin_pad) * K * K, B * OH * OW), (OH, OW)


def conv2d_cm(x_cm, w_flat, bias, K, stride, padding, act,
              cin_pad=0, out_dtype=jnp.bfloat16):
    """Conv2d on channel-major activations.  w_flat: [C_out, (C_in+cin_pad)*K*K]."""
    Cout = w_flat.shape[0]
    B = x_cm.shape[1]
    cols, (OH, OW) = _im2col_cm(x_cm, K, stride, padding, cin_pad)
    out = conv_gemm(w_flat, cols, bias, act, out_dtype)    # [C_out, B*OH*OW]
    return out.reshape(Cout, B, OH, OW)


def conv_transpose2d_cm(x_cm, w_phase, bias_phase, act, out_dtype=jnp.bfloat16):
    """ConvTranspose2d(k=4, stride=2, padding=1) via sub-pixel phase decomposition:
    one K=2 stride-1 GEMM over the 1-padded input + interleave of the 4 phases."""
    Cin, B, H, W = x_cm.shape
    Cout = w_phase.shape[0] // 4
    cols, (PH, PW) = _im2col_cm(x_cm, K=2, stride=1, padding=1)   # PH=H+1, PW=W+1
    out = conv_gemm(w_phase, cols, bias_phase, act, out_dtype)    # [4*C_out, B*PH*PW]
    o = out.reshape(2, 2, Cout, B, PH, PW)                        # [r, s, co, b, y, x]
    s00 = o[0, 0, :, :, 0:H, 0:W]           # -> out[2m,   2n  ]
    s01 = o[0, 1, :, :, 0:H, 1:W + 1]       # -> out[2m,   2n+1]
    s10 = o[1, 0, :, :, 1:H + 1, 0:W]       # -> out[2m+1, 2n  ]
    s11 = o[1, 1, :, :, 1:H + 1, 1:W + 1]   # -> out[2m+1, 2n+1]
    row0 = jnp.stack([s00, s01], axis=-1)               # [C_out, B, H, W, 2]
    row1 = jnp.stack([s10, s11], axis=-1)
    full = jnp.stack([row0, row1], axis=3)               # [C_out, B, H, 2, W, 2]
    return full.reshape(Cout, B, 2 * H, 2 * W)


# ------------------------------- parameters --------------------------------- #

def init_params(key, latent_variable_size=32):
    """PyTorch-layout, PyTorch-default-init parameters (f32)."""
    def uni(k, shape, fan_in):
        bound = 1.0 / (fan_in ** 0.5)
        return jax.random.uniform(k, shape, jnp.float32, -bound, bound)

    ks = jax.random.split(key, 12)
    return {
        "enc1_w": uni(ks[0], (32, 3, 4, 4), 3 * 16),
        "enc1_b": uni(ks[1], (32,), 3 * 16),
        "enc2_w": uni(ks[2], (64, 32, 4, 4), 32 * 16),
        "enc2_b": uni(ks[3], (64,), 32 * 16),
        "fc1_w": uni(ks[4], (latent_variable_size, 64 * 8 * 8), 64 * 8 * 8),
        "fc1_b": uni(ks[5], (latent_variable_size,), 64 * 8 * 8),
        "d1_w": uni(ks[6], (64 * 8 * 8, latent_variable_size), latent_variable_size),
        "d1_b": uni(ks[7], (64 * 8 * 8,), latent_variable_size),
        "dec1_w": uni(ks[8], (64, 32, 4, 4), 64 * 16),
        "dec1_b": uni(ks[9], (32,), 64 * 16),
        "dec2_w": uni(ks[10], (32, 3, 4, 4), 32 * 16),
        "dec2_b": uni(ks[11], (3,), 32 * 16),
    }


_TAPS = ((3, 1), (2, 0))   # kernel indices per output parity, in conv-tap order
ENC1_CIN_PAD = 5           # pad enc1 C_in 3 -> 8 so GEMM K = 8*4*4 = 128 (lane aligned)


def _phase_pack(wt, bias):
    """ConvTranspose2d weight [C_in, C_out, 4, 4] -> sub-pixel phase GEMM weight
    [4*C_out, C_in*4] (phase-major rows; cols ordered c-major, th, tw) + tiled bias."""
    Cin, Cout = wt.shape[0], wt.shape[1]
    blocks = []
    for r in range(2):
        for s in range(2):
            sub = wt[:, :, list(_TAPS[r]), :][:, :, :, list(_TAPS[s])]   # [Cin,Cout,2,2]
            blocks.append(jnp.transpose(sub, (1, 0, 2, 3)).reshape(Cout, Cin * 4))
    w_phase = jnp.concatenate(blocks, axis=0).astype(jnp.bfloat16)       # [4*Cout, Cin*4]
    b_phase = jnp.tile(bias, 4).astype(jnp.float32)
    return w_phase, b_phase


def prepare_params(p):
    """One-time layout prep: flatten / pre-transpose / phase-pack weights and cast the
    GEMM operands to bf16 (biases stay f32; epilogues run in f32)."""
    enc1_w = jnp.pad(p["enc1_w"], ((0, 0), (0, ENC1_CIN_PAD), (0, 0), (0, 0)))
    q = {
        "enc1_w": enc1_w.reshape(32, -1).astype(jnp.bfloat16),        # [32, 128]
        "enc1_b": p["enc1_b"].astype(jnp.float32),
        "enc2_w": p["enc2_w"].reshape(64, -1).astype(jnp.bfloat16),   # [64, 512]
        "enc2_b": p["enc2_b"].astype(jnp.float32),
        "fc1_w": p["fc1_w"].T.astype(jnp.bfloat16),                   # [4096, 32]
        "fc1_b": p["fc1_b"].astype(jnp.float32),
        "d1_w": p["d1_w"].T.astype(jnp.bfloat16),                     # [32, 4096]
        "d1_b": p["d1_b"].astype(jnp.float32),
    }
    q["dec1_w"], q["dec1_b"] = _phase_pack(p["dec1_w"], p["dec1_b"])  # [128, 256]
    q["dec2_w"], q["dec2_b"] = _phase_pack(p["dec2_w"], p["dec2_b"])  # [12, 128]
    return q


# --------------------------------- forward ---------------------------------- #

def autoencoder_forward(x, q, only_decode=False):
    """Matches Autoencoder.forward: x is an NCHW image if only_decode=False, else the
    latent [B, latent_variable_size]."""
    B = x.shape[0]
    if not only_decode:
        h = jnp.transpose(x, (1, 0, 2, 3)).astype(jnp.bfloat16)       # -> [C, B, H, W]
        h = conv2d_cm(h, q["enc1_w"], q["enc1_b"], K=4, stride=2, padding=1,
                      act="leaky_relu", cin_pad=ENC1_CIN_PAD)         # [32, B, 16, 16]
        h = conv2d_cm(h, q["enc2_w"], q["enc2_b"], K=4, stride=2, padding=1,
                      act="leaky_relu")                               # [64, B, 8, 8]
        h_flat = jnp.transpose(h, (1, 0, 2, 3)).reshape(B, 64 * 8 * 8)  # torch .view order
        encoded, d = fc1_d1_fused(h_flat, q["fc1_w"], q["fc1_b"],
                                  q["d1_w"], q["d1_b"])               # [B,32], [B,4096]
    else:
        d = fc_gemm(x.astype(jnp.bfloat16), q["d1_w"], q["d1_b"],
                    act="none", out_dtype=jnp.bfloat16)               # [B, 4096]
    d = jnp.transpose(d.reshape(B, 64, 8, 8), (1, 0, 2, 3))           # -> [64, B, 8, 8]
    d = conv_transpose2d_cm(d, q["dec1_w"], q["dec1_b"],
                            act="leaky_relu")                         # [32, B, 16, 16]
    d = conv_transpose2d_cm(d, q["dec2_w"], q["dec2_b"], act="sigmoid",
                            out_dtype=jnp.float32)                    # [3, B, 32, 32]
    decoded = jnp.transpose(d, (1, 0, 2, 3))                          # -> NCHW
    if only_decode:
        return decoded
    return encoded, decoded


# ------------------------ pure-XLA reference (f32) --------------------------- #

def _ref_forward(x, p, only_decode=False):
    hp = jax.lax.Precision.HIGHEST

    def conv(h, w, b, stride, pad):
        y = jax.lax.conv_general_dilated(
            h, w, (stride, stride), [(pad, pad), (pad, pad)],
            dimension_numbers=("NCHW", "OIHW", "NCHW"), precision=hp)
        return y + b.reshape(1, -1, 1, 1)

    def convT(h, w, b, stride, pad):
        K = w.shape[2]
        wf = jnp.transpose(jnp.flip(w, (2, 3)), (1, 0, 2, 3))
        y = jax.lax.conv_general_dilated(
            h, wf, (1, 1), [(K - 1 - pad,) * 2, (K - 1 - pad,) * 2],
            lhs_dilation=(stride, stride),
            dimension_numbers=("NCHW", "OIHW", "NCHW"), precision=hp)
        return y + b.reshape(1, -1, 1, 1)

    lrelu = lambda v: jnp.where(v > 0, v, 0.01 * v)
    if not only_decode:
        h = lrelu(conv(x, p["enc1_w"], p["enc1_b"], 2, 1))
        h = lrelu(conv(h, p["enc2_w"], p["enc2_b"], 2, 1))
        enc = jnp.dot(h.reshape(x.shape[0], -1), p["fc1_w"].T, precision=hp) + p["fc1_b"]
    else:
        enc = x
    d = jnp.dot(enc, p["d1_w"].T, precision=hp) + p["d1_b"]
    d = d.reshape(-1, 64, 8, 8)
    d = lrelu(convT(d, p["dec1_w"], p["dec1_b"], 2, 1))
    d = jax.nn.sigmoid(convT(d, p["dec2_w"], p["dec2_b"], 2, 1))
    return d if only_decode else (enc, d)


# ----------------------------------- main ------------------------------------ #

if __name__ == "__main__":
    key = jax.random.PRNGKey(0)
    pkey, xkey, zkey = jax.random.split(key, 3)
    params = init_params(pkey)
    prepped = prepare_params(params)

    # Only_Decode == False path: image input [B, 3, 32, 32]
    x = jax.random.uniform(xkey, (2, 3, 32, 32), jnp.float32)
    fwd = jax.jit(lambda xx, qq: autoencoder_forward(xx, qq, only_decode=False))
    encoded, decoded = fwd(x, prepped)
    jax.block_until_ready((encoded, decoded))
    assert encoded.shape == (2, 32) and decoded.shape == (2, 3, 32, 32)

    # Only_Decode == True path: latent input [B, 32]
    z = jax.random.normal(zkey, (2, 32), jnp.float32)
    fwd_dec = jax.jit(lambda zz, qq: autoencoder_forward(zz, qq, only_decode=True))
    dec_only = fwd_dec(z, prepped)
    jax.block_until_ready(dec_only)
    assert dec_only.shape == (2, 3, 32, 32)

    # Correctness check vs a pure-XLA f32 reference (loose tol: bf16 MXU operands).
    ref_enc, ref_dec = _ref_forward(x, params, only_decode=False)
    ref_dec_only = _ref_forward(z, params, only_decode=True)
    assert float(jnp.max(jnp.abs(encoded - ref_enc))) < 1e-2
    assert float(jnp.max(jnp.abs(decoded - ref_dec))) < 1e-2
    assert float(jnp.max(jnp.abs(dec_only - ref_dec_only))) < 1e-2

    print("KERNEL_OK")
</pallas_src>

<mosaic_0001>
module attributes {stable_mosaic.version = 11 : i64} {
  func.func @_gemm_bias_act_kernel(%arg0: i32, %arg1: memref<32x128xbf16, #tpu.memory_space<vmem>>, %arg2: memref<128x256xbf16, #tpu.memory_space<vmem>>, %arg3: memref<32x1xf32, #tpu.memory_space<vmem>>, %arg4: memref<32x256xbf16, #tpu.memory_space<vmem>>) attributes {dimension_semantics = [#tpu.dimension_semantics<parallel>], iteration_bounds = array<i64: 2>, scalar_prefetch = 0 : i64, scratch_operands = 0 : i64, tpu.core_type = #tpu.core_type<tc>, window_params = [{pipeline_mode = #tpu.pipeline_mode<synchronous>, transform_indices = @transform_0, window_bounds = array<i64: 32, 128>}, {transform_indices = @transform_1, window_bounds = array<i64: 128, 256>}, {pipeline_mode = #tpu.pipeline_mode<synchronous>, transform_indices = @transform_2, window_bounds = array<i64: 32, 1>}, {transform_indices = @transform_3, window_bounds = array<i64: 32, 256>}]} {
    %c0 = arith.constant 0 : index
    %c0_0 = arith.constant 0 : index
    %0 = vector.load %arg1[%c0, %c0_0] : memref<32x128xbf16, #tpu.memory_space<vmem>>, vector<32x128xbf16>
    %c0_1 = arith.constant 0 : index
    %c0_2 = arith.constant 0 : index
    %1 = vector.load %arg2[%c0_1, %c0_2] : memref<128x256xbf16, #tpu.memory_space<vmem>>, vector<128x256xbf16>
    %cst = arith.constant dense<0.000000e+00> : vector<32x256xf32>
    %2 = tpu.matmul %0, %1, %cst {dimension_numbers = #tpu.dot_dimension_numbers<[1], [0], [0], [1], [0, 0, 1, 1], [], []>} : vector<32x128xbf16>, vector<128x256xbf16>, vector<32x256xf32> -> vector<32x256xf32>
    %c0_3 = arith.constant 0 : index
    %c0_4 = arith.constant 0 : index
    %3 = vector.load %arg3[%c0_3, %c0_4] : memref<32x1xf32, #tpu.memory_space<vmem>>, vector<32x1xf32>
    %4 = vector.broadcast %3 : vector<32x1xf32> to vector<32x256xf32>
    %5 = arith.addf %2, %4 : vector<32x256xf32>
    %cst_5 = arith.constant 0.000000e+00 : f32
    %6 = vector.broadcast %cst_5 : f32 to vector<32x256xf32>
    %7 = arith.cmpf ogt, %5, %6 : vector<32x256xf32>
    %cst_6 = arith.constant 0.00999999977 : f32
    %8 = vector.broadcast %cst_6 : f32 to vector<32x256xf32>
    %9 = arith.mulf %8, %5 : vector<32x256xf32>
    %10 = arith.select %7, %5, %9 : vector<32x256xi1>, vector<32x256xf32>
    %11 = arith.truncf %10 : vector<32x256xf32> to vector<32x256xbf16>
    %c0_7 = arith.constant 0 : index
    %c0_8 = arith.constant 0 : index
    %12 = vector.load %arg4[%c0_7, %c0_8] : memref<32x256xbf16, #tpu.memory_space<vmem>>, vector<32x256xbf16>
    tpu.vector_store %arg4[%c0_7, %c0_8], %11 {strides = array<i32>} : memref<32x256xbf16, #tpu.memory_space<vmem>>, vector<32x256xbf16>,
    return
  }
  func.func @transform_0(%arg0: i32) -> (i32, i32) {
    %c0_i32 = arith.constant 0 : i32
    %c0_i32_0 = arith.constant 0 : i32
    %c0_i32_1 = arith.constant 0 : i32
    return %c0_i32, %c0_i32_0 : i32, i32
  }
  func.func @transform_1(%arg0: i32) -> (i32, i32) {
    %c0_i32 = arith.constant 0 : i32
    %c0_i32_0 = arith.constant 0 : i32
    return %c0_i32, %arg0 : i32, i32
  }
  func.func @transform_2(%arg0: i32) -> (i32, i32) {
    %c0_i32 = arith.constant 0 : i32
    %c0_i32_0 = arith.constant 0 : i32
    %c0_i32_1 = arith.constant 0 : i32
    return %c0_i32, %c0_i32_0 : i32, i32
  }
  func.func @transform_3(%arg0: i32) -> (i32, i32) {
    %c0_i32 = arith.constant 0 : i32
    %c0_i32_0 = arith.constant 0 : i32
    return %c0_i32, %arg0 : i32, i32
  }
}

module attributes {stable_mosaic.version = 11 : i64} {
  func.func @_gemm_bias_act_kernel(%arg0: i32, %arg1: memref<64x512xbf16, #tpu.memory_space<vmem>>, %arg2: memref<512x128xbf16, #tpu.memory_space<vmem>>, %arg3: memref<64x1xf32, #tpu.memory_space<vmem>>, %arg4: memref<64x128xbf16, #tpu.memory_space<vmem>>) attributes {dimension_semantics = [#tpu.dimension_semantics<parallel>], iteration_bounds = array<i64: 1>, scalar_prefetch = 0 : i64, scratch_operands = 0 : i64, tpu.core_type = #tpu.core_type<tc>, window_params = [{pipeline_mode = #tpu.pipeline_mode<synchronous>, transform_indices = @transform_0, window_bounds = array<i64: 64, 512>}, {transform_indices = @transform_1, window_bounds = array<i64: 512, 128>}, {pipeline_mode = #tpu.pipeline_mode<synchronous>, transform_indices = @transform_2, window_bounds = array<i64: 64, 1>}, {transform_indices = @transform_3, window_bounds = array<i64: 64, 128>}]} {
    %c0 = arith.constant 0 : index
    %c0_0 = arith.constant 0 : index
    %0 = vector.load %arg1[%c0, %c0_0] : memref<64x512xbf16, #tpu.memory_space<vmem>>, vector<64x512xbf16>
    %c0_1 = arith.constant 0 : index
    %c0_2 = arith.constant 0 : index
    %1 = vector.load %arg2[%c0_1, %c0_2] : memref<512x128xbf16, #tpu.memory_space<vmem>>, vector<512x128xbf16>
    %cst = arith.constant dense<0.000000e+00> : vector<64x128xf32>
    %2 = tpu.matmul %0, %1, %cst {dimension_numbers = #tpu.dot_dimension_numbers<[1], [0], [0], [1], [0, 0, 1, 1], [], []>} : vector<64x512xbf16>, vector<512x128xbf16>, vector<64x128xf32> -> vector<64x128xf32>
    %c0_3 = arith.constant 0 : index
    %c0_4 = arith.constant 0 : index
    %3 = vector.load %arg3[%c0_3, %c0_4] : memref<64x1xf32, #tpu.memory_space<vmem>>, vector<64x1xf32>
    %4 = vector.broadcast %3 : vector<64x1xf32> to vector<64x128xf32>
    %5 = arith.addf %2, %4 : vector<64x128xf32>
    %cst_5 = arith.constant 0.000000e+00 : f32
    %6 = vector.broadcast %cst_5 : f32 to vector<64x128xf32>
    %7 = arith.cmpf ogt, %5, %6 : vector<64x128xf32>
    %cst_6 = arith.constant 0.00999999977 : f32
    %8 = vector.broadcast %cst_6 : f32 to vector<64x128xf32>
    %9 = arith.mulf %8, %5 : vector<64x128xf32>
    %10 = arith.select %7, %5, %9 : vector<64x128xi1>, vector<64x128xf32>
    %11 = arith.truncf %10 : vector<64x128xf32> to vector<64x128xbf16>
    %c0_7 = arith.constant 0 : index
    %c0_8 = arith.constant 0 : index
    %12 = vector.load %arg4[%c0_7, %c0_8] : memref<64x128xbf16, #tpu.memory_space<vmem>>, vector<64x128xbf16>
    tpu.vector_store %arg4[%c0_7, %c0_8], %11 {strides = array<i32>} : memref<64x128xbf16, #tpu.memory_space<vmem>>, vector<64x128xbf16>,
    return
  }
  func.func @transform_0(%arg0: i32) -> (i32, i32) {
    %c0_i32 = arith.constant 0 : i32
    %c0_i32_0 = arith.constant 0 : i32
    %c0_i32_1 = arith.constant 0 : i32
    return %c0_i32, %c0_i32_0 : i32, i32
  }
  func.func @transform_1(%arg0: i32) -> (i32, i32) {
    %c0_i32 = arith.constant 0 : i32
    %c0_i32_0 = arith.constant 0 : i32
    return %c0_i32, %arg0 : i32, i32
  }
  func.func @transform_2(%arg0: i32) -> (i32, i32) {
    %c0_i32 = arith.constant 0 : i32
    %c0_i32_0 = arith.constant 0 : i32
    %c0_i32_1 = arith.constant 0 : i32
    return %c0_i32, %c0_i32_0 : i32, i32
  }
  func.func @transform_3(%arg0: i32) -> (i32, i32) {
    %c0_i32 = arith.constant 0 : i32
    %c0_i32_0 = arith.constant 0 : i32
    return %c0_i32, %arg0 : i32, i32
  }
}

module attributes {stable_mosaic.version = 11 : i64} {
  func.func @_fc_fused_kernel(%arg0: i32, %arg1: memref<2x4096xbf16, #tpu.memory_space<vmem>>, %arg2: memref<4096x32xbf16, #tpu.memory_space<vmem>>, %arg3: memref<1x32xf32, #tpu.memory_space<vmem>>, %arg4: memref<32x4096xbf16, #tpu.memory_space<vmem>>, %arg5: memref<1x4096xf32, #tpu.memory_space<vmem>>, %arg6: memref<2x32xf32, #tpu.memory_space<vmem>>, %arg7: memref<2x4096xbf16, #tpu.memory_space<vmem>>) attributes {dimension_semantics = [#tpu.dimension_semantics<arbitrary>], iteration_bounds = array<i64: 1>, scalar_prefetch = 0 : i64, scratch_operands = 0 : i64, tpu.core_type = #tpu.core_type<tc>, window_params = [{pipeline_mode = #tpu.pipeline_mode<synchronous>, transform_indices = @transform_0, window_bounds = array<i64: 2, 4096>}, {pipeline_mode = #tpu.pipeline_mode<synchronous>, transform_indices = @transform_1, window_bounds = array<i64: 4096, 32>}, {pipeline_mode = #tpu.pipeline_mode<synchronous>, transform_indices = @transform_2, window_bounds = array<i64: 1, 32>}, {pipeline_mode = #tpu.pipeline_mode<synchronous>, transform_indices = @transform_3, window_bounds = array<i64: 32, 4096>}, {pipeline_mode = #tpu.pipeline_mode<synchronous>, transform_indices = @transform_4, window_bounds = array<i64: 1, 4096>}, {pipeline_mode = #tpu.pipeline_mode<synchronous>, transform_indices = @transform_5, window_bounds = array<i64: 2, 32>}, {pipeline_mode = #tpu.pipeline_mode<synchronous>, transform_indices = @transform_6, window_bounds = array<i64: 2, 4096>}]} {
    %c0 = arith.constant 0 : index
    %c0_0 = arith.constant 0 : index
    %0 = vector.load %arg1[%c0, %c0_0] : memref<2x4096xbf16, #tpu.memory_space<vmem>>, vector<2x4096xbf16>
    %c0_1 = arith.constant 0 : index
    %c0_2 = arith.constant 0 : index
    %1 = vector.load %arg2[%c0_1, %c0_2] : memref<4096x32xbf16, #tpu.memory_space<vmem>>, vector<4096x32xbf16>
    %cst = arith.constant dense<0.000000e+00> : vector<2x32xf32>
    %2 = tpu.matmul %0, %1, %cst {dimension_numbers = #tpu.dot_dimension_numbers<[1], [0], [0], [1], [0, 0, 1, 1], [], []>} : vector<2x4096xbf16>, vector<4096x32xbf16>, vector<2x32xf32> -> vector<2x32xf32>
    %c0_3 = arith.constant 0 : index
    %c0_4 = arith.constant 0 : index
    %3 = vector.load %arg3[%c0_3, %c0_4] : memref<1x32xf32, #tpu.memory_space<vmem>>, vector<1x32xf32>
    %4 = vector.broadcast %3 : vector<1x32xf32> to vector<2x32xf32>
    %5 = arith.addf %2, %4 : vector<2x32xf32>
    %c0_5 = arith.constant 0 : index
    %c0_6 = arith.constant 0 : index
    %6 = vector.load %arg6[%c0_5, %c0_6] : memref<2x32xf32, #tpu.memory_space<vmem>>, vector<2x32xf32>
    tpu.vector_store %arg6[%c0_5, %c0_6], %5 {strides = array<i32>} : memref<2x32xf32, #tpu.memory_space<vmem>>, vector<2x32xf32>,
    %7 = arith.truncf %5 : vector<2x32xf32> to vector<2x32xbf16>
    %c0_7 = arith.constant 0 : index
    %c0_8 = arith.constant 0 : index
    %8 = vector.load %arg4[%c0_7, %c0_8] : memref<32x4096xbf16, #tpu.memory_space<vmem>>, vector<32x4096xbf16>
    %cst_9 = arith.constant dense<0.000000e+00> : vector<2x4096xf32>
    %9 = tpu.matmul %7, %8, %cst_9 {dimension_numbers = #tpu.dot_dimension_numbers<[1], [0], [0], [1], [0, 0, 1, 1], [], []>} : vector<2x32xbf16>, vector<32x4096xbf16>, vector<2x4096xf32> -> vector<2x4096xf32>
    %c0_10 = arith.constant 0 : index
    %c0_11 = arith.constant 0 : index
    %10 = vector.load %arg5[%c0_10, %c0_11] : memref<1x4096xf32, #tpu.memory_space<vmem>>, vector<1x4096xf32>
    %11 = vector.broadcast %10 : vector<1x4096xf32> to vector<2x4096xf32>
    %12 = arith.addf %9, %11 : vector<2x4096xf32>
    %13 = arith.truncf %12 : vector<2x4096xf32> to vector<2x4096xbf16>
    %c0_12 = arith.constant 0 : index
    %c0_13 = arith.constant 0 : index
    %14 = vector.load %arg7[%c0_12, %c0_13] : memref<2x4096xbf16, #tpu.memory_space<vmem>>, vector<2x4096xbf16>
    tpu.vector_store %arg7[%c0_12, %c0_13], %13 {strides = array<i32>} : memref<2x4096xbf16, #tpu.memory_space<vmem>>, vector<2x4096xbf16>,
    return
  }
  func.func @transform_0(%arg0: i32) -> (i32, i32) {
    %c0_i32 = arith.constant 0 : i32
    %c0_i32_0 = arith.constant 0 : i32
    %c0_i32_1 = arith.constant 0 : i32
    return %c0_i32, %c0_i32_0 : i32, i32
  }
  func.func @transform_1(%arg0: i32) -> (i32, i32) {
    %c0_i32 = arith.constant 0 : i32
    %c0_i32_0 = arith.constant 0 : i32
    %c0_i32_1 = arith.constant 0 : i32
    return %c0_i32, %c0_i32_0 : i32, i32
  }
  func.func @transform_2(%arg0: i32) -> (i32, i32) {
    %c0_i32 = arith.constant 0 : i32
    %c0_i32_0 = arith.constant 0 : i32
    %c0_i32_1 = arith.constant 0 : i32
    return %c0_i32, %c0_i32_0 : i32, i32
  }
  func.func @transform_3(%arg0: i32) -> (i32, i32) {
    %c0_i32 = arith.constant 0 : i32
    %c0_i32_0 = arith.constant 0 : i32
    %c0_i32_1 = arith.constant 0 : i32
    return %c0_i32, %c0_i32_0 : i32, i32
  }
  func.func @transform_4(%arg0: i32) -> (i32, i32) {
    %c0_i32 = arith.constant 0 : i32
    %c0_i32_0 = arith.constant 0 : i32
    %c0_i32_1 = arith.constant 0 : i32
    return %c0_i32, %c0_i32_0 : i32, i32
  }
  func.func @transform_5(%arg0: i32) -> (i32, i32) {
    %c0_i32 = arith.constant 0 : i32
    %c0_i32_0 = arith.constant 0 : i32
    %c0_i32_1 = arith.constant 0 : i32
    return %c0_i32, %c0_i32_0 : i32, i32
  }
  func.func @transform_6(%arg0: i32) -> (i32, i32) {
    %c0_i32 = arith.constant 0 : i32
    %c0_i32_0 = arith.constant 0 : i32
    %c0_i32_1 = arith.constant 0 : i32
    return %c0_i32, %c0_i32_0 : i32, i32
  }
}

module attributes {stable_mosaic.version = 11 : i64} {
  func.func @_gemm_bias_act_kernel(%arg0: i32, %arg1: memref<128x256xbf16, #tpu.memory_space<vmem>>, %arg2: memref<256x162xbf16, #tpu.memory_space<vmem>>, %arg3: memref<128x1xf32, #tpu.memory_space<vmem>>, %arg4: memref<128x162xbf16, #tpu.memory_space<vmem>>) attributes {dimension_semantics = [#tpu.dimension_semantics<parallel>], iteration_bounds = array<i64: 1>, scalar_prefetch = 0 : i64, scratch_operands = 0 : i64, tpu.core_type = #tpu.core_type<tc>, window_params = [{pipeline_mode = #tpu.pipeline_mode<synchronous>, transform_indices = @transform_0, window_bounds = array<i64: 128, 256>}, {transform_indices = @transform_1, window_bounds = array<i64: 256, 162>}, {pipeline_mode = #tpu.pipeline_mode<synchronous>, transform_indices = @transform_2, window_bounds = array<i64: 128, 1>}, {transform_indices = @transform_3, window_bounds = array<i64: 128, 162>}]} {
    %c0 = arith.constant 0 : index
    %c0_0 = arith.constant 0 : index
    %0 = vector.load %arg1[%c0, %c0_0] : memref<128x256xbf16, #tpu.memory_space<vmem>>, vector<128x256xbf16>
    %c0_1 = arith.constant 0 : index
    %c0_2 = arith.constant 0 : index
    %1 = vector.load %arg2[%c0_1, %c0_2] : memref<256x162xbf16, #tpu.memory_space<vmem>>, vector<256x162xbf16>
    %cst = arith.constant dense<0.000000e+00> : vector<128x162xf32>
    %2 = tpu.matmul %0, %1, %cst {dimension_numbers = #tpu.dot_dimension_numbers<[1], [0], [0], [1], [0, 0, 1, 1], [], []>} : vector<128x256xbf16>, vector<256x162xbf16>, vector<128x162xf32> -> vector<128x162xf32>
    %c0_3 = arith.constant 0 : index
    %c0_4 = arith.constant 0 : index
    %3 = vector.load %arg3[%c0_3, %c0_4] : memref<128x1xf32, #tpu.memory_space<vmem>>, vector<128x1xf32>
    %4 = vector.broadcast %3 : vector<128x1xf32> to vector<128x162xf32>
    %5 = arith.addf %2, %4 : vector<128x162xf32>
    %cst_5 = arith.constant 0.000000e+00 : f32
    %6 = vector.broadcast %cst_5 : f32 to vector<128x162xf32>
    %7 = arith.cmpf ogt, %5, %6 : vector<128x162xf32>
    %cst_6 = arith.constant 0.00999999977 : f32
    %8 = vector.broadcast %cst_6 : f32 to vector<128x162xf32>
    %9 = arith.mulf %8, %5 : vector<128x162xf32>
    %10 = arith.select %7, %5, %9 : vector<128x162xi1>, vector<128x162xf32>
    %11 = arith.truncf %10 : vector<128x162xf32> to vector<128x162xbf16>
    %c0_7 = arith.constant 0 : index
    %c0_8 = arith.constant 0 : index
    %12 = vector.load %arg4[%c0_7, %c0_8] : memref<128x162xbf16, #tpu.memory_space<vmem>>, vector<128x162xbf16>
    tpu.vector_store %arg4[%c0_7, %c0_8], %11 {strides = array<i32>} : memref<128x162xbf16, #tpu.memory_space<vmem>>, vector<128x162xbf16>,
    return
  }
  func.func @transform_0(%arg0: i32) -> (i32, i32) {
    %c0_i32 = arith.constant 0 : i32
    %c0_i32_0 = arith.constant 0 : i32
    %c0_i32_1 = arith.constant 0 : i32
    return %c0_i32, %c0_i32_0 : i32, i32
  }
  func.func @transform_1(%arg0: i32) -> (i32, i32) {
    %c0_i32 = arith.constant 0 : i32
    %c0_i32_0 = arith.constant 0 : i32
    return %c0_i32, %arg0 : i32, i32
  }
  func.func @transform_2(%arg0: i32) -> (i32, i32) {
    %c0_i32 = arith.constant 0 : i32
    %c0_i32_0 = arith.constant 0 : i32
    %c0_i32_1 = arith.constant 0 : i32
    return %c0_i32, %c0_i32_0 : i32, i32
  }
  func.func @transform_3(%arg0: i32) -> (i32, i32) {
    %c0_i32 = arith.constant 0 : i32
    %c0_i32_0 = arith.constant 0 : i32
    return %c0_i32, %arg0 : i32, i32
  }
}

module attributes {stable_mosaic.version = 11 : i64} {
  func.func @_gemm_bias_act_kernel(%arg0: i32, %arg1: memref<12x128xbf16, #tpu.memory_space<vmem>>, %arg2: memref<128x578xbf16, #tpu.memory_space<vmem>>, %arg3: memref<12x1xf32, #tpu.memory_space<vmem>>, %arg4: memref<12x578xf32, #tpu.memory_space<vmem>>) attributes {dimension_semantics = [#tpu.dimension_semantics<parallel>], iteration_bounds = array<i64: 1>, scalar_prefetch = 0 : i64, scratch_operands = 0 : i64, tpu.core_type = #tpu.core_type<tc>, window_params = [{pipeline_mode = #tpu.pipeline_mode<synchronous>, transform_indices = @transform_0, window_bounds = array<i64: 12, 128>}, {transform_indices = @transform_1, window_bounds = array<i64: 128, 578>}, {pipeline_mode = #tpu.pipeline_mode<synchronous>, transform_indices = @transform_2, window_bounds = array<i64: 12, 1>}, {transform_indices = @transform_3, window_bounds = array<i64: 12, 578>}]} {
    %c0 = arith.constant 0 : index
    %c0_0 = arith.constant 0 : index
    %0 = vector.load %arg1[%c0, %c0_0] : memref<12x128xbf16, #tpu.memory_space<vmem>>, vector<12x128xbf16>
    %c0_1 = arith.constant 0 : index
    %c0_2 = arith.constant 0 : index
    %1 = vector.load %arg2[%c0_1, %c0_2] : memref<128x578xbf16, #tpu.memory_space<vmem>>, vector<128x578xbf16>
    %cst = arith.constant dense<0.000000e+00> : vector<12x578xf32>
    %2 = tpu.matmul %0, %1, %cst {dimension_numbers = #tpu.dot_dimension_numbers<[1], [0], [0], [1], [0, 0, 1, 1], [], []>} : vector<12x128xbf16>, vector<128x578xbf16>, vector<12x578xf32> -> vector<12x578xf32>
    %c0_3 = arith.constant 0 : index
    %c0_4 = arith.constant 0 : index
    %3 = vector.load %arg3[%c0_3, %c0_4] : memref<12x1xf32, #tpu.memory_space<vmem>>, vector<12x1xf32>
    %4 = vector.broadcast %3 : vector<12x1xf32> to vector<12x578xf32>
    %5 = arith.addf %2, %4 : vector<12x578xf32>
    %cst_5 = arith.constant 0.000000e+00 : f32
    %6 = vector.broadcast %cst_5 : f32 to vector<12x578xf32>
    %7 = arith.subf %6, %5 : vector<12x578xf32>
    %8 = math.exp %7 : vector<12x578xf32>
    %cst_6 = arith.constant 1.000000e+00 : f32
    %9 = vector.broadcast %cst_6 : f32 to vector<12x578xf32>
    %10 = arith.addf %9, %8 : vector<12x578xf32>
    %11 = tpu.reciprocal %10 {approx = true} : vector<12x578xf32> -> vector<12x578xf32>
    %c0_7 = arith.constant 0 : index
    %c0_8 = arith.constant 0 : index
    %12 = vector.load %arg4[%c0_7, %c0_8] : memref<12x578xf32, #tpu.memory_space<vmem>>, vector<12x578xf32>
    tpu.vector_store %arg4[%c0_7, %c0_8], %11 {strides = array<i32>} : memref<12x578xf32, #tpu.memory_space<vmem>>, vector<12x578xf32>,
    return
  }
  func.func @transform_0(%arg0: i32) -> (i32, i32) {
    %c0_i32 = arith.constant 0 : i32
    %c0_i32_0 = arith.constant 0 : i32
    %c0_i32_1 = arith.constant 0 : i32
    return %c0_i32, %c0_i32_0 : i32, i32
  }
  func.func @transform_1(%arg0: i32) -> (i32, i32) {
    %c0_i32 = arith.constant 0 : i32
    %c0_i32_0 = arith.constant 0 : i32
    return %c0_i32, %arg0 : i32, i32
  }
  func.func @transform_2(%arg0: i32) -> (i32, i32) {
    %c0_i32 = arith.constant 0 : i32
    %c0_i32_0 = arith.constant 0 : i32
    %c0_i32_1 = arith.constant 0 : i32
    return %c0_i32, %c0_i32_0 : i32, i32
  }
  func.func @transform_3(%arg0: i32) -> (i32, i32) {
    %c0_i32 = arith.constant 0 : i32
    %c0_i32_0 = arith.constant 0 : i32
    return %c0_i32, %arg0 : i32, i32
  }
}

</mosaic_0001>

<bundles_post_ra>
// kernel: _lambda_.5
= control target key start
LH: loop header
LB: loop body
LE: loop exit
PB: predicated region body
PF: predicated region fallthrough
CT: control target
= control target key end

     0   :  { %s771_s12 = smov 0   ;;  %s773_s13 = smov 0   ;;  %s892_s0 = inlined_call_operand.vmem [shape: bf16[32,128], index: 0, kind: input, shape index: {}]   ;;  %s893_s1 = inlined_call_operand.vmem [shape: bf16[128,512], index: 1, kind: input, shape index: {}]   ;;  %s894_s2 = inlined_call_operand.vmem [shape: f32[32,1], index: 2, kind: input, shape index: {}]   ;;  %s895_s3 = inlined_call_operand.vmem [shape: bf16[32,512], index: 3, kind: output, shape index: {}]  }
   0x1   :  { %s775_s14 = smov 0  }
   0x2 LB: > { %s614_s15 = sadd.s32 4294967295, %s748_s14   ;;  %s788_s16 = sadd.s32 1, %s748_s14   ;;  %s748_s14 = sphi %s775_s14, %s899_s14   ;;  %s744_s13 = sphi %s773_s13, %s898_s13   ;;  %s740_s12 = sphi %s771_s12, %s897_s12  }
   0x3   : > { %s38_s17 = ssub.s32 %s748_s14, %s788_s16  ;;  %s41_s18 = sadd.s32 1, %s744_s13 }
   0x4   : > { %p39_p0 = scmp.eq.s32.totalorder %s38_s17, 0  ;;  %p48_p1 = scmp.ne.s32.totalorder %s744_s13, %s740_s12 }
   0x5   : > { %p49_p2 = scmp.eq.s32.totalorder %s748_s14, 0  ;;  %p99_p3 = scmp.eq.s32.totalorder %s614_s15, 1 }
   0x6   : > { %s799_s19 = scalar_select %p39_p0, %s744_s13, %s41_s18  }
   0x7   : > { %p50_p4 = por %p49_p2, %p48_p1  ;;  %p801_p5 = por %p99_p3, %p48_p1 }
   0x8   : > { %p617_p6 = scmp.ge.s32.totalorder %s748_s14, 2 }
   0xa   : > { %127 = sbr.rel (%p617_p6) target bundleno = 29 (0x1d), region = 24 }
  0x11   : > { %130 = sbr.rel (!%p50_p4) target bundleno = 29 (0x1d), region = 28  ;;  %s132_s21 = sand.u32 (%p50_p4), 1, %s744_s13  }
  0x12   : > { %s651_s22 = sshll.u32 (%p50_p4), %s748_s14, 3  ;;  %s618_s23 = sshll.u32 (%p50_p4), %s132_s21, 7 }
  0x13   : > { %s811_s26 = scalar_lea.vmem (%p50_p4), %s893_s1, %s651_s22  ;;  %s134_s27 = scalar_lea.vmem (%p50_p4), [#allocation2], %s618_s23 }
  0x14   : > { %v195_v0 = vld [vmem:[%s811_s26] sm:$0xff] (%p50_p4)  ;;  %v197_v1 = vld [vmem:[%s811_s26 + $0x10] sm:$0xff] (%p50_p4) }
  0x15   : > { %v199_v2 = vld [vmem:[%s811_s26 + $0x20] sm:$0xff] (%p50_p4)  ;;  %196 = vst [vmem:[%s134_s27] sm:$0xff] (%p50_p4), %v195_v0  ;;  %198 = vst [vmem:[%s134_s27 + $0x8] sm:$0xff] (%p50_p4), %v197_v1  ;;  %v201_v3 = vld [vmem:[%s811_s26 + $0x30] sm:$0xff] (%p50_p4) }
  0x16   : > { %200 = vst [vmem:[%s134_s27 + $0x10] sm:$0xff] (%p50_p4), %v199_v2  ;;  %v203_v4 = vld [vmem:[%s811_s26 + $0x40] sm:$0xff] (%p50_p4)  ;;  %v205_v5 = vld [vmem:[%s811_s26 + $0x50] sm:$0xff] (%p50_p4)  ;;  %202 = vst [vmem:[%s134_s27 + $0x18] sm:$0xff] (%p50_p4), %v201_v3 }
  0x17   : > { %204 = vst [vmem:[%s134_s27 + $0x20] sm:$0xff] (%p50_p4), %v203_v4  ;;  %206 = vst [vmem:[%s134_s27 + $0x28] sm:$0xff] (%p50_p4), %v205_v5  ;;  %v207_v6 = vld [vmem:[%s811_s26 + $0x60] sm:$0xff] (%p50_p4)  ;;  %v209_v7 = vld [vmem:[%s811_s26 + $0x70] sm:$0xff] (%p50_p4) }
  0x18   : > { %v211_v8 = vld [vmem:[%s811_s26 + $0x80] sm:$0xff]  ;;  %208 = vst [vmem:[%s134_s27 + $0x30] sm:$0xff] %v207_v6  ;;  %210 = vst [vmem:[%s134_s27 + $0x38] sm:$0xff] %v209_v7  ;;  %v213_v9 = vld [vmem:[%s811_s26 + $0x90] sm:$0xff] }
  0x19   : > { %212 = vst [vmem:[%s134_s27 + $0x40] sm:$0xff] %v211_v8  ;;  %v215_v10 = vld [vmem:[%s811_s26 + $0xa0] sm:$0xff]  ;;  %v217_v11 = vld [vmem:[%s811_s26 + $0xb0] sm:$0xff]  ;;  %214 = vst [vmem:[%s134_s27 + $0x48] sm:$0xff] %v213_v9 }
  0x1a   : > { %216 = vst [vmem:[%s134_s27 + $0x50] sm:$0xff] %v215_v10  ;;  %218 = vst [vmem:[%s134_s27 + $0x58] sm:$0xff] %v217_v11  ;;  %v219_v12 = vld [vmem:[%s811_s26 + $0xc0] sm:$0xff]  ;;  %v221_v13 = vld [vmem:[%s811_s26 + $0xd0] sm:$0xff] }
  0x1b   : > { %v223_v14 = vld [vmem:[%s811_s26 + $0xe0] sm:$0xff]  ;;  %220 = vst [vmem:[%s134_s27 + $0x60] sm:$0xff] %v219_v12  ;;  %222 = vst [vmem:[%s134_s27 + $0x68] sm:$0xff] %v221_v13  ;;  %v225_v15 = vld [vmem:[%s811_s26 + $0xf0] sm:$0xff] }
  0x1c   : > { %224 = vst [vmem:[%s134_s27 + $0x70] sm:$0xff] %v223_v14  ;;  %226 = vst [vmem:[%s134_s27 + $0x78] sm:$0xff] %v225_v15 }
  0x1d PF: > { %p621_p7 = scmp.ge.s32.totalorder %s748_s14, 1  ;;  %p231_p8 = scmp.lt.s32.totalorder %s748_s14, 3 }
  0x1f   : > { %p232_p9 = pnand %p621_p7, %p231_p8 }
  0x20   : > { %s238_s28 = sand.u32 (!%p232_p9), 1, %s740_s12   ;;  %v750_v16 = vmov (!%p232_p9), 0   ;;  %v285_v17 = vld [vmem:[%s894_s2 + $0x10] sm:$0xff] (!%p232_p9)  ;;  %v283_v18 = vld [vmem:[%s894_s2] sm:$0xff] (!%p232_p9)  ;;  %v286_v26 = vld [vmem:[%s894_s2 + $0x18] sm:$0xff] (!%p232_p9) }
  0x21   : > { %235 = sbr.rel (%p232_p9) target bundleno = 302 (0x12e), region = 66  ;;  %s622_s29 = sshll.u32 (!%p232_p9), %s238_s28, 7  ;;  %431 = vmatprep.mubr.bf16.mxu0 (!%p232_p9), %v750_v16  ;;  %441 = vmatprep.mubr.bf16.mxu1 (!%p232_p9), %v750_v16  ;;  %v284_v28 = vld [vmem:[%s894_s2 + $0x8] sm:$0xff] (!%p232_p9)  ;;  %v724_v37 = vld [vmem:[%s892_s0] sm:$0xff] (!%p232_p9)  }
  0x22   : > { %699 = vset.pattern.permute.xlu1 (!%p232_p9), %v750_v16  ;;  %698 = vset.pattern.permute.xlu0 (!%p232_p9), %v750_v16  ;;  %s840_s7 = scalar_lea.vmem (!%p232_p9), [#allocation2], %s622_s29  ;;  %v725_v38 = vld [vmem:[%s892_s0 + $0x8] sm:$0xff] (!%p232_p9)   ;;  %s872_s23 = sshll.u32 (!%p232_p9), %s238_s28, 5 }
  0x23   : > { %v700_v19 = vld [vmem:[%s840_s7 + $0x4] ss:$8 sps:$4 sm:$0xff] (!%p232_p9)   ;;  %299 = vperm.xlu1 (!%p232_p9), %699, %v285_v17   ;;  %289 = vperm.xlu0 (!%p232_p9), %698, %v283_v18   ;;  %v702_v20 = vld [vmem:[%s840_s7] ss:$8 sps:$4 sm:$0xff] (!%p232_p9)   ;;  %v703_v21 = vld [vmem:[%s840_s7 + $0x14] ss:$8 sps:$4 sm:$0xff] (!%p232_p9)  }
  0x24   : > { %399 = vmatprep.subr.bf16.mxu0 (!%p232_p9), %v700_v19  ;;  %657 = vmatprep.subr.bf16.mxu1 (!%p232_p9), %v700_v19  ;;  %v705_v22 = vld [vmem:[%s840_s7 + $0x10] ss:$8 sps:$4 sm:$0xff] (!%p232_p9)   ;;  %v706_v23 = vld [vmem:[%s840_s7 + $0x24] ss:$8 sps:$4 sm:$0xff] (!%p232_p9)   ;;  %v708_v24 = vld [vmem:[%s840_s7 + $0x20] ss:$8 sps:$4 sm:$0xff] (!%p232_p9)  }
  0x25   : > { %400 = vmatpush1.bf16.msra.mxu0 (!%p232_p9), %v702_v20  ;;  %665 = vmatpush1.bf16.msra.mxu1 (!%p232_p9), %v702_v20  ;;  %v709_v25 = vld [vmem:[%s840_s7 + $0x34] ss:$8 sps:$4 sm:$0xff] (!%p232_p9)   ;;  %v711_v27 = vld [vmem:[%s840_s7 + $0x30] ss:$8 sps:$4 sm:$0xff] (!%p232_p9)   ;;  %v712_v29 = vld [vmem:[%s840_s7 + $0x44] ss:$8 sps:$4 sm:$0xff] (!%p232_p9)  }
  0x26   : > { %401 = vmatprep.subr.bf16.mxu0 (!%p232_p9), %v703_v21  ;;  %658 = vmatprep.subr.bf16.mxu1 (!%p232_p9), %v703_v21  ;;  %v714_v30 = vld [vmem:[%s840_s7 + $0x40] ss:$8 sps:$4 sm:$0xff] (!%p232_p9)   ;;  %v715_v31 = vld [vmem:[%s840_s7 + $0x54] ss:$8 sps:$4 sm:$0xff] (!%p232_p9)   ;;  %v717_v32 = vld [vmem:[%s840_s7 + $0x50] ss:$8 sps:$4 sm:$0xff] (!%p232_p9)  }
  0x27   : > { %304 = vperm.xlu1 (!%p232_p9), %699, %v286_v26   ;;  %294 = vperm.xlu0 (!%p232_p9), %698, %v284_v28   ;;  %v718_v33 = vld [vmem:[%s840_s7 + $0x64] ss:$8 sps:$4 sm:$0xff] (!%p232_p9)   ;;  %v720_v34 = vld [vmem:[%s840_s7 + $0x60] ss:$8 sps:$4 sm:$0xff] (!%p232_p9)   ;;  %v721_v35 = vld [vmem:[%s840_s7 + $0x74] ss:$8 sps:$4 sm:$0xff] (!%p232_p9)  }
  0x28   : > { %v723_v36 = vld [vmem:[%s840_s7 + $0x70] ss:$8 sps:$4 sm:$0xff]   ;;  %s259_s12 = scalar_lea.vmem [#allocation3], %s872_s23  ;;  %s656_s24 = sshll.u32 (%p801_p5), %s614_s15, 3 }
  0x29   : > { %402 = vmatpush1.bf16.msra.mxu0 %v705_v22  ;;  %666 = vmatpush1.bf16.msra.mxu1 %v705_v22  ;;  %s513_s27 = scalar_lea.vmem (%p801_p5), %s895_s3, %s656_s24 }
  0x2a   : > { %403 = vmatprep.subr.bf16.mxu0 %v706_v23  ;;  %659 = vmatprep.subr.bf16.mxu1 %v706_v23 }
  0x2d   : > { %404 = vmatpush1.bf16.msra.mxu0 %v708_v24  ;;  %667 = vmatpush1.bf16.msra.mxu1 %v708_v24 }
  0x2e   : > { %405 = vmatprep.subr.bf16.mxu0 %v709_v25  ;;  %660 = vmatprep.subr.bf16.mxu1 %v709_v25 }
  0x31   : > { %406 = vmatpush1.bf16.msra.mxu0 %v711_v27  ;;  %668 = vmatpush1.bf16.msra.mxu1 %v711_v27 }
  0x32   : > { %407 = vmatprep.subr.bf16.mxu0 %v712_v29  ;;  %661 = vmatprep.subr.bf16.mxu1 %v712_v29 }
  0x35   : > { %408 = vmatpush1.bf16.msra.mxu0 %v714_v30  ;;  %669 = vmatpush1.bf16.msra.mxu1 %v714_v30 }
  0x36   : > { %409 = vmatprep.subr.bf16.mxu0 %v715_v31  ;;  %662 = vmatprep.subr.bf16.mxu1 %v715_v31 }
  0x39   : > { %410 = vmatpush1.bf16.msra.mxu0 %v717_v32  ;;  %670 = vmatpush1.bf16.msra.mxu1 %v717_v32 }
  0x3a   : > { %411 = vmatprep.subr.bf16.mxu0 %v718_v33  ;;  %663 = vmatprep.subr.bf16.mxu1 %v718_v33 }
  0x3d   : > { %412 = vmatpush1.bf16.msra.mxu0 %v720_v34  ;;  %671 = vmatpush1.bf16.msra.mxu1 %v720_v34 }
  0x3e   : > { %413 = vmatprep.subr.bf16.mxu0 %v721_v35  ;;  %664 = vmatprep.subr.bf16.mxu1 %v721_v35 }
  0x41   : > { %414 = vmatpush1.bf16.msra.mxu0 %v723_v36  ;;  %672 = vmatpush1.bf16.msra.mxu1 %v723_v36 }
  0x44   : > { %432 = vmatmul.mubr.bf16.vlgmr.msra.gmra.mrb[0].mxu0 %v724_v37  ;;  %442 = vmatmul.mubr.bf16.vlgmr.msra.gmra.mrb[0].mxu1 %v725_v38 }
  0xa2   : > { %v300_v39 = vpop.permute.xlu1 %299  ;;  %v290_v40 = vpop.permute.xlu0 %289 }
  0xa6   : > { %v305_v53 = vpop.permute.xlu1 %304  ;;  %v295_v54 = vpop.permute.xlu0 %294 }
 0x117   : > { %v433_v41 = vpop.f32.mrb[0].mxu0  ;;  %v443_v42 = vpop.f32.mrb[0].mxu1 }
 0x118   : > { %v434_v43 = vadd.f32 %v433_v41, %v290_v40  ;;  %v444_v44 = vadd.f32 %v443_v42, %v300_v39  ;;  %v435_v45 = vpop.f32.mrb[1].mxu0  ;;  %v445_v46 = vpop.f32.mrb[1].mxu1 }
 0x119   : > { %v436_v47 = vadd.f32 %v435_v45, %v290_v40  ;;  %v446_v48 = vadd.f32 %v445_v46, %v300_v39  ;;  %v437_v49 = vpop.f32.mrb[2].mxu0  ;;  %v447_v50 = vpop.f32.mrb[2].mxu1 }
 0x11a   : > { %vm452_vm0 = vcmp.gt.f32.partialorder %v434_v43, 0.0  ;;  %v460_v51 = vmul.f32 0.01, %v434_v43  ;;  %vm456_vm1 = vcmp.gt.f32.partialorder %v444_v44, 0.0  ;;  %v464_v52 = vmul.f32 0.01, %v444_v44 }
 0x11b   : > { %vm453_vm2 = vcmp.gt.f32.partialorder %v436_v47, 0.0  ;;  %v461_v55 = vmul.f32 0.01, %v436_v47  ;;  %vm457_vm3 = vcmp.gt.f32.partialorder %v446_v48, 0.0  ;;  %v465_v56 = vmul.f32 0.01, %v446_v48 }
 0x11c   : > { %v468_v57 = vsel %vm452_vm0, %v434_v43, %v460_v51  ;;  %v472_v58 = vsel %vm456_vm1, %v444_v44, %v464_v52  ;;  %v438_v59 = vadd.f32 %v437_v49, %v295_v54  ;;  %v448_v60 = vadd.f32 %v447_v50, %v305_v53  ;;  %v439_v61 = vpop.f32.mrb[3].mxu0  ;;  %v449_v62 = vpop.f32.mrb[3].mxu1 }
 0x11d   : > { %v469_v63 = vsel %vm453_vm2, %v436_v47, %v461_v55  ;;  %v473_v0 = vsel %vm457_vm3, %v446_v48, %v465_v56  ;;  %v440_v1 = vadd.f32 %v439_v61, %v295_v54  ;;  %v450_v2 = vadd.f32 %v449_v62, %v305_v53 }
 0x11e   : > { %v652_v3 = vpack.c.bf16 %v469_v63, %v468_v57  ;;  %v654_v4 = vpack.c.bf16 %v473_v0, %v472_v58  ;;  %vm454_vm4 = vcmp.gt.f32.partialorder %v438_v59, 0.0  ;;  %v462_v5 = vmul.f32 0.01, %v438_v59 }
 0x11f   : > { %vm458_vm5 = vcmp.gt.f32.partialorder %v448_v60, 0.0  ;;  %v466_v6 = vmul.f32 0.01, %v448_v60  ;;  %vm455_vm6 = vcmp.gt.f32.partialorder %v440_v1, 0.0  ;;  %v463_v7 = vmul.f32 0.01, %v440_v1 }
 0x120   : > { %500 = vst [vmem:[%s259_s12] sm:$0xff] %v652_v3  ;;  %502 = vst [vmem:[%s259_s12 + $0x10] sm:$0xff] %v654_v4  ;;  %v470_v8 = vsel %vm454_vm4, %v438_v59, %v462_v5  ;;  %vm459_vm7 = vcmp.gt.f32.partialorder %v450_v2, 0.0  ;;  %v467_v9 = vmul.f32 0.01, %v450_v2  ;;  %510 = sbr.rel (!%p801_p5) target bundleno = 302 (0x12e), region = 74 }
 0x121   : > { %v474_v10 = vsel %vm458_vm5, %v448_v60, %v466_v6  ;;  %v471_v11 = vsel %vm455_vm6, %v440_v1, %v463_v7 }
 0x122   : > { %v653_v12 = vpack.c.bf16 %v471_v11, %v470_v8  ;;  %v475_v13 = vsel %vm459_vm7, %v450_v2, %v467_v9 }
 0x123   : > { %v655_v14 = vpack.c.bf16 %v475_v13, %v474_v10 }
 0x124   : > { %501 = vst [vmem:[%s259_s12 + $0x8] sm:$0xff] %v653_v12 }
 0x125   : > { %503 = vst [vmem:[%s259_s12 + $0x18] sm:$0xff] %v655_v14 }
 0x127   : > { %v547_v15 = vld [vmem:[%s259_s12] sm:$0xff]  ;;  %v551_v17 = vld [vmem:[%s259_s12 + $0x10] sm:$0xff] }
 0x128   : > { %548 = vst [vmem:[%s513_s27] sm:$0xff] %v547_v15  ;;  %552 = vst [vmem:[%s513_s27 + $0x20] sm:$0xff] %v551_v17 }
 0x12b   : > { %v549_v16 = vld [vmem:[%s259_s12 + $0x8] sm:$0xff] }
 0x12c   : > { %v553_v18 = vld [vmem:[%s259_s12 + $0x18] sm:$0xff]  ;;  %550 = vst [vmem:[%s513_s27 + $0x10] sm:$0xff] %v549_v16 }
 0x12d   : > { %554 = vst [vmem:[%s513_s27 + $0x30] sm:$0xff] %v553_v18 }
 0x12e PF: > { %p10_p10 = scmp.ge.s32.totalorder %s788_s16, 4   ;;  %s897_s12 = smov %s744_s13 }
 0x12f   : > { %s898_s13 = smov %s799_s19  ;;  %s899_s14 = smov %s788_s16 }
 0x130   :  { %12 = sbr.rel (!%p10_p10) target bundleno = 2 (0x2), region = 143 }

// kernel: _lambda_.6
= control target key start
LH: loop header
LB: loop body
LE: loop exit
PB: predicated region body
PF: predicated region fallthrough
CT: control target
= control target key end

     0   :  { %v839_v1 = vmov 0   ;;  %s1040_s1 = inlined_call_operand.vmem [shape: bf16[512,128], index: 1, kind: input, shape index: {}]   ;;  %s1041_s0 = inlined_call_operand.vmem [shape: bf16[64,512], index: 0, kind: input, shape index: {}]   ;;  %s1042_s2 = inlined_call_operand.vmem [shape: f32[64,1], index: 2, kind: input, shape index: {}]   ;;  %s1043_s3 = inlined_call_operand.vmem [shape: bf16[64,128], index: 3, kind: output, shape index: {}]  }
   0x1   :  { %v783_v0 = vld [vmem:[%s1040_s1 + $0x40] sm:$0xff]   ;;  %781 = vset.pattern.permute.xlu0 %v839_v1  ;;  %782 = vset.pattern.permute.xlu1 %v839_v1  ;;  %v787_v5 = vld [vmem:[%s1040_s1 + $0x48] sm:$0xff]   ;;  %v791_v9 = vld [vmem:[%s1040_s1 + $0x50] sm:$0xff]  }
   0x2   :  { %v784_v2 = vld [vmem:[%s1040_s1 + $0xc0] sm:$0xff]   ;;  %700 = vmatprep.subr.bf16.mxu0 %v783_v0  ;;  %v788_v6 = vld [vmem:[%s1040_s1 + $0xc8] sm:$0xff]   ;;  %v792_v10 = vld [vmem:[%s1040_s1 + $0xd0] sm:$0xff]  }
   0x3   :  { %v785_v3 = vld [vmem:[%s1040_s1] sm:$0xff]   ;;  %740 = vmatprep.subr.bf16.mxu1 %v784_v2  ;;  %v789_v7 = vld [vmem:[%s1040_s1 + $0x8] sm:$0xff]   ;;  %v793_v11 = vld [vmem:[%s1040_s1 + $0x10] sm:$0xff]  }
   0x4   :  { %v786_v4 = vld [vmem:[%s1040_s1 + $0x80] sm:$0xff]   ;;  %701 = vmatpush3.bf16.msra.mxu0 %v785_v3  ;;  %v790_v8 = vld [vmem:[%s1040_s1 + $0x88] sm:$0xff]   ;;  %v794_v12 = vld [vmem:[%s1040_s1 + $0x90] sm:$0xff]  }
   0x5   :  { %741 = vmatpush3.bf16.msra.mxu1 %v786_v4  ;;  %702 = vmatprep.subr.bf16.mxu0 %v787_v5  ;;  %v795_v13 = vld [vmem:[%s1040_s1 + $0x58] sm:$0xff]   ;;  %v799_v17 = vld [vmem:[%s1040_s1 + $0x60] sm:$0xff]   ;;  %v803_v21 = vld [vmem:[%s1040_s1 + $0x68] sm:$0xff]  }
   0x6   :  { %742 = vmatprep.subr.bf16.mxu1 %v788_v6  ;;  %v796_v14 = vld [vmem:[%s1040_s1 + $0xd8] sm:$0xff]   ;;  %v800_v18 = vld [vmem:[%s1040_s1 + $0xe0] sm:$0xff]   ;;  %v804_v22 = vld [vmem:[%s1040_s1 + $0xe8] sm:$0xff]  }
   0x7   :  { %v797_v15 = vld [vmem:[%s1040_s1 + $0x18] sm:$0xff]   ;;  %v801_v19 = vld [vmem:[%s1040_s1 + $0x20] sm:$0xff]   ;;  %v805_v23 = vld [vmem:[%s1040_s1 + $0x28] sm:$0xff]  }
   0x8   :  { %703 = vmatpush3.bf16.msra.mxu0 %v789_v7  ;;  %v798_v16 = vld [vmem:[%s1040_s1 + $0x98] sm:$0xff]   ;;  %v802_v20 = vld [vmem:[%s1040_s1 + $0xa0] sm:$0xff]   ;;  %v806_v24 = vld [vmem:[%s1040_s1 + $0xa8] sm:$0xff]  }
   0x9   :  { %743 = vmatpush3.bf16.msra.mxu1 %v790_v8  ;;  %704 = vmatprep.subr.bf16.mxu0 %v791_v9  ;;  %v807_v25 = vld [vmem:[%s1040_s1 + $0x70] sm:$0xff]   ;;  %v811_v29 = vld [vmem:[%s1040_s1 + $0x78] sm:$0xff]   ;;  %v95_v43 = vld [vmem:[%s1042_s2] sm:$0xff] }
   0xa   :  { %744 = vmatprep.subr.bf16.mxu1 %v792_v10  ;;  %v808_v26 = vld [vmem:[%s1040_s1 + $0xf0] sm:$0xff]   ;;  %v812_v30 = vld [vmem:[%s1040_s1 + $0xf8] sm:$0xff]   ;;  %105 = vperm.xlu0 %781, %v95_v43   ;;  %v96_v45 = vld [vmem:[%s1042_s2 + $0x8] sm:$0xff] }
   0xb   :  { %v809_v27 = vld [vmem:[%s1040_s1 + $0x30] sm:$0xff]   ;;  %v813_v31 = vld [vmem:[%s1040_s1 + $0x38] sm:$0xff]   ;;  %v99_v48 = vld [vmem:[%s1042_s2 + $0x20] sm:$0xff] }
   0xc   :  { %705 = vmatpush3.bf16.msra.mxu0 %v793_v11  ;;  %v810_v28 = vld [vmem:[%s1040_s1 + $0xb0] sm:$0xff]   ;;  %v814_v32 = vld [vmem:[%s1040_s1 + $0xb8] sm:$0xff]   ;;  %v100_v51 = vld [vmem:[%s1042_s2 + $0x28] sm:$0xff] }
   0xd   :  { %745 = vmatpush3.bf16.msra.mxu1 %v794_v12  ;;  %706 = vmatprep.subr.bf16.mxu0 %v795_v13  ;;  %v815_v33 = vld [vmem:[%s1041_s0] ss:$16 sps:$4 sm:$0xff]   ;;  %v817_v34 = vld [vmem:[%s1041_s0 + $0x4] ss:$16 sps:$4 sm:$0xff]   ;;  %v818_v35 = vld [vmem:[%s1041_s0 + $0x8] ss:$16 sps:$4 sm:$0xff]  }
   0xe   :  { %746 = vmatprep.subr.bf16.mxu1 %v796_v14  ;;  %v820_v36 = vld [vmem:[%s1041_s0 + $0xc] ss:$16 sps:$4 sm:$0xff]   ;;  %447 = vmatprep.mubr.bf16.mxu0 %v817_v34  ;;  %v821_v37 = vld [vmem:[%s1041_s0 + $0x24] ss:$16 sps:$4 sm:$0xff]   ;;  %v825_v39 = vld [vmem:[%s1041_s0 + $0x20] ss:$16 sps:$4 sm:$0xff]  }
   0xf   :  { %512 = vmatprep.mubr.bf16.mxu1 %v820_v36  ;;  %v823_v38 = vld [vmem:[%s1041_s0 + $0x2c] ss:$16 sps:$4 sm:$0xff]   ;;  %v826_v40 = vld [vmem:[%s1041_s0 + $0x28] ss:$16 sps:$4 sm:$0xff]   ;;  %v827_v41 = vld [vmem:[%s1041_s0 + $0x44] ss:$16 sps:$4 sm:$0xff]   ;;  %110 = vperm.xlu0 %781, %v96_v45  }
  0x10   :  { %707 = vmatpush3.bf16.msra.mxu0 %v797_v15  ;;  %v829_v42 = vld [vmem:[%s1041_s0 + $0x4c] ss:$16 sps:$4 sm:$0xff]   ;;  %v97_v44 = vld [vmem:[%s1042_s2 + $0x10] sm:$0xff]  ;;  %v832_v49 = vld [vmem:[%s1041_s0 + $0x48] ss:$16 sps:$4 sm:$0xff]  }
  0x11   :  { %747 = vmatpush3.bf16.msra.mxu1 %v798_v16  ;;  %708 = vmatprep.subr.bf16.mxu0 %v799_v17  ;;  %v98_v46 = vld [vmem:[%s1042_s2 + $0x18] sm:$0xff]  ;;  %v831_v47 = vld [vmem:[%s1041_s0 + $0x40] ss:$16 sps:$4 sm:$0xff]   ;;  %v833_v50 = vld [vmem:[%s1041_s0 + $0x64] ss:$16 sps:$4 sm:$0xff]  }
  0x12   :  { %748 = vmatprep.subr.bf16.mxu1 %v800_v18  ;;  %115 = vperm.xlu1 %782, %v97_v44   ;;  %v835_v52 = vld [vmem:[%s1041_s0 + $0x6c] ss:$16 sps:$4 sm:$0xff]   ;;  %v101_v53 = vld [vmem:[%s1042_s2 + $0x30] sm:$0xff]  ;;  %v838_v56 = vld [vmem:[%s1041_s0 + $0x68] ss:$16 sps:$4 sm:$0xff]  }
  0x13   :  { %125 = vperm.xlu0 %781, %v99_v48   ;;  %v102_v54 = vld [vmem:[%s1042_s2 + $0x38] sm:$0xff]  ;;  %v837_v55 = vld [vmem:[%s1041_s0 + $0x60] ss:$16 sps:$4 sm:$0xff]  }
  0x14   :  { %709 = vmatpush3.bf16.msra.mxu0 %v801_v19 }
  0x15   :  { %749 = vmatpush3.bf16.msra.mxu1 %v802_v20  ;;  %710 = vmatprep.subr.bf16.mxu0 %v803_v21 }
  0x16   :  { %750 = vmatprep.subr.bf16.mxu1 %v804_v22  ;;  %120 = vperm.xlu1 %782, %v98_v46  }
  0x17   :  { %135 = vperm.xlu0 %781, %v101_v53  }
  0x18   :  { %711 = vmatpush3.bf16.msra.mxu0 %v805_v23 }
  0x19   :  { %751 = vmatpush3.bf16.msra.mxu1 %v806_v24  ;;  %712 = vmatprep.subr.bf16.mxu0 %v807_v25 }
  0x1a   :  { %752 = vmatprep.subr.bf16.mxu1 %v808_v26  ;;  %130 = vperm.xlu1 %782, %v100_v51  }
  0x1c   :  { %713 = vmatpush3.bf16.msra.mxu0 %v809_v27 }
  0x1d   :  { %753 = vmatpush3.bf16.msra.mxu1 %v810_v28  ;;  %714 = vmatprep.subr.bf16.mxu0 %v811_v29 }
  0x1e   :  { %754 = vmatprep.subr.bf16.mxu1 %v812_v30  ;;  %140 = vperm.xlu1 %782, %v102_v54  }
  0x20   :  { %715 = vmatpush3.bf16.msra.mxu0 %v813_v31 }
  0x21   :  { %755 = vmatpush3.bf16.msra.mxu1 %v814_v32 }
  0x23   :  { %448 = vmatmul.mubr.bf16.vlgmr.msra.gmra.mrb[0].mxu0 %v815_v33 }
  0x24   :  { %513 = vmatmul.mubr.bf16.vlgmr.msra.gmra.mrb[0].mxu1 %v818_v35  ;;  %455 = vmatprep.mubr.bf16.mxu0 %v821_v37 }
  0x25   :  { %520 = vmatprep.mubr.bf16.mxu1 %v823_v38 }
  0x2b   :  { %456 = vmatmul.mubr.bf16.gmra.mrb[4].mxu0 %v825_v39 }
  0x2c   :  { %521 = vmatmul.mubr.bf16.gmra.mrb[4].mxu1 %v826_v40  ;;  %463 = vmatprep.mubr.bf16.mxu0 %v827_v41 }
  0x2d   :  { %528 = vmatprep.mubr.bf16.mxu1 %v829_v42 }
  0x33   :  { %464 = vmatmul.mubr.bf16.gmra.mrb[8].mxu0 %v831_v47 }
  0x34   :  { %529 = vmatmul.mubr.bf16.gmra.mrb[8].mxu1 %v832_v49  ;;  %471 = vmatprep.mubr.bf16.mxu0 %v833_v50 }
  0x35   :  { %536 = vmatprep.mubr.bf16.mxu1 %v835_v52 }
  0x3b   :  { %472 = vmatmul.mubr.bf16.gmra.mrb[12].mxu0 %v837_v55 }
  0x3c   :  { %537 = vmatmul.mubr.bf16.gmra.mrb[12].mxu1 %v838_v56 }
  0x89   :  { %v106_v57 = vpop.permute.xlu0 %105 }
  0x8e   :  { %v111_v59 = vpop.permute.xlu0 %110 }
  0x91   :  { %v116_v10 = vpop.permute.xlu1 %115 }
  0x92   :  { %v126_v35 = vpop.permute.xlu0 %125 }
  0x95   :  { %v121_v29 = vpop.permute.xlu1 %120 }
  0x96   :  { %v136_v56 = vpop.permute.xlu0 %135 }
  0x99   :  { %v131_v52 = vpop.permute.xlu1 %130 }
  0xf6   :  { %v716_v58 = vpop.f32.mrb[0].mxu0 }
  0xf7   :  { %v756_v60 = vpop.f32.mrb[0].mxu1  ;;  %v717_v61 = vpop.f32.mrb[1].mxu0 }
  0xf8   :  { %v718_v62 = vadd.f32 %v717_v61, %v716_v58  ;;  %v757_v63 = vpop.f32.mrb[1].mxu1  ;;  %v719_v0 = vpop.f32.mrb[2].mxu0 }
  0xf9   :  { %v758_v1 = vadd.f32 %v757_v63, %v756_v60  ;;  %v759_v2 = vpop.f32.mrb[2].mxu1  ;;  %v720_v3 = vpop.f32.mrb[3].mxu0 }
  0xfa   :  { %v450_v4 = vadd.f32 %v718_v62, %v106_v57  ;;  %v721_v5 = vadd.f32 %v720_v3, %v719_v0  ;;  %v760_v6 = vpop.f32.mrb[3].mxu1 }
  0xfb   :  { %v761_v7 = vadd.f32 %v760_v6, %v759_v2 }
  0xfc   :  { %v515_v8 = vadd.f32 %v758_v1, %v450_v4  ;;  %v453_v9 = vadd.f32 %v721_v5, %v111_v59 }
  0xfe   :  { %v553_v11 = vmul.f32 0.01, %v515_v8  ;;  %v518_v12 = vadd.f32 %v761_v7, %v453_v9  ;;  %v722_v13 = vpop.f32.mrb[4].mxu0  ;;  %vm545_vm0 = vcmp.gt.f32.partialorder %v515_v8, 0.0 }
  0xff   :  { %v762_v14 = vpop.f32.mrb[4].mxu1  ;;  %v723_v15 = vpop.f32.mrb[5].mxu0 }
 0x100   :  { %vm546_vm1 = vcmp.gt.f32.partialorder %v518_v12, 0.0  ;;  %v554_v16 = vmul.f32 0.01, %v518_v12  ;;  %v724_v17 = vadd.f32 %v723_v15, %v722_v13  ;;  %v763_v18 = vpop.f32.mrb[5].mxu1  ;;  %v725_v19 = vpop.f32.mrb[6].mxu0  ;;  %v561_v23 = vsel %vm545_vm0, %v515_v8, %v553_v11 }
 0x101   :  { %v764_v20 = vadd.f32 %v763_v18, %v762_v14  ;;  %v765_v21 = vpop.f32.mrb[6].mxu1  ;;  %v726_v22 = vpop.f32.mrb[7].mxu0 }
 0x102   :  { %v562_v24 = vsel %vm546_vm1, %v518_v12, %v554_v16  ;;  %v458_v25 = vadd.f32 %v724_v17, %v116_v10  ;;  %v727_v26 = vadd.f32 %v726_v22, %v725_v19  ;;  %v766_v27 = vpop.f32.mrb[7].mxu1  ;;  %v141_v10 = vpop.permute.xlu1 %140 }
 0x103   :  { %v680_v28 = vpack.c.bf16 %v562_v24, %v561_v23  ;;  %v767_v30 = vadd.f32 %v766_v27, %v765_v21 }
 0x104   :  { %v523_v31 = vadd.f32 %v764_v20, %v458_v25  ;;  %v461_v32 = vadd.f32 %v727_v26, %v121_v29 }
 0x105   :  { %681 = vst [vmem:[%s1043_s3] sm:$0xff] %v680_v28  }
 0x106   :  { %v555_v33 = vmul.f32 0.01, %v523_v31  ;;  %v526_v34 = vadd.f32 %v767_v30, %v461_v32  ;;  %v728_v36 = vpop.f32.mrb[8].mxu0  ;;  %vm547_vm2 = vcmp.gt.f32.partialorder %v523_v31, 0.0 }
 0x107   :  { %v768_v37 = vpop.f32.mrb[8].mxu1  ;;  %v729_v38 = vpop.f32.mrb[9].mxu0 }
 0x108   :  { %vm548_vm3 = vcmp.gt.f32.partialorder %v526_v34, 0.0  ;;  %v556_v39 = vmul.f32 0.01, %v526_v34  ;;  %v730_v40 = vadd.f32 %v729_v38, %v728_v36  ;;  %v769_v41 = vpop.f32.mrb[9].mxu1  ;;  %v731_v42 = vpop.f32.mrb[10].mxu0  ;;  %v563_v46 = vsel %vm547_vm2, %v523_v31, %v555_v33 }
 0x109   :  { %v770_v43 = vadd.f32 %v769_v41, %v768_v37  ;;  %v771_v44 = vpop.f32.mrb[10].mxu1  ;;  %v732_v45 = vpop.f32.mrb[11].mxu0 }
 0x10a   :  { %v564_v47 = vsel %vm548_vm3, %v526_v34, %v556_v39  ;;  %v466_v48 = vadd.f32 %v730_v40, %v126_v35  ;;  %v733_v49 = vadd.f32 %v732_v45, %v731_v42  ;;  %v772_v50 = vpop.f32.mrb[11].mxu1 }
 0x10b   :  { %v685_v51 = vpack.c.bf16 %v564_v47, %v563_v46  ;;  %v773_v53 = vadd.f32 %v772_v50, %v771_v44 }
 0x10c   :  { %v531_v54 = vadd.f32 %v770_v43, %v466_v48  ;;  %v469_v55 = vadd.f32 %v733_v49, %v131_v52 }
 0x10d   :  { %697 = vst [vmem:[%s1043_s3 + $0x8] sm:$0xff] %v685_v51  }
 0x10e   :  { %v557_v57 = vmul.f32 0.01, %v531_v54  ;;  %v534_v58 = vadd.f32 %v773_v53, %v469_v55  ;;  %v734_v59 = vpop.f32.mrb[12].mxu0  ;;  %vm549_vm4 = vcmp.gt.f32.partialorder %v531_v54, 0.0 }
 0x10f   :  { %v774_v60 = vpop.f32.mrb[12].mxu1  ;;  %v735_v61 = vpop.f32.mrb[13].mxu0 }
 0x110   :  { %vm550_vm5 = vcmp.gt.f32.partialorder %v534_v58, 0.0  ;;  %v558_v62 = vmul.f32 0.01, %v534_v58  ;;  %v736_v63 = vadd.f32 %v735_v61, %v734_v59  ;;  %v775_v0 = vpop.f32.mrb[13].mxu1  ;;  %v737_v1 = vpop.f32.mrb[14].mxu0  ;;  %v565_v5 = vsel %vm549_vm4, %v531_v54, %v557_v57 }
 0x111   :  { %v776_v2 = vadd.f32 %v775_v0, %v774_v60  ;;  %v777_v3 = vpop.f32.mrb[14].mxu1  ;;  %v738_v4 = vpop.f32.mrb[15].mxu0 }
 0x112   :  { %v566_v6 = vsel %vm550_vm5, %v534_v58, %v558_v62  ;;  %v474_v7 = vadd.f32 %v736_v63, %v136_v56  ;;  %v739_v8 = vadd.f32 %v738_v4, %v737_v1  ;;  %v778_v9 = vpop.f32.mrb[15].mxu1 }
 0x113   :  { %v690_v11 = vpack.c.bf16 %v566_v6, %v565_v5  ;;  %v779_v12 = vadd.f32 %v778_v9, %v777_v3 }
 0x114   :  { %v539_v13 = vadd.f32 %v776_v2, %v474_v7  ;;  %v477_v14 = vadd.f32 %v739_v8, %v141_v10 }
 0x115   :  { %698 = vst [vmem:[%s1043_s3 + $0x10] sm:$0xff] %v690_v11  }
 0x116   :  { %v559_v15 = vmul.f32 0.01, %v539_v13  ;;  %v542_v16 = vadd.f32 %v779_v12, %v477_v14  ;;  %vm551_vm6 = vcmp.gt.f32.partialorder %v539_v13, 0.0 }
 0x118   :  { %vm552_vm7 = vcmp.gt.f32.partialorder %v542_v16, 0.0  ;;  %v560_v17 = vmul.f32 0.01, %v542_v16  ;;  %v567_v18 = vsel %vm551_vm6, %v539_v13, %v559_v15 }
 0x11a   :  { %v568_v19 = vsel %vm552_vm7, %v542_v16, %v560_v17 }
 0x11b   :  { %v695_v20 = vpack.c.bf16 %v568_v19, %v567_v18 }
 0x11d   :  { %699 = vst [vmem:[%s1043_s3 + $0x18] sm:$0xff] %v695_v20  }

// kernel: _lambda_.7
= control target key start
LH: loop header
LB: loop body
LE: loop exit
PB: predicated region body
PF: predicated region fallthrough
CT: control target
= control target key end

     0   :  { %v555_v28 = vlaneseq  ;;  %v5448_v36 = vmov 1966171168   ;;  %s6698_s0 = inlined_call_operand.vmem [shape: bf16[2,4096], index: 0, kind: input, shape index: {}]   ;;  %s6699_s1 = inlined_call_operand.vmem [shape: bf16[4096,32], index: 1, kind: input, shape index: {}]   ;;  %s6700_s2 = inlined_call_operand.vmem [shape: f32[1,32], index: 2, kind: input, shape index: {}]   ;;  %s6701_s3 = inlined_call_operand.vmem [shape: bf16[32,4096], index: 3, kind: input, shape index: {}]   ;;  %s6702_s4 = inlined_call_operand.vmem [shape: f32[1,4096], index: 4, kind: input, shape index: {}]   ;;  %s6703_s5 = inlined_call_operand.hbm [shape: f32[2,32], index: 5, kind: output, shape index: {0}]   ;;  %s6704_s6 = inlined_call_operand.vmem [shape: bf16[2,4096], index: 6, kind: output, shape index: {1}]  }
   0x1   :  { %v5164_v0 = vld [vmem:[%s6699_s1 + $0x40] sm:$0xff]   ;;  %v5168_v4 = vld [vmem:[%s6699_s1 + $0x48] sm:$0xff]   ;;  %v5172_v8 = vld [vmem:[%s6699_s1 + $0x50] sm:$0xff]   ;;  %v553_v37 = vunpack.c.l.s4 %v5448_v36 }
   0x2   :  { %v5165_v1 = vld [vmem:[%s6699_s1 + $0xc0] sm:$0xff]   ;;  %4809 = vmatprep.subr.bf16.mxu0 %v5164_v0  ;;  %v5169_v5 = vld [vmem:[%s6699_s1 + $0xc8] sm:$0xff]   ;;  %v5173_v9 = vld [vmem:[%s6699_s1 + $0xd0] sm:$0xff]   ;;  %v5582_v33 = vshrl.u32 %v555_v28, 7 }
   0x3   :  { %v5166_v2 = vld [vmem:[%s6699_s1] sm:$0xff]   ;;  %4831 = vmatprep.subr.bf16.mxu1 %v5165_v1  ;;  %v5170_v6 = vld [vmem:[%s6699_s1 + $0x8] sm:$0xff]   ;;  %v5174_v10 = vld [vmem:[%s6699_s1 + $0x10] sm:$0xff]   ;;  %v554_v40 = vunpack.c.0.s8 %v553_v37 }
   0x4   :  { %v5167_v3 = vld [vmem:[%s6699_s1 + $0x80] sm:$0xff]   ;;  %4810 = vmatpush3.bf16.msra.mxu0 %v5166_v2  ;;  %v5171_v7 = vld [vmem:[%s6699_s1 + $0x88] sm:$0xff]   ;;  %v5175_v11 = vld [vmem:[%s6699_s1 + $0x90] sm:$0xff]  }
   0x5   :  { %4832 = vmatpush3.bf16.msra.mxu1 %v5167_v3  ;;  %4811 = vmatprep.subr.bf16.mxu0 %v5168_v4  ;;  %v5176_v12 = vld [vmem:[%s6699_s1 + $0x58] sm:$0xff]   ;;  %v5180_v16 = vld [vmem:[%s6699_s1 + $0x60] sm:$0xff]   ;;  %v5184_v20 = vld [vmem:[%s6699_s1 + $0x68] sm:$0xff]   ;;  %v5594_v41 = vsub.s32 %v554_v40, %v5582_v33 }
   0x6   :  { %4833 = vmatprep.subr.bf16.mxu1 %v5169_v5  ;;  %v5177_v13 = vld [vmem:[%s6699_s1 + $0xd8] sm:$0xff]   ;;  %v5181_v17 = vld [vmem:[%s6699_s1 + $0xe0] sm:$0xff]   ;;  %v5185_v21 = vld [vmem:[%s6699_s1 + $0xe8] sm:$0xff]  }
   0x7   :  { %v5178_v14 = vld [vmem:[%s6699_s1 + $0x18] sm:$0xff]   ;;  %v5182_v18 = vld [vmem:[%s6699_s1 + $0x20] sm:$0xff]   ;;  %v5186_v22 = vld [vmem:[%s6699_s1 + $0x28] sm:$0xff]  }
   0x8   :  { %4812 = vmatpush3.bf16.msra.mxu0 %v5170_v6  ;;  %v5179_v15 = vld [vmem:[%s6699_s1 + $0x98] sm:$0xff]   ;;  %v5183_v19 = vld [vmem:[%s6699_s1 + $0xa0] sm:$0xff]   ;;  %v5187_v23 = vld [vmem:[%s6699_s1 + $0xa8] sm:$0xff]  }
   0x9   :  { %4834 = vmatpush3.bf16.msra.mxu1 %v5171_v7  ;;  %4813 = vmatprep.subr.bf16.mxu0 %v5172_v8  ;;  %v5188_v24 = vld [vmem:[%s6699_s1 + $0x70] sm:$0xff]   ;;  %v5192_v29 = vld [vmem:[%s6699_s1 + $0x78] sm:$0xff]   ;;  %v24_v34 = vld [vmem:[%s6698_s0] sm:$0xff] }
   0xa   :  { %4835 = vmatprep.subr.bf16.mxu1 %v5173_v9  ;;  %v5189_v25 = vld [vmem:[%s6699_s1 + $0xf0] sm:$0xff]   ;;  %v5193_v30 = vld [vmem:[%s6699_s1 + $0xf8] sm:$0xff]   ;;  %v5197_v35 = vld [vmem:[%s6699_s1 + $0x140] sm:$0xff]   ;;  %v551_v39 = vcombine.high %v24_v34, %v24_v34  ;;  %v558_v42 = vrot.slane %v24_v34, %v5594_v41 }
   0xb   :  { %v5190_v26 = vld [vmem:[%s6699_s1 + $0x30] sm:$0xff]   ;;  %v5194_v31 = vld [vmem:[%s6699_s1 + $0x38] sm:$0xff]   ;;  %v5198_v38 = vld [vmem:[%s6699_s1 + $0x1c0] sm:$0xff]  }
   0xc   :  { %4814 = vmatpush3.bf16.msra.mxu0 %v5174_v10  ;;  %v5191_v27 = vld [vmem:[%s6699_s1 + $0xb0] sm:$0xff]   ;;  %v5195_v32 = vld [vmem:[%s6699_s1 + $0xb8] sm:$0xff]   ;;  %v5598_v43 = vrot.slane %v551_v39, %v5594_v41  ;;  %v566_v44 = vcombine.high %v558_v42, %v558_v42  ;;  %v574_v45 = vrot.slane %v558_v42, %v5594_v41  ;;  %v5199_v47 = vld [vmem:[%s6699_s1 + $0x100] sm:$0xff]  }
   0xd   :  { %4836 = vmatpush3.bf16.msra.mxu1 %v5175_v11  ;;  %4815 = vmatprep.subr.bf16.mxu0 %v5176_v12  ;;  %v5200_v49 = vld [vmem:[%s6699_s1 + $0x180] sm:$0xff]   ;;  %v5201_v52 = vld [vmem:[%s6699_s1 + $0x148] sm:$0xff]   ;;  %v5205_v58 = vld [vmem:[%s6699_s1 + $0x150] sm:$0xff]  }
   0xe   :  { %4837 = vmatprep.subr.bf16.mxu1 %v5177_v13  ;;  %v567_v46 = vcombine.high %v5598_v43, %v5598_v43  ;;  %v588_v48 = vrot.slane %v566_v44, %v5594_v41  ;;  %v596_v51 = vcombine.high %v574_v45, %v574_v45  ;;  %v5202_v54 = vld [vmem:[%s6699_s1 + $0x1c8] sm:$0xff]   ;;  %v5206_v59 = vld [vmem:[%s6699_s1 + $0x1d0] sm:$0xff]   ;;  %v5209_v62 = vld [vmem:[%s6699_s1 + $0x158] sm:$0xff]  }
   0xf   :  { %v5203_v55 = vld [vmem:[%s6699_s1 + $0x108] sm:$0xff]   ;;  %v5207_v60 = vld [vmem:[%s6699_s1 + $0x110] sm:$0xff]   ;;  %v5210_v63 = vld [vmem:[%s6699_s1 + $0x1d8] sm:$0xff]  }
  0x10   :  { %4816 = vmatpush3.bf16.msra.mxu0 %v5178_v14  ;;  %v595_v50 = vrot.slane %v567_v46, %v5594_v41  ;;  %2347 = vmatprep.mubr.bf16.mxu0 %v588_v48  ;;  %v598_v53 = vcombine.high %v588_v48, %v588_v48  ;;  %v5204_v57 = vld [vmem:[%s6699_s1 + $0x188] sm:$0xff]   ;;  %v5208_v61 = vld [vmem:[%s6699_s1 + $0x190] sm:$0xff]   ;;  %v5211_v0 = vld [vmem:[%s6699_s1 + $0x118] sm:$0xff]  }
  0x11   :  { %4838 = vmatpush3.bf16.msra.mxu1 %v5179_v15  ;;  %4817 = vmatprep.subr.bf16.mxu0 %v5180_v16  ;;  %v5212_v1 = vld [vmem:[%s6699_s1 + $0x198] sm:$0xff]   ;;  %v5213_v2 = vld [vmem:[%s6699_s1 + $0x160] sm:$0xff]   ;;  %v5217_v6 = vld [vmem:[%s6699_s1 + $0x168] sm:$0xff]  }
  0x12   :  { %4839 = vmatprep.subr.bf16.mxu1 %v5181_v17  ;;  %v599_v56 = vcombine.high %v595_v50, %v595_v50  ;;  %2387 = vmatprep.mubr.bf16.mxu1 %v598_v53  ;;  %v5214_v3 = vld [vmem:[%s6699_s1 + $0x1e0] sm:$0xff]   ;;  %v5218_v7 = vld [vmem:[%s6699_s1 + $0x1e8] sm:$0xff]   ;;  %v5221_v10 = vld [vmem:[%s6699_s1 + $0x170] sm:$0xff]  }
  0x13   :  { %v5215_v4 = vld [vmem:[%s6699_s1 + $0x120] sm:$0xff]   ;;  %v5219_v8 = vld [vmem:[%s6699_s1 + $0x128] sm:$0xff]   ;;  %v5222_v11 = vld [vmem:[%s6699_s1 + $0x1f0] sm:$0xff]  }
  0x14   :  { %4818 = vmatpush3.bf16.msra.mxu0 %v5182_v18  ;;  %v5216_v5 = vld [vmem:[%s6699_s1 + $0x1a0] sm:$0xff]   ;;  %v5220_v9 = vld [vmem:[%s6699_s1 + $0x1a8] sm:$0xff]   ;;  %v5223_v12 = vld [vmem:[%s6699_s1 + $0x130] sm:$0xff]   ;;  %v581_v18 = vrot.slane %v5598_v43, %v5594_v41 }
  0x15   :  { %4840 = vmatpush3.bf16.msra.mxu1 %v5183_v19  ;;  %4819 = vmatprep.subr.bf16.mxu0 %v5184_v20  ;;  %v5224_v13 = vld [vmem:[%s6699_s1 + $0x1b0] sm:$0xff]   ;;  %v5225_v14 = vld [vmem:[%s6699_s1 + $0x178] sm:$0xff]   ;;  %v5229_v19 = vld [vmem:[%s6699_s1 + $0x240] sm:$0xff]  }
  0x16   :  { %4841 = vmatprep.subr.bf16.mxu1 %v5185_v21  ;;  %v5226_v15 = vld [vmem:[%s6699_s1 + $0x1f8] sm:$0xff]   ;;  %v5230_v20 = vld [vmem:[%s6699_s1 + $0x2c0] sm:$0xff]   ;;  %v5237_v28 = vld [vmem:[%s6699_s1 + $0x250] sm:$0xff]  }
  0x17   :  { %v5227_v16 = vld [vmem:[%s6699_s1 + $0x138] sm:$0xff]   ;;  %v5231_v21 = vld [vmem:[%s6699_s1 + $0x200] sm:$0xff]   ;;  %v5249_v42 = vld [vmem:[%s6699_s1 + $0x268] sm:$0xff]  }
  0x18   :  { %4820 = vmatpush3.bf16.msra.mxu0 %v5186_v22  ;;  %v5228_v17 = vld [vmem:[%s6699_s1 + $0x1b8] sm:$0xff]   ;;  %v5232_v22 = vld [vmem:[%s6699_s1 + $0x280] sm:$0xff]   ;;  %v5250_v43 = vld [vmem:[%s6699_s1 + $0x2e8] sm:$0xff]  }
  0x19   :  { %4842 = vmatpush3.bf16.msra.mxu1 %v5187_v23  ;;  %4821 = vmatprep.subr.bf16.mxu0 %v5188_v24  ;;  %v597_v23 = vcombine.high %v581_v18, %v581_v18  ;;  %v5233_v24 = vld [vmem:[%s6699_s1 + $0x248] sm:$0xff]   ;;  %v5242_v34 = vld [vmem:[%s6699_s1 + $0x2d8] sm:$0xff]   ;;  %v5245_v37 = vld [vmem:[%s6699_s1 + $0x260] sm:$0xff]  }
  0x1a   :  { %4843 = vmatprep.subr.bf16.mxu1 %v5189_v25  ;;  %v5234_v25 = vld [vmem:[%s6699_s1 + $0x2c8] sm:$0xff]   ;;  %v5244_v36 = vld [vmem:[%s6699_s1 + $0x298] sm:$0xff]   ;;  %v5247_v39 = vld [vmem:[%s6699_s1 + $0x220] sm:$0xff]  }
  0x1b   :  { %v5248_v40 = vld [vmem:[%s6699_s1 + $0x2a0] sm:$0xff]   ;;  %v5251_v44 = vld [vmem:[%s6699_s1 + $0x228] sm:$0xff]   ;;  %v5253_v46 = vld [vmem:[%s6699_s1 + $0x270] sm:$0xff]  }
  0x1c   :  { %4822 = vmatpush3.bf16.msra.mxu0 %v5190_v26  ;;  %v5235_v26 = vld [vmem:[%s6699_s1 + $0x208] sm:$0xff]   ;;  %v5254_v48 = vld [vmem:[%s6699_s1 + $0x2f0] sm:$0xff]  }
  0x1d   :  { %4844 = vmatpush3.bf16.msra.mxu1 %v5191_v27  ;;  %4823 = vmatprep.subr.bf16.mxu0 %v5192_v29  ;;  %v5236_v27 = vld [vmem:[%s6699_s1 + $0x288] sm:$0xff]   ;;  %v5238_v29 = vld [vmem:[%s6699_s1 + $0x2d0] sm:$0xff]  }
  0x1e   :  { %4845 = vmatprep.subr.bf16.mxu1 %v5193_v30  ;;  %v5239_v30 = vld [vmem:[%s6699_s1 + $0x210] sm:$0xff]  }
  0x20   :  { %4824 = vmatpush3.bf16.msra.mxu0 %v5194_v31  ;;  %v5240_v31 = vld [vmem:[%s6699_s1 + $0x290] sm:$0xff]  }
  0x21   :  { %4846 = vmatpush3.bf16.msra.mxu1 %v5195_v32  ;;  %4853 = vmatprep.subr.bf16.mxu0 %v5197_v35  ;;  %v5241_v32 = vld [vmem:[%s6699_s1 + $0x258] sm:$0xff]  }
  0x22   :  { %4875 = vmatprep.subr.bf16.mxu1 %v5198_v38  ;;  %v5243_v35 = vld [vmem:[%s6699_s1 + $0x218] sm:$0xff]   ;;  %v5246_v38 = vld [vmem:[%s6699_s1 + $0x2e0] sm:$0xff]  }
  0x23   :  { %2348 = vmatmul.mubr.bf16.vlgmr.msra.gmra.mrb[0].mxu0 %v574_v45  ;;  %v5252_v45 = vld [vmem:[%s6699_s1 + $0x2a8] sm:$0xff]  }
  0x24   :  { %4854 = vmatpush3.bf16.msra.mxu0 %v5199_v47  ;;  %2388 = vmatmul.mubr.bf16.vlgmr.msra.gmra.mrb[0].mxu1 %v596_v51  ;;  %v25_v47 = vld [vmem:[%s6698_s0 + $0x8] sm:$0xff]  ;;  %v5255_v51 = vld [vmem:[%s6699_s1 + $0x230] sm:$0xff]  }
  0x25   :  { %4855 = vmatprep.subr.bf16.mxu0 %v5201_v52  ;;  %4876 = vmatpush3.bf16.msra.mxu1 %v5200_v49  ;;  %v607_v49 = vrot.slane %v25_v47, %v5594_v41  ;;  %v5256_v52 = vld [vmem:[%s6699_s1 + $0x2b0] sm:$0xff]  }
  0x26   :  { %2427 = vmatprep.mubr.bf16.mxu0 %v595_v50  ;;  %4877 = vmatprep.subr.bf16.mxu1 %v5202_v54  ;;  %v600_v50 = vcombine.high %v25_v47, %v25_v47  ;;  %v5303_v47 = vld [vmem:[%s6699_s1 + $0x4d0] sm:$0xff]  }
  0x27   :  { %2467 = vmatprep.mubr.bf16.mxu1 %v599_v56  ;;  %v615_v53 = vcombine.high %v607_v49, %v607_v49  ;;  %v5258_v56 = vld [vmem:[%s6699_s1 + $0x2f8] sm:$0xff]  }
  0x28   :  { %4856 = vmatpush3.bf16.msra.mxu0 %v5203_v55  ;;  %v5786_v54 = vrot.slane %v600_v50, %v5594_v41  ;;  %v5257_v55 = vld [vmem:[%s6699_s1 + $0x278] sm:$0xff]  }
  0x29   :  { %4857 = vmatprep.subr.bf16.mxu0 %v5205_v58  ;;  %4878 = vmatpush3.bf16.msra.mxu1 %v5204_v57  ;;  %v637_v57 = vrot.slane %v615_v53, %v5594_v41  ;;  %v5306_v50 = vld [vmem:[%s6699_s1 + $0x458] sm:$0xff]  }
  0x2a   :  { %4879 = vmatprep.subr.bf16.mxu1 %v5206_v59  ;;  %v616_v58 = vcombine.high %v5786_v54, %v5786_v54  ;;  %v5259_v59 = vld [vmem:[%s6699_s1 + $0x238] sm:$0xff]  }
  0x2b   :  { %v5309_v53 = vld [vmem:[%s6699_s1 + $0x498] sm:$0xff]  }
  0x2c   :  { %4858 = vmatpush3.bf16.msra.mxu0 %v5207_v60  ;;  %v5260_v60 = vld [vmem:[%s6699_s1 + $0x2b8] sm:$0xff]  }
  0x2d   :  { %4859 = vmatprep.subr.bf16.mxu0 %v5209_v62  ;;  %4880 = vmatpush3.bf16.msra.mxu1 %v5208_v61  ;;  %v647_v61 = vcombine.high %v637_v57, %v637_v57  ;;  %v623_v62 = vrot.slane %v607_v49, %v5594_v41  ;;  %v5305_v49 = vld [vmem:[%s6699_s1 + $0x490] sm:$0xff]  }
  0x2e   :  { %4881 = vmatprep.subr.bf16.mxu1 %v5210_v63  ;;  %v5261_v63 = vld [vmem:[%s6699_s1 + $0x340] sm:$0xff]  }
  0x30   :  { %4860 = vmatpush3.bf16.msra.mxu0 %v5211_v0  ;;  %v5262_v0 = vld [vmem:[%s6699_s1 + $0x3c0] sm:$0xff]  }
  0x31   :  { %4861 = vmatprep.subr.bf16.mxu0 %v5213_v2  ;;  %4882 = vmatpush3.bf16.msra.mxu1 %v5212_v1  ;;  %v644_v1 = vrot.slane %v616_v58, %v5594_v41  ;;  %v5263_v2 = vld [vmem:[%s6699_s1 + $0x300] sm:$0xff]   ;;  %v5314_v58 = vld [vmem:[%s6699_s1 + $0x468] sm:$0xff]  }
  0x32   :  { %4883 = vmatprep.subr.bf16.mxu1 %v5214_v3  ;;  %v5264_v3 = vld [vmem:[%s6699_s1 + $0x380] sm:$0xff]  }
  0x34   :  { %4862 = vmatpush3.bf16.msra.mxu0 %v5215_v4  ;;  %v645_v4 = vcombine.high %v623_v62, %v623_v62 }
  0x35   :  { %4863 = vmatprep.subr.bf16.mxu0 %v5217_v6  ;;  %4884 = vmatpush3.bf16.msra.mxu1 %v5216_v5  ;;  %v5265_v5 = vld [vmem:[%s6699_s1 + $0x348] sm:$0xff]  }
  0x36   :  { %4885 = vmatprep.subr.bf16.mxu1 %v5218_v7  ;;  %v5266_v6 = vld [vmem:[%s6699_s1 + $0x3c8] sm:$0xff]   ;;  %v648_v7 = vcombine.high %v644_v1, %v644_v1 }
  0x38   :  { %4864 = vmatpush3.bf16.msra.mxu0 %v5219_v8  ;;  %v5267_v8 = vld [vmem:[%s6699_s1 + $0x308] sm:$0xff]  }
  0x39   :  { %4865 = vmatprep.subr.bf16.mxu0 %v5221_v10  ;;  %4886 = vmatpush3.bf16.msra.mxu1 %v5220_v9  ;;  %v5268_v9 = vld [vmem:[%s6699_s1 + $0x388] sm:$0xff]   ;;  %v5269_v10 = vld [vmem:[%s6699_s1 + $0x350] sm:$0xff]  }
  0x3a   :  { %4887 = vmatprep.subr.bf16.mxu1 %v5222_v11  ;;  %v5270_v11 = vld [vmem:[%s6699_s1 + $0x3d0] sm:$0xff]  }
  0x3c   :  { %4866 = vmatpush3.bf16.msra.mxu0 %v5223_v12  ;;  %v5271_v12 = vld [vmem:[%s6699_s1 + $0x310] sm:$0xff]  }
  0x3d   :  { %4867 = vmatprep.subr.bf16.mxu0 %v5225_v14  ;;  %4888 = vmatpush3.bf16.msra.mxu1 %v5224_v13  ;;  %v5272_v13 = vld [vmem:[%s6699_s1 + $0x390] sm:$0xff]   ;;  %v5273_v14 = vld [vmem:[%s6699_s1 + $0x358] sm:$0xff]  }
  0x3e   :  { %4889 = vmatprep.subr.bf16.mxu1 %v5226_v15  ;;  %v5274_v15 = vld [vmem:[%s6699_s1 + $0x3d8] sm:$0xff]  }
  0x40   :  { %4868 = vmatpush3.bf16.msra.mxu0 %v5227_v16  ;;  %v5275_v16 = vld [vmem:[%s6699_s1 + $0x318] sm:$0xff]  }
  0x41   :  { %4897 = vmatprep.subr.bf16.mxu0 %v5229_v19  ;;  %4890 = vmatpush3.bf16.msra.mxu1 %v5228_v17  ;;  %v5276_v17 = vld [vmem:[%s6699_s1 + $0x398] sm:$0xff]   ;;  %v5278_v19 = vld [vmem:[%s6699_s1 + $0x3e0] sm:$0xff]  }
  0x42   :  { %4919 = vmatprep.subr.bf16.mxu1 %v5230_v20  ;;  %v5279_v20 = vld [vmem:[%s6699_s1 + $0x320] sm:$0xff]  }
  0x43   :  { %2428 = vmatmul.mubr.bf16.vlgmr.msra.gmra.mrb[4].mxu0 %v581_v18  ;;  %v5277_v18 = vld [vmem:[%s6699_s1 + $0x360] sm:$0xff]  }
  0x44   :  { %4898 = vmatpush3.bf16.msra.mxu0 %v5231_v21  ;;  %2468 = vmatmul.mubr.bf16.vlgmr.msra.gmra.mrb[4].mxu1 %v597_v23  ;;  %v5280_v21 = vld [vmem:[%s6699_s1 + $0x3a0] sm:$0xff]   ;;  %v5282_v23 = vld [vmem:[%s6699_s1 + $0x3e8] sm:$0xff]  }
  0x45   :  { %4899 = vmatprep.subr.bf16.mxu0 %v5233_v24  ;;  %4920 = vmatpush3.bf16.msra.mxu1 %v5232_v22  ;;  %v5281_v22 = vld [vmem:[%s6699_s1 + $0x368] sm:$0xff]  }
  0x46   :  { %4921 = vmatprep.subr.bf16.mxu1 %v5234_v25  ;;  %2507 = vmatprep.mubr.bf16.mxu0 %v637_v57  ;;  %v5283_v24 = vld [vmem:[%s6699_s1 + $0x328] sm:$0xff]   ;;  %v5313_v57 = vld [vmem:[%s6699_s1 + $0x4a0] sm:$0xff]  }
  0x47   :  { %2547 = vmatprep.mubr.bf16.mxu1 %v647_v61  ;;  %v5284_v25 = vld [vmem:[%s6699_s1 + $0x3a8] sm:$0xff]  }
  0x48   :  { %4900 = vmatpush3.bf16.msra.mxu0 %v5235_v26  ;;  %v5285_v26 = vld [vmem:[%s6699_s1 + $0x370] sm:$0xff]   ;;  %v5317_v61 = vld [vmem:[%s6699_s1 + $0x4a8] sm:$0xff]  }
  0x49   :  { %4901 = vmatprep.subr.bf16.mxu0 %v5237_v28  ;;  %4922 = vmatpush3.bf16.msra.mxu1 %v5236_v27  ;;  %v5286_v27 = vld [vmem:[%s6699_s1 + $0x3f0] sm:$0xff]  }
  0x4a   :  { %4923 = vmatprep.subr.bf16.mxu1 %v5238_v29  ;;  %v5287_v28 = vld [vmem:[%s6699_s1 + $0x330] sm:$0xff]  }
  0x4b   :  { %v5288_v29 = vld [vmem:[%s6699_s1 + $0x3b0] sm:$0xff]  }
  0x4c   :  { %4902 = vmatpush3.bf16.msra.mxu0 %v5239_v30  ;;  %v5289_v30 = vld [vmem:[%s6699_s1 + $0x378] sm:$0xff]  }
  0x4d   :  { %4903 = vmatprep.subr.bf16.mxu0 %v5241_v32  ;;  %4924 = vmatpush3.bf16.msra.mxu1 %v5240_v31  ;;  %v5290_v31 = vld [vmem:[%s6699_s1 + $0x3f8] sm:$0xff]  }
  0x4e   :  { %4925 = vmatprep.subr.bf16.mxu1 %v5242_v34  ;;  %v5291_v32 = vld [vmem:[%s6699_s1 + $0x338] sm:$0xff]  }
  0x4f   :  { %v5292_v34 = vld [vmem:[%s6699_s1 + $0x3b8] sm:$0xff]  }
  0x50   :  { %4904 = vmatpush3.bf16.msra.mxu0 %v5243_v35  ;;  %v630_v35 = vrot.slane %v5786_v54, %v5594_v41  ;;  %v5310_v54 = vld [vmem:[%s6699_s1 + $0x460] sm:$0xff]  }
  0x51   :  { %4905 = vmatprep.subr.bf16.mxu0 %v5245_v37  ;;  %4926 = vmatpush3.bf16.msra.mxu1 %v5244_v36  ;;  %v5294_v36 = vld [vmem:[%s6699_s1 + $0x440] sm:$0xff]  }
  0x52   :  { %4927 = vmatprep.subr.bf16.mxu1 %v5246_v38  ;;  %v5295_v37 = vld [vmem:[%s6699_s1 + $0x4c0] sm:$0xff]  }
  0x53   :  { %v5296_v38 = vld [vmem:[%s6699_s1 + $0x400] sm:$0xff]  }
  0x54   :  { %4906 = vmatpush3.bf16.msra.mxu0 %v5247_v39  ;;  %v5297_v39 = vld [vmem:[%s6699_s1 + $0x480] sm:$0xff]  }
  0x55   :  { %4907 = vmatprep.subr.bf16.mxu0 %v5249_v42  ;;  %4928 = vmatpush3.bf16.msra.mxu1 %v5248_v40  ;;  %v646_v40 = vcombine.high %v630_v35, %v630_v35  ;;  %v5298_v42 = vld [vmem:[%s6699_s1 + $0x448] sm:$0xff]  }
  0x56   :  { %4929 = vmatprep.subr.bf16.mxu1 %v5250_v43  ;;  %v5299_v43 = vld [vmem:[%s6699_s1 + $0x4c8] sm:$0xff]  }
  0x58   :  { %4908 = vmatpush3.bf16.msra.mxu0 %v5251_v44  ;;  %v5300_v44 = vld [vmem:[%s6699_s1 + $0x408] sm:$0xff]  }
  0x59   :  { %4909 = vmatprep.subr.bf16.mxu0 %v5253_v46  ;;  %4930 = vmatpush3.bf16.msra.mxu1 %v5252_v45  ;;  %v5301_v45 = vld [vmem:[%s6699_s1 + $0x488] sm:$0xff]   ;;  %v5302_v46 = vld [vmem:[%s6699_s1 + $0x450] sm:$0xff]  }
  0x5a   :  { %4931 = vmatprep.subr.bf16.mxu1 %v5254_v48  ;;  %v5304_v48 = vld [vmem:[%s6699_s1 + $0x410] sm:$0xff]  }
  0x5c   :  { %4910 = vmatpush3.bf16.msra.mxu0 %v5255_v51  ;;  %v5307_v51 = vld [vmem:[%s6699_s1 + $0x4d8] sm:$0xff]  }
  0x5d   :  { %4911 = vmatprep.subr.bf16.mxu0 %v5257_v55  ;;  %4932 = vmatpush3.bf16.msra.mxu1 %v5256_v52  ;;  %v5308_v52 = vld [vmem:[%s6699_s1 + $0x418] sm:$0xff]   ;;  %v5311_v55 = vld [vmem:[%s6699_s1 + $0x4e0] sm:$0xff]  }
  0x5e   :  { %4933 = vmatprep.subr.bf16.mxu1 %v5258_v56  ;;  %v5312_v56 = vld [vmem:[%s6699_s1 + $0x420] sm:$0xff]  }
  0x60   :  { %4912 = vmatpush3.bf16.msra.mxu0 %v5259_v59  ;;  %v5315_v59 = vld [vmem:[%s6699_s1 + $0x4e8] sm:$0xff]  }
  0x61   :  { %4941 = vmatprep.subr.bf16.mxu0 %v5261_v63  ;;  %4934 = vmatpush3.bf16.msra.mxu1 %v5260_v60  ;;  %v5316_v60 = vld [vmem:[%s6699_s1 + $0x428] sm:$0xff]   ;;  %v26_v63 = vld [vmem:[%s6698_s0 + $0x10] sm:$0xff] }
  0x62   :  { %4963 = vmatprep.subr.bf16.mxu1 %v5262_v0  ;;  %v5319_v0 = vld [vmem:[%s6699_s1 + $0x4f0] sm:$0xff]  }
  0x63   :  { %2508 = vmatmul.mubr.bf16.vlgmr.msra.gmra.mrb[8].mxu0 %v623_v62  ;;  %v5318_v62 = vld [vmem:[%s6699_s1 + $0x470] sm:$0xff]  }
  0x64   :  { %4942 = vmatpush3.bf16.msra.mxu0 %v5263_v2  ;;  %2587 = vmatprep.mubr.bf16.mxu0 %v644_v1  ;;  %v656_v1 = vrot.slane %v26_v63, %v5594_v41  ;;  %v649_v2 = vcombine.high %v26_v63, %v26_v63  ;;  %v5368_v63 = vld [vmem:[%s6699_s1 + $0x6d0] sm:$0xff]  }
  0x65   :  { %2548 = vmatmul.mubr.bf16.vlgmr.msra.gmra.mrb[8].mxu1 %v645_v4  ;;  %4943 = vmatprep.subr.bf16.mxu0 %v5265_v5  ;;  %v5321_v4 = vld [vmem:[%s6699_s1 + $0x4b0] sm:$0xff]  }
  0x66   :  { %4964 = vmatpush3.bf16.msra.mxu1 %v5264_v3  ;;  %2627 = vmatprep.mubr.bf16.mxu1 %v648_v7  ;;  %v5320_v3 = vld [vmem:[%s6699_s1 + $0x430] sm:$0xff]   ;;  %v664_v5 = vcombine.high %v656_v1, %v656_v1  ;;  %v5322_v7 = vld [vmem:[%s6699_s1 + $0x478] sm:$0xff]  }
  0x67   :  { %4965 = vmatprep.subr.bf16.mxu1 %v5266_v6  ;;  %v5992_v6 = vrot.slane %v649_v2, %v5594_v41  ;;  %v5371_v2 = vld [vmem:[%s6699_s1 + $0x658] sm:$0xff]  }
  0x68   :  { %4944 = vmatpush3.bf16.msra.mxu0 %v5267_v8  ;;  %v5323_v8 = vld [vmem:[%s6699_s1 + $0x4f8] sm:$0xff]  }
  0x69   :  { %4945 = vmatprep.subr.bf16.mxu0 %v5269_v10  ;;  %v665_v10 = vcombine.high %v5992_v6, %v5992_v6 }
  0x6a   :  { %4966 = vmatpush3.bf16.msra.mxu1 %v5268_v9  ;;  %v686_v9 = vrot.slane %v664_v5, %v5594_v41  ;;  %v5374_v5 = vld [vmem:[%s6699_s1 + $0x698] sm:$0xff]  }
  0x6b   :  { %4967 = vmatprep.subr.bf16.mxu1 %v5270_v11  ;;  %v5324_v11 = vld [vmem:[%s6699_s1 + $0x438] sm:$0xff]  }
  0x6c   :  { %4946 = vmatpush3.bf16.msra.mxu0 %v5271_v12  ;;  %v5325_v12 = vld [vmem:[%s6699_s1 + $0x4b8] sm:$0xff]  }
  0x6d   :  { %4947 = vmatprep.subr.bf16.mxu0 %v5273_v14  ;;  %v672_v14 = vrot.slane %v656_v1, %v5594_v41  ;;  %v5370_v1 = vld [vmem:[%s6699_s1 + $0x690] sm:$0xff]  }
  0x6e   :  { %4968 = vmatpush3.bf16.msra.mxu1 %v5272_v13  ;;  %v696_v13 = vcombine.high %v686_v9, %v686_v9 }
  0x6f   :  { %4969 = vmatprep.subr.bf16.mxu1 %v5274_v15  ;;  %v5326_v15 = vld [vmem:[%s6699_s1 + $0x540] sm:$0xff]  }
  0x70   :  { %4948 = vmatpush3.bf16.msra.mxu0 %v5275_v16  ;;  %v5327_v16 = vld [vmem:[%s6699_s1 + $0x5c0] sm:$0xff]  }
  0x71   :  { %4949 = vmatprep.subr.bf16.mxu0 %v5277_v18  ;;  %v5328_v18 = vld [vmem:[%s6699_s1 + $0x500] sm:$0xff]  }
  0x72   :  { %4970 = vmatpush3.bf16.msra.mxu1 %v5276_v17  ;;  %v693_v17 = vrot.slane %v665_v10, %v5594_v41  ;;  %v5379_v10 = vld [vmem:[%s6699_s1 + $0x668] sm:$0xff]  }
  0x73   :  { %4971 = vmatprep.subr.bf16.mxu1 %v5278_v19  ;;  %v5329_v19 = vld [vmem:[%s6699_s1 + $0x580] sm:$0xff]  }
  0x74   :  { %4950 = vmatpush3.bf16.msra.mxu0 %v5279_v20  ;;  %v694_v20 = vcombine.high %v672_v14, %v672_v14 }
  0x75   :  { %4951 = vmatprep.subr.bf16.mxu0 %v5281_v22  ;;  %v5331_v22 = vld [vmem:[%s6699_s1 + $0x5c8] sm:$0xff]  }
  0x76   :  { %4972 = vmatpush3.bf16.msra.mxu1 %v5280_v21  ;;  %v5330_v21 = vld [vmem:[%s6699_s1 + $0x548] sm:$0xff]  }
  0x77   :  { %4973 = vmatprep.subr.bf16.mxu1 %v5282_v23  ;;  %v697_v23 = vcombine.high %v693_v17, %v693_v17 }
  0x78   :  { %4952 = vmatpush3.bf16.msra.mxu0 %v5283_v24  ;;  %v5332_v24 = vld [vmem:[%s6699_s1 + $0x508] sm:$0xff]  }
  0x79   :  { %4953 = vmatprep.subr.bf16.mxu0 %v5285_v26  ;;  %v5334_v26 = vld [vmem:[%s6699_s1 + $0x550] sm:$0xff]  }
  0x7a   :  { %4974 = vmatpush3.bf16.msra.mxu1 %v5284_v25  ;;  %v5333_v25 = vld [vmem:[%s6699_s1 + $0x588] sm:$0xff]  }
  0x7b   :  { %4975 = vmatprep.subr.bf16.mxu1 %v5286_v27  ;;  %v5335_v27 = vld [vmem:[%s6699_s1 + $0x5d0] sm:$0xff]  }
  0x7c   :  { %4954 = vmatpush3.bf16.msra.mxu0 %v5287_v28  ;;  %v5336_v28 = vld [vmem:[%s6699_s1 + $0x510] sm:$0xff]  }
  0x7d   :  { %4955 = vmatprep.subr.bf16.mxu0 %v5289_v30  ;;  %v5338_v30 = vld [vmem:[%s6699_s1 + $0x558] sm:$0xff]  }
  0x7e   :  { %4976 = vmatpush3.bf16.msra.mxu1 %v5288_v29  ;;  %v5337_v29 = vld [vmem:[%s6699_s1 + $0x590] sm:$0xff]  }
  0x7f   :  { %4977 = vmatprep.subr.bf16.mxu1 %v5290_v31  ;;  %v5339_v31 = vld [vmem:[%s6699_s1 + $0x5d8] sm:$0xff]  }
  0x80   :  { %4956 = vmatpush3.bf16.msra.mxu0 %v5291_v32  ;;  %v5340_v32 = vld [vmem:[%s6699_s1 + $0x518] sm:$0xff]  }
  0x81   :  { %4985 = vmatprep.subr.bf16.mxu0 %v5294_v36  ;;  %v5343_v36 = vld [vmem:[%s6699_s1 + $0x5e0] sm:$0xff]  }
  0x82   :  { %4978 = vmatpush3.bf16.msra.mxu1 %v5292_v34  ;;  %v5341_v34 = vld [vmem:[%s6699_s1 + $0x598] sm:$0xff]  }
  0x83   :  { %2588 = vmatmul.mubr.bf16.vlgmr.msra.gmra.mrb[12].mxu0 %v630_v35  ;;  %5007 = vmatprep.subr.bf16.mxu1 %v5295_v37  ;;  %v5342_v35 = vld [vmem:[%s6699_s1 + $0x560] sm:$0xff]  }
  0x84   :  { %4986 = vmatpush3.bf16.msra.mxu0 %v5296_v38  ;;  %2667 = vmatprep.mubr.bf16.mxu0 %v686_v9  ;;  %v5344_v37 = vld [vmem:[%s6699_s1 + $0x520] sm:$0xff]  }
  0x85   :  { %2628 = vmatmul.mubr.bf16.vlgmr.msra.gmra.mrb[12].mxu1 %v646_v40  ;;  %4987 = vmatprep.subr.bf16.mxu0 %v5298_v42  ;;  %v5345_v38 = vld [vmem:[%s6699_s1 + $0x5a0] sm:$0xff]   ;;  %v5347_v40 = vld [vmem:[%s6699_s1 + $0x5e8] sm:$0xff]  }
  0x86   :  { %5008 = vmatpush3.bf16.msra.mxu1 %v5297_v39  ;;  %2707 = vmatprep.mubr.bf16.mxu1 %v696_v13  ;;  %v5346_v39 = vld [vmem:[%s6699_s1 + $0x568] sm:$0xff]   ;;  %v5378_v9 = vld [vmem:[%s6699_s1 + $0x6a0] sm:$0xff]  }
  0x87   :  { %5009 = vmatprep.subr.bf16.mxu1 %v5299_v43  ;;  %v5348_v42 = vld [vmem:[%s6699_s1 + $0x528] sm:$0xff]  }
  0x88   :  { %4988 = vmatpush3.bf16.msra.mxu0 %v5300_v44  ;;  %v5349_v43 = vld [vmem:[%s6699_s1 + $0x5a8] sm:$0xff]   ;;  %v5350_v44 = vld [vmem:[%s6699_s1 + $0x570] sm:$0xff]  }
  0x89   :  { %4989 = vmatprep.subr.bf16.mxu0 %v5302_v46  ;;  %v5352_v46 = vld [vmem:[%s6699_s1 + $0x530] sm:$0xff]   ;;  %v5382_v13 = vld [vmem:[%s6699_s1 + $0x6a8] sm:$0xff]  }
  0x8a   :  { %5010 = vmatpush3.bf16.msra.mxu1 %v5301_v45  ;;  %v5351_v45 = vld [vmem:[%s6699_s1 + $0x5f0] sm:$0xff]  }
  0x8b   :  { %5011 = vmatprep.subr.bf16.mxu1 %v5303_v47  ;;  %v5353_v47 = vld [vmem:[%s6699_s1 + $0x5b0] sm:$0xff]  }
  0x8c   :  { %4990 = vmatpush3.bf16.msra.mxu0 %v5304_v48  ;;  %v5354_v48 = vld [vmem:[%s6699_s1 + $0x578] sm:$0xff]  }
  0x8d   :  { %4991 = vmatprep.subr.bf16.mxu0 %v5306_v50  ;;  %v5356_v50 = vld [vmem:[%s6699_s1 + $0x538] sm:$0xff]  }
  0x8e   :  { %5012 = vmatpush3.bf16.msra.mxu1 %v5305_v49  ;;  %v5355_v49 = vld [vmem:[%s6699_s1 + $0x5f8] sm:$0xff]  }
  0x8f   :  { %5013 = vmatprep.subr.bf16.mxu1 %v5307_v51  ;;  %v5357_v51 = vld [vmem:[%s6699_s1 + $0x5b8] sm:$0xff]  }
  0x90   :  { %4992 = vmatpush3.bf16.msra.mxu0 %v5308_v52  ;;  %v679_v52 = vrot.slane %v5992_v6, %v5594_v41  ;;  %v5375_v6 = vld [vmem:[%s6699_s1 + $0x660] sm:$0xff]  }
  0x91   :  { %4993 = vmatprep.subr.bf16.mxu0 %v5310_v54  ;;  %v5360_v54 = vld [vmem:[%s6699_s1 + $0x6c0] sm:$0xff]  }
  0x92   :  { %5014 = vmatpush3.bf16.msra.mxu1 %v5309_v53  ;;  %v5359_v53 = vld [vmem:[%s6699_s1 + $0x640] sm:$0xff]  }
  0x93   :  { %5015 = vmatprep.subr.bf16.mxu1 %v5311_v55  ;;  %v5361_v55 = vld [vmem:[%s6699_s1 + $0x600] sm:$0xff]  }
  0x94   :  { %4994 = vmatpush3.bf16.msra.mxu0 %v5312_v56  ;;  %v5362_v56 = vld [vmem:[%s6699_s1 + $0x680] sm:$0xff]  }
  0x95   :  { %4995 = vmatprep.subr.bf16.mxu0 %v5314_v58  ;;  %v5363_v58 = vld [vmem:[%s6699_s1 + $0x648] sm:$0xff]  }
  0x96   :  { %5016 = vmatpush3.bf16.msra.mxu1 %v5313_v57  ;;  %v695_v57 = vcombine.high %v679_v52, %v679_v52 }
  0x97   :  { %5017 = vmatprep.subr.bf16.mxu1 %v5315_v59  ;;  %v5364_v59 = vld [vmem:[%s6699_s1 + $0x6c8] sm:$0xff]  }
  0x98   :  { %4996 = vmatpush3.bf16.msra.mxu0 %v5316_v60  ;;  %v5365_v60 = vld [vmem:[%s6699_s1 + $0x608] sm:$0xff]  }
  0x99   :  { %4997 = vmatprep.subr.bf16.mxu0 %v5318_v62  ;;  %v5367_v62 = vld [vmem:[%s6699_s1 + $0x650] sm:$0xff]  }
  0x9a   :  { %5018 = vmatpush3.bf16.msra.mxu1 %v5317_v61  ;;  %v5366_v61 = vld [vmem:[%s6699_s1 + $0x688] sm:$0xff]  }
  0x9b   :  { %5019 = vmatprep.subr.bf16.mxu1 %v5319_v0  ;;  %v5369_v0 = vld [vmem:[%s6699_s1 + $0x610] sm:$0xff]  }
  0x9c   :  { %4998 = vmatpush3.bf16.msra.mxu0 %v5320_v3  ;;  %v5372_v3 = vld [vmem:[%s6699_s1 + $0x6d8] sm:$0xff]  }
  0x9d   :  { %4999 = vmatprep.subr.bf16.mxu0 %v5322_v7  ;;  %v5376_v7 = vld [vmem:[%s6699_s1 + $0x6e0] sm:$0xff]  }
  0x9e   :  { %5020 = vmatpush3.bf16.msra.mxu1 %v5321_v4  ;;  %v5373_v4 = vld [vmem:[%s6699_s1 + $0x618] sm:$0xff]  }
  0x9f   :  { %5021 = vmatprep.subr.bf16.mxu1 %v5323_v8  ;;  %v5377_v8 = vld [vmem:[%s6699_s1 + $0x620] sm:$0xff]  }
  0xa0   :  { %5000 = vmatpush3.bf16.msra.mxu0 %v5324_v11  ;;  %v5380_v11 = vld [vmem:[%s6699_s1 + $0x6e8] sm:$0xff]  }
  0xa1   :  { %5029 = vmatprep.subr.bf16.mxu0 %v5326_v15  ;;  %v27_v15 = vld [vmem:[%s6698_s0 + $0x18] sm:$0xff] }
  0xa2   :  { %5022 = vmatpush3.bf16.msra.mxu1 %v5325_v12  ;;  %v5381_v12 = vld [vmem:[%s6699_s1 + $0x628] sm:$0xff]  }
  0xa3   :  { %2668 = vmatmul.mubr.bf16.vlgmr.msra.gmra.mrb[16].mxu0 %v672_v14  ;;  %5051 = vmatprep.subr.bf16.mxu1 %v5327_v16  ;;  %v5383_v14 = vld [vmem:[%s6699_s1 + $0x670] sm:$0xff]  }
  0xa4   :  { %5030 = vmatpush3.bf16.msra.mxu0 %v5328_v18  ;;  %2747 = vmatprep.mubr.bf16.mxu0 %v693_v17  ;;  %v5384_v16 = vld [vmem:[%s6699_s1 + $0x6f0] sm:$0xff]   ;;  %v705_v17 = vrot.slane %v27_v15, %v5594_v41  ;;  %v698_v18 = vcombine.high %v27_v15, %v27_v15 }
  0xa5   :  { %2708 = vmatmul.mubr.bf16.vlgmr.msra.gmra.mrb[16].mxu1 %v694_v20  ;;  %5031 = vmatprep.subr.bf16.mxu0 %v5330_v21  ;;  %v5387_v20 = vld [vmem:[%s6699_s1 + $0x678] sm:$0xff]  }
  0xa6   :  { %5052 = vmatpush3.bf16.msra.mxu1 %v5329_v19  ;;  %2787 = vmatprep.mubr.bf16.mxu1 %v697_v23  ;;  %v5385_v19 = vld [vmem:[%s6699_s1 + $0x630] sm:$0xff]   ;;  %v713_v21 = vcombine.high %v705_v17, %v705_v17 }
  0xa7   :  { %5053 = vmatprep.subr.bf16.mxu1 %v5331_v22  ;;  %v6198_v22 = vrot.slane %v698_v18, %v5594_v41  ;;  %v5386_v23 = vld [vmem:[%s6699_s1 + $0x6b0] sm:$0xff]  }
  0xa8   :  { %5032 = vmatpush3.bf16.msra.mxu0 %v5332_v24  ;;  %v5388_v24 = vld [vmem:[%s6699_s1 + $0x6f8] sm:$0xff]  }
  0xa9   :  { %5033 = vmatprep.subr.bf16.mxu0 %v5334_v26  ;;  %v714_v26 = vcombine.high %v6198_v22, %v6198_v22 }
  0xaa   :  { %5054 = vmatpush3.bf16.msra.mxu1 %v5333_v25  ;;  %v735_v25 = vrot.slane %v713_v21, %v5594_v41 }
  0xab   :  { %5055 = vmatprep.subr.bf16.mxu1 %v5335_v27  ;;  %v5389_v27 = vld [vmem:[%s6699_s1 + $0x638] sm:$0xff]  }
  0xac   :  { %5034 = vmatpush3.bf16.msra.mxu0 %v5336_v28  ;;  %v745_v28 = vcombine.high %v735_v25, %v735_v25 }
  0xad   :  { %5035 = vmatprep.subr.bf16.mxu0 %v5338_v30  ;;  %v5391_v30 = vld [vmem:[%s6699_s1 + $0x740] sm:$0xff]  }
  0xae   :  { %5056 = vmatpush3.bf16.msra.mxu1 %v5337_v29  ;;  %v721_v29 = vrot.slane %v705_v17, %v5594_v41 }
  0xaf   :  { %5057 = vmatprep.subr.bf16.mxu1 %v5339_v31  ;;  %v5390_v31 = vld [vmem:[%s6699_s1 + $0x6b8] sm:$0xff]  }
  0xb0   :  { %5036 = vmatpush3.bf16.msra.mxu0 %v5340_v32  ;;  %v742_v32 = vrot.slane %v714_v26, %v5594_v41 }
  0xb1   :  { %5037 = vmatprep.subr.bf16.mxu0 %v5342_v35  ;;  %v5393_v35 = vld [vmem:[%s6699_s1 + $0x700] sm:$0xff]  }
  0xb2   :  { %5058 = vmatpush3.bf16.msra.mxu1 %v5341_v34  ;;  %v5392_v34 = vld [vmem:[%s6699_s1 + $0x7c0] sm:$0xff]  }
  0xb3   :  { %5059 = vmatprep.subr.bf16.mxu1 %v5343_v36  ;;  %v743_v36 = vcombine.high %v721_v29, %v721_v29 }
  0xb4   :  { %5038 = vmatpush3.bf16.msra.mxu0 %v5344_v37  ;;  %v5395_v37 = vld [vmem:[%s6699_s1 + $0x748] sm:$0xff]  }
  0xb5   :  { %5039 = vmatprep.subr.bf16.mxu0 %v5346_v39  ;;  %v746_v39 = vcombine.high %v742_v32, %v742_v32 }
  0xb6   :  { %5060 = vmatpush3.bf16.msra.mxu1 %v5345_v38  ;;  %v5394_v38 = vld [vmem:[%s6699_s1 + $0x780] sm:$0xff]  }
  0xb7   :  { %5061 = vmatprep.subr.bf16.mxu1 %v5347_v40  ;;  %v5396_v40 = vld [vmem:[%s6699_s1 + $0x7c8] sm:$0xff]  }
  0xb8   :  { %5040 = vmatpush3.bf16.msra.mxu0 %v5348_v42  ;;  %v5397_v42 = vld [vmem:[%s6699_s1 + $0x708] sm:$0xff]  }
  0xb9   :  { %5041 = vmatprep.subr.bf16.mxu0 %v5350_v44  ;;  %v5398_v44 = vld [vmem:[%s6699_s1 + $0x788] sm:$0xff]  }
  0xba   :  { %5062 = vmatpush3.bf16.msra.mxu1 %v5349_v43  ;;  %v5399_v43 = vld [vmem:[%s6699_s1 + $0x750] sm:$0xff]  }
  0xbb   :  { %5063 = vmatprep.subr.bf16.mxu1 %v5351_v45  ;;  %v5400_v45 = vld [vmem:[%s6699_s1 + $0x7d0] sm:$0xff]  }
  0xbc   :  { %5042 = vmatpush3.bf16.msra.mxu0 %v5352_v46  ;;  %v5401_v46 = vld [vmem:[%s6699_s1 + $0x710] sm:$0xff]  }
  0xbd   :  { %5043 = vmatprep.subr.bf16.mxu0 %v5354_v48  ;;  %v5402_v48 = vld [vmem:[%s6699_s1 + $0x790] sm:$0xff]  }
  0xbe   :  { %5064 = vmatpush3.bf16.msra.mxu1 %v5353_v47  ;;  %v5403_v47 = vld [vmem:[%s6699_s1 + $0x758] sm:$0xff]  }
  0xbf   :  { %5065 = vmatprep.subr.bf16.mxu1 %v5355_v49  ;;  %v5404_v49 = vld [vmem:[%s6699_s1 + $0x7d8] sm:$0xff]  }
  0xc0   :  { %5044 = vmatpush3.bf16.msra.mxu0 %v5356_v50  ;;  %v5405_v50 = vld [vmem:[%s6699_s1 + $0x718] sm:$0xff]  }
  0xc1   :  { %5073 = vmatprep.subr.bf16.mxu0 %v5359_v53  ;;  %v5408_v53 = vld [vmem:[%s6699_s1 + $0x7e0] sm:$0xff]  }
  0xc2   :  { %5066 = vmatpush3.bf16.msra.mxu1 %v5357_v51  ;;  %v5407_v51 = vld [vmem:[%s6699_s1 + $0x760] sm:$0xff]  }
  0xc3   :  { %2748 = vmatmul.mubr.bf16.vlgmr.msra.gmra.mrb[20].mxu0 %v679_v52  ;;  %5095 = vmatprep.subr.bf16.mxu1 %v5360_v54  ;;  %v5406_v52 = vld [vmem:[%s6699_s1 + $0x798] sm:$0xff]   ;;  %v5409_v54 = vld [vmem:[%s6699_s1 + $0x720] sm:$0xff]  }
  0xc4   :  { %5074 = vmatpush3.bf16.msra.mxu0 %v5361_v55  ;;  %2827 = vmatprep.mubr.bf16.mxu0 %v735_v25  ;;  %v5411_v55 = vld [vmem:[%s6699_s1 + $0x768] sm:$0xff]  }
  0xc5   :  { %2788 = vmatmul.mubr.bf16.vlgmr.msra.gmra.mrb[20].mxu1 %v695_v57  ;;  %5075 = vmatprep.subr.bf16.mxu0 %v5363_v58  ;;  %v5412_v57 = vld [vmem:[%s6699_s1 + $0x7e8] sm:$0xff]  }
  0xc6   :  { %5096 = vmatpush3.bf16.msra.mxu1 %v5362_v56  ;;  %2867 = vmatprep.mubr.bf16.mxu1 %v745_v28  ;;  %v5410_v56 = vld [vmem:[%s6699_s1 + $0x7a0] sm:$0xff]   ;;  %v5413_v58 = vld [vmem:[%s6699_s1 + $0x728] sm:$0xff]  }
  0xc7   :  { %5097 = vmatprep.subr.bf16.mxu1 %v5364_v59  ;;  %v5415_v59 = vld [vmem:[%s6699_s1 + $0x770] sm:$0xff]  }
  0xc8   :  { %5076 = vmatpush3.bf16.msra.mxu0 %v5365_v60 }
  0xc9   :  { %5077 = vmatprep.subr.bf16.mxu0 %v5367_v62 }
  0xca   :  { %5098 = vmatpush3.bf16.msra.mxu1 %v5366_v61  ;;  %v5414_v61 = vld [vmem:[%s6699_s1 + $0x7a8] sm:$0xff]  }
  0xcb   :  { %5099 = vmatprep.subr.bf16.mxu1 %v5368_v63 }
  0xcc   :  { %5078 = vmatpush3.bf16.msra.mxu0 %v5369_v0 }
  0xcd   :  { %5079 = vmatprep.subr.bf16.mxu0 %v5371_v2 }
  0xce   :  { %5100 = vmatpush3.bf16.msra.mxu1 %v5370_v1 }
  0xcf   :  { %5101 = vmatprep.subr.bf16.mxu1 %v5372_v3 }
  0xd0   :  { %5080 = vmatpush3.bf16.msra.mxu0 %v5373_v4 }
  0xd1   :  { %5081 = vmatprep.subr.bf16.mxu0 %v5375_v6 }
  0xd2   :  { %5102 = vmatpush3.bf16.msra.mxu1 %v5374_v5 }
  0xd3   :  { %5103 = vmatprep.subr.bf16.mxu1 %v5376_v7 }
  0xd4   :  { %5082 = vmatpush3.bf16.msra.mxu0 %v5377_v8 }
  0xd5   :  { %5083 = vmatprep.subr.bf16.mxu0 %v5379_v10 }
  0xd6   :  { %5104 = vmatpush3.bf16.msra.mxu1 %v5378_v9 }
  0xd7   :  { %5105 = vmatprep.subr.bf16.mxu1 %v5380_v11 }
  0xd8   :  { %5084 = vmatpush3.bf16.msra.mxu0 %v5381_v12 }
  0xd9   :  { %5085 = vmatprep.subr.bf16.mxu0 %v5383_v14 }
  0xda   :  { %5106 = vmatpush3.bf16.msra.mxu1 %v5382_v13 }
  0xdb   :  { %5107 = vmatprep.subr.bf16.mxu1 %v5384_v16 }
  0xdc   :  { %5086 = vmatpush3.bf16.msra.mxu0 %v5385_v19 }
  0xdd   :  { %5087 = vmatprep.subr.bf16.mxu0 %v5387_v20 }
  0xde   :  { %5108 = vmatpush3.bf16.msra.mxu1 %v5386_v23 }
  0xdf   :  { %5109 = vmatprep.subr.bf16.mxu1 %v5388_v24 }
  0xe0   :  { %5088 = vmatpush3.bf16.msra.mxu0 %v5389_v27 }
  0xe1   :  { %5117 = vmatprep.subr.bf16.mxu0 %v5391_v30 }
  0xe2   :  { %5110 = vmatpush3.bf16.msra.mxu1 %v5390_v31 }
  0xe3   :  { %2828 = vmatmul.mubr.bf16.vlgmr.msra.gmra.mrb[24].mxu0 %v721_v29  ;;  %5139 = vmatprep.subr.bf16.mxu1 %v5392_v34 }
  0xe4   :  { %5118 = vmatpush3.bf16.msra.mxu0 %v5393_v35  ;;  %2907 = vmatprep.mubr.bf16.mxu0 %v742_v32 }
  0xe5   :  { %2868 = vmatmul.mubr.bf16.vlgmr.msra.gmra.mrb[24].mxu1 %v743_v36  ;;  %5119 = vmatprep.subr.bf16.mxu0 %v5395_v37 }
  0xe6   :  { %5140 = vmatpush3.bf16.msra.mxu1 %v5394_v38  ;;  %2947 = vmatprep.mubr.bf16.mxu1 %v746_v39 }
  0xe7   :  { %5141 = vmatprep.subr.bf16.mxu1 %v5396_v40 }
  0xe8   :  { %5120 = vmatpush3.bf16.msra.mxu0 %v5397_v42 }
  0xe9   :  { %5121 = vmatprep.subr.bf16.mxu0 %v5399_v43 }
  0xea   :  { %5142 = vmatpush3.bf16.msra.mxu1 %v5398_v44 }
  0xeb   :  { %5143 = vmatprep.subr.bf16.mxu1 %v5400_v45 }
  0xec   :  { %5122 = vmatpush3.bf16.msra.mxu0 %v5401_v46 }
  0xed   :  { %5123 = vmatprep.subr.bf16.mxu0 %v5403_v47 }
  0xee   :  { %5144 = vmatpush3.bf16.msra.mxu1 %v5402_v48 }
  0xef   :  { %5145 = vmatprep.subr.bf16.mxu1 %v5404_v49 }
  0xf0   :  { %5124 = vmatpush3.bf16.msra.mxu0 %v5405_v50 }
  0xf1   :  { %5125 = vmatprep.subr.bf16.mxu0 %v5407_v51 }
  0xf2   :  { %5146 = vmatpush3.bf16.msra.mxu1 %v5406_v52 }
  0xf3   :  { %5147 = vmatprep.subr.bf16.mxu1 %v5408_v53 }
  0xf4   :  { %5126 = vmatpush3.bf16.msra.mxu0 %v5409_v54 }
  0xf5   :  { %5127 = vmatprep.subr.bf16.mxu0 %v5411_v55 }
  0xf6   :  { %5148 = vmatpush3.bf16.msra.mxu1 %v5410_v56  ;;  %v4825_v60 = vpop.f32.mrb[0].mxu0 }
  0xf7   :  { %12 = vsyncpa [#allocation3], 0  ;;  %v4456_v62 = vld [vmem:[%s6700_s2] ss:$0 sm:$0xff]  ;;  %v4826_v63 = vpop.f32.mrb[1].mxu0  ;;  %5149 = vmatprep.subr.bf16.mxu1 %v5412_v57  ;;  %v5416_v0 = vld [vmem:[%s6699_s1 + $0x7f0] sm:$0xff]   ;;  %v728_v16 = vrot.slane %v6198_v22, %v5594_v41 }
  0xf8   :  { %v4847_v1 = vpop.f32.mrb[0].mxu1  ;;  %v4827_v2 = vadd.f32 %v4826_v63, %v4825_v60  ;;  %v4828_v3 = vpop.f32.mrb[2].mxu0  ;;  %5128 = vmatpush3.bf16.msra.mxu0 %v5413_v58  ;;  %v5417_v4 = vld [vmem:[%s6699_s1 + $0x730] sm:$0xff]   ;;  %v5419_v7 = vld [vmem:[%s6699_s1 + $0x778] sm:$0xff]   ;;  %v2958_v47 = vld [vmem:[%s6701_s3] sm:$0xff]  ;;  %vm2955_vm0 = vcmask 254976  }
  0xf9   :  { %v4848_v5 = vpop.f32.mrb[1].mxu1  ;;  %v4829_v6 = vpop.f32.mrb[3].mxu0  ;;  %5129 = vmatprep.subr.bf16.mxu0 %v5415_v59  ;;  %v5418_v11 = vld [vmem:[%s6699_s1 + $0x7b0] sm:$0xff]   ;;  %v5420_v13 = vld [vmem:[%s6699_s1 + $0x7f8] sm:$0xff]   ;;  %v744_v18 = vcombine.high %v728_v16, %v728_v16  ;;  %v2974_v48 = vld [vmem:[%s6701_s3 + $0x80] sm:$0xff]  ;;  %vm3510_vm1 = vcmask 261120  }
  0xfa   :  { %v2350_v8 = vadd.f32 %v4827_v2, %v4456_v62  ;;  %v4849_v9 = vadd.f32 %v4848_v5, %v4847_v1  ;;  %v4850_v10 = vpop.f32.mrb[2].mxu1  ;;  %5150 = vmatpush3.bf16.msra.mxu1 %v5414_v61  ;;  %v5421_v15 = vld [vmem:[%s6699_s1 + $0x738] sm:$0xff]   ;;  %v2959_v49 = vld [vmem:[%s6701_s3 + $0x8] sm:$0xff]  ;;  %v4714_v53 = vcombine.high %v2958_v47, %v2974_v48  ;;  %v4713_v57 = vcombine.low %v2958_v47, %v2974_v48  ;;  %v3006_v1 = vld [vmem:[%s6701_s3 + $0x180] sm:$0xff] }
  0xfb   :  { %v4851_v12 = vpop.f32.mrb[3].mxu1  ;;  %5151 = vmatprep.subr.bf16.mxu1 %v5416_v0  ;;  %v5422_v17 = vld [vmem:[%s6699_s1 + $0x7b8] sm:$0xff]   ;;  %v2975_v54 = vld [vmem:[%s6701_s3 + $0x88] sm:$0xff]  ;;  %v2990_v0 = vld [vmem:[%s6701_s3 + $0x100] sm:$0xff] }
  0xfc   :  { %v2390_v14 = vadd.f32 %v4849_v9, %v2350_v8  ;;  %5130 = vmatpush3.bf16.msra.mxu0 %v5417_v4  ;;  %v4715_v58 = vcombine.low %v2959_v49, %v2975_v54  ;;  %v4716_v59 = vcombine.high %v2959_v49, %v2975_v54  ;;  %v2991_v2 = vld [vmem:[%s6701_s3 + $0x108] sm:$0xff]  ;;  %v4746_v4 = vcombine.high %v2990_v0, %v3006_v1  ;;  %v6345_v9 = vld [vmem:[%s6701_s3 + $0x10] sm:$0xff] }
  0xfd   :  { %5131 = vmatprep.subr.bf16.mxu0 %v5419_v7  ;;  %v3007_v5 = vld [vmem:[%s6701_s3 + $0x188] sm:$0xff]  ;;  %v4745_v6 = vcombine.low %v2990_v0, %v3006_v1  ;;  %v6350_v10 = vld [vmem:[%s6701_s3 + $0x90] sm:$0xff] }
  0xfe   :  { %5152 = vmatpush3.bf16.msra.mxu1 %v5418_v11  ;;  %v4747_v7 = vcombine.low %v2991_v2, %v3007_v5  ;;  %v4748_v8 = vcombine.high %v2991_v2, %v3007_v5  ;;  %v6355_v11 = vld [vmem:[%s6701_s3 + $0x18] sm:$0xff]  ;;  %v4717_v12 = vcombine.low %v6345_v9, %v6350_v10  ;;  %v2992_v2 = vld [vmem:[%s6701_s3 + $0x110] sm:$0xff] }
  0xff   :  { %5153 = vmatprep.subr.bf16.mxu1 %v5420_v13  ;;  %v4718_v13 = vcombine.high %v6345_v9, %v6350_v10  ;;  %v2993_v5 = vld [vmem:[%s6701_s3 + $0x118] sm:$0xff]  ;;  %v3010_v9 = vld [vmem:[%s6701_s3 + $0x1a0] sm:$0xff]  ;;  %v2995_v10 = vld [vmem:[%s6701_s3 + $0x128] sm:$0xff] }
 0x100   :  { %5132 = vmatpush3.bf16.msra.mxu0 %v5421_v15  ;;  %v5449_v15 = vmov 0  }
 0x101   :  { %3514 = vmatprep.subr.bf16.mxu0 %v4714_v53 }
 0x102   :  { %5154 = vmatpush3.bf16.msra.mxu1 %v5422_v17 }
 0x103   :  { %2908 = vmatmul.mubr.bf16.vlgmr.msra.gmra.mrb[28].mxu0 %v728_v16  ;;  %3555 = vmatprep.subr.bf16.mxu1 %v4716_v59 }
 0x104   :  { %3515 = vmatpush1.bf16.msra.mxu0 %v4713_v57  ;;  %3546 = vmatprep.mubr.bf16.mxu0 %v5449_v15 }
 0x105   :  { %2948 = vmatmul.mubr.bf16.vlgmr.msra.gmra.mrb[28].mxu1 %v744_v18  ;;  %3516 = vmatprep.subr.bf16.mxu0 %v4746_v4  ;;  %v3008_v4 = vld [vmem:[%s6701_s3 + $0x190] sm:$0xff] }
 0x106   :  { %3556 = vmatpush1.bf16.msra.mxu1 %v4715_v58  ;;  %3587 = vmatprep.mubr.bf16.mxu1 %v5449_v15 }
 0x107   :  { %3557 = vmatprep.subr.bf16.mxu1 %v4748_v8 }
 0x108   :  { %3517 = vmatpush1.bf16.msra.mxu0 %v4745_v6  ;;  %v3009_v6 = vld [vmem:[%s6701_s3 + $0x198] sm:$0xff] }
 0x109   :  { %3596 = vmatprep.subr.bf16.mxu0 %v4718_v13  ;;  %v4750_v13 = vcombine.high %v2992_v2, %v3008_v4 }
 0x10a   :  { %3558 = vmatpush1.bf16.msra.mxu1 %v4747_v7 }
 0x116   :  { %v4869_v19 = vpop.f32.mrb[4].mxu0 }
 0x117   :  { %v4870_v20 = vpop.f32.mrb[5].mxu0  ;;  %v4891_v21 = vpop.f32.mrb[4].mxu1 }
 0x118   :  { %v4871_v23 = vadd.f32 %v4870_v20, %v4869_v19  ;;  %v4872_v24 = vpop.f32.mrb[6].mxu0  ;;  %v4892_v25 = vpop.f32.mrb[5].mxu1 }
 0x119   :  { %v4873_v26 = vpop.f32.mrb[7].mxu0  ;;  %v4893_v22 = vadd.f32 %v4892_v25, %v4891_v21  ;;  %v4894_v28 = vpop.f32.mrb[6].mxu1 }
 0x11a   :  { %v2430_v27 = vadd.f32 %v4871_v23, %v2390_v14  ;;  %v4895_v29 = vpop.f32.mrb[7].mxu1  ;;  %v6364_v14 = vld [vmem:[%s6701_s3 + $0x98] sm:$0xff] }
 0x11b   :  { %v4719_v16 = vcombine.low %v6355_v11, %v6364_v14  ;;  %v4720_v17 = vcombine.high %v6355_v11, %v6364_v14  ;;  %v3011_v11 = vld [vmem:[%s6701_s3 + $0x1a8] sm:$0xff] }
 0x11c   :  { %v2470_v30 = vadd.f32 %v4893_v22, %v2430_v27 }
 0x11d   :  { %3637 = vmatprep.subr.bf16.mxu1 %v4720_v17  ;;  %v4752_v17 = vcombine.high %v2993_v5, %v3009_v6 }
 0x136   :  { %v4913_v31 = vpop.f32.mrb[8].mxu0 }
 0x137   :  { %v4914_v32 = vpop.f32.mrb[9].mxu0 }
 0x138   :  { %v4935_v34 = vpop.f32.mrb[8].mxu1  ;;  %v4915_v35 = vadd.f32 %v4914_v32, %v4913_v31  ;;  %v4916_v36 = vpop.f32.mrb[10].mxu0 }
 0x139   :  { %v4936_v37 = vpop.f32.mrb[9].mxu1  ;;  %v4917_v38 = vpop.f32.mrb[11].mxu0 }
 0x13a   :  { %v2510_v39 = vadd.f32 %v4915_v35, %v2470_v30  ;;  %v4937_v40 = vadd.f32 %v4936_v37, %v4935_v34  ;;  %v4938_v42 = vpop.f32.mrb[10].mxu1 }
 0x13b   :  { %v4939_v43 = vpop.f32.mrb[11].mxu1 }
 0x13c   :  { %v2550_v44 = vadd.f32 %v4937_v40, %v2510_v39 }
 0x156   :  { %v4957_v45 = vpop.f32.mrb[12].mxu0 }
 0x157   :  { %v4958_v46 = vpop.f32.mrb[13].mxu0 }
 0x158   :  { %v4979_v50 = vpop.f32.mrb[12].mxu1  ;;  %v4959_v51 = vadd.f32 %v4958_v46, %v4957_v45  ;;  %v4960_v52 = vpop.f32.mrb[14].mxu0 }
 0x159   :  { %v4980_v55 = vpop.f32.mrb[13].mxu1  ;;  %v4961_v56 = vpop.f32.mrb[15].mxu0 }
 0x15a   :  { %v2590_v60 = vadd.f32 %v4959_v51, %v2550_v44  ;;  %v4981_v61 = vadd.f32 %v4980_v55, %v4979_v50  ;;  %v4982_v62 = vpop.f32.mrb[14].mxu1 }
 0x15b   :  { %v4983_v63 = vpop.f32.mrb[15].mxu1 }
 0x15c   :  { %v2630_v3 = vadd.f32 %v4981_v61, %v2590_v60 }
 0x176   :  { %v5001_v18 = vpop.f32.mrb[16].mxu0 }
 0x177   :  { %v5002_v19 = vpop.f32.mrb[17].mxu0 }
 0x178   :  { %v5023_v20 = vpop.f32.mrb[16].mxu1  ;;  %v5003_v21 = vadd.f32 %v5002_v19, %v5001_v18  ;;  %v5004_v23 = vpop.f32.mrb[18].mxu0  ;;  %v2962_v18 = vld [vmem:[%s6701_s3 + $0x20] sm:$0xff] }
 0x179   :  { %v5024_v24 = vpop.f32.mrb[17].mxu1  ;;  %v5005_v25 = vpop.f32.mrb[19].mxu0  ;;  %v2978_v19 = vld [vmem:[%s6701_s3 + $0xa0] sm:$0xff]  ;;  %v4749_v23 = vcombine.low %v2992_v2, %v3008_v4 }
 0x17a   :  { %v2670_v26 = vadd.f32 %v5003_v21, %v2630_v3  ;;  %v5025_v27 = vadd.f32 %v5024_v24, %v5023_v20  ;;  %v5026_v22 = vpop.f32.mrb[18].mxu1  ;;  %v2963_v20 = vld [vmem:[%s6701_s3 + $0x28] sm:$0xff]  ;;  %v4751_v24 = vcombine.low %v2993_v5, %v3009_v6  ;;  %v4722_v25 = vcombine.high %v2962_v18, %v2978_v19  ;;  %v3000_v6 = vld [vmem:[%s6701_s3 + $0x150] sm:$0xff] }
 0x17b   :  { %v5027_v28 = vpop.f32.mrb[19].mxu1  ;;  %v2979_v21 = vld [vmem:[%s6701_s3 + $0xa8] sm:$0xff]  ;;  %v4756_v22 = vcombine.high %v2995_v10, %v3011_v11 }
 0x17c   :  { %v2710_v29 = vadd.f32 %v5025_v27, %v2670_v26  ;;  %v4724_v26 = vcombine.high %v2963_v20, %v2979_v21  ;;  %v2994_v27 = vld [vmem:[%s6701_s3 + $0x120] sm:$0xff]  ;;  %v4723_v14 = vcombine.low %v2963_v20, %v2979_v21  ;;  %v2964_v28 = vld [vmem:[%s6701_s3 + $0x30] sm:$0xff] }
 0x196   :  { %v5045_v30 = vpop.f32.mrb[20].mxu0 }
 0x197   :  { %v5046_v31 = vpop.f32.mrb[21].mxu0 }
 0x198   :  { %v5067_v32 = vpop.f32.mrb[20].mxu1  ;;  %v5047_v34 = vadd.f32 %v5046_v31, %v5045_v30  ;;  %v5048_v35 = vpop.f32.mrb[22].mxu0  ;;  %v2965_v30 = vld [vmem:[%s6701_s3 + $0x38] sm:$0xff] }
 0x199   :  { %v5068_v36 = vpop.f32.mrb[21].mxu1  ;;  %v5049_v37 = vpop.f32.mrb[23].mxu0  ;;  %v2981_v31 = vld [vmem:[%s6701_s3 + $0xb8] sm:$0xff] }
 0x19a   :  { %v2750_v38 = vadd.f32 %v5047_v34, %v2710_v29  ;;  %v5069_v39 = vadd.f32 %v5068_v36, %v5067_v32  ;;  %v5070_v40 = vpop.f32.mrb[22].mxu1  ;;  %v2980_v29 = vld [vmem:[%s6701_s3 + $0xb0] sm:$0xff]  ;;  %v4753_v32 = vcombine.low %v2994_v27, %v3010_v9  ;;  %v4755_v34 = vcombine.low %v2995_v10, %v3011_v11 }
 0x19b   :  { %v5071_v42 = vpop.f32.mrb[23].mxu1  ;;  %v4726_v35 = vcombine.high %v2964_v28, %v2980_v29  ;;  %v4728_v36 = vcombine.high %v2965_v30, %v2981_v31  ;;  %v2996_v37 = vld [vmem:[%s6701_s3 + $0x130] sm:$0xff]  ;;  %v3013_v40 = vld [vmem:[%s6701_s3 + $0x1b8] sm:$0xff] }
 0x19c   :  { %v2790_v43 = vadd.f32 %v5069_v39, %v2750_v38  ;;  %v3012_v38 = vld [vmem:[%s6701_s3 + $0x1b0] sm:$0xff]  ;;  %v2997_v39 = vld [vmem:[%s6701_s3 + $0x138] sm:$0xff]  ;;  %v4725_v42 = vcombine.low %v2964_v28, %v2980_v29 }
 0x1b6   :  { %v5089_v44 = vpop.f32.mrb[24].mxu0 }
 0x1b7   :  { %v5090_v45 = vpop.f32.mrb[25].mxu0 }
 0x1b8   :  { %v5111_v46 = vpop.f32.mrb[24].mxu1  ;;  %v5091_v47 = vadd.f32 %v5090_v45, %v5089_v44  ;;  %v5092_v48 = vpop.f32.mrb[26].mxu0  ;;  %v4758_v44 = vcombine.high %v2996_v37, %v3012_v38  ;;  %v4760_v45 = vcombine.high %v2997_v39, %v3013_v40 }
 0x1b9   :  { %v5112_v49 = vpop.f32.mrb[25].mxu1  ;;  %v5093_v50 = vpop.f32.mrb[27].mxu0  ;;  %v2967_v48 = vld [vmem:[%s6701_s3 + $0x48] sm:$0xff] }
 0x1ba   :  { %v2830_v51 = vadd.f32 %v5091_v47, %v2790_v43  ;;  %v5113_v52 = vadd.f32 %v5112_v49, %v5111_v46  ;;  %v5114_v53 = vpop.f32.mrb[26].mxu1  ;;  %v4727_v43 = vcombine.low %v2965_v30, %v2981_v31  ;;  %v2966_v46 = vld [vmem:[%s6701_s3 + $0x40] sm:$0xff]  ;;  %v2983_v49 = vld [vmem:[%s6701_s3 + $0xc8] sm:$0xff]  ;;  %v4757_v50 = vcombine.low %v2996_v37, %v3012_v38 }
 0x1bb   :  { %v5115_v54 = vpop.f32.mrb[27].mxu1  ;;  %v2982_v47 = vld [vmem:[%s6701_s3 + $0xc0] sm:$0xff]  ;;  %v4732_v53 = vcombine.high %v2967_v48, %v2983_v49 }
 0x1bc   :  { %v2870_v55 = vadd.f32 %v5113_v52, %v2830_v51  ;;  %v4759_v51 = vcombine.low %v2997_v39, %v3013_v40  ;;  %v4730_v52 = vcombine.high %v2966_v46, %v2982_v47  ;;  %v2998_v54 = vld [vmem:[%s6701_s3 + $0x140] sm:$0xff] }
 0x1d6   :  { %v5133_v56 = vpop.f32.mrb[28].mxu0 }
 0x1d7   :  { %v5134_v57 = vpop.f32.mrb[29].mxu0 }
 0x1d8   :  { %v5155_v58 = vpop.f32.mrb[28].mxu1  ;;  %v5135_v59 = vadd.f32 %v5134_v57, %v5133_v56  ;;  %v5136_v60 = vpop.f32.mrb[30].mxu0  ;;  %v2999_v56 = vld [vmem:[%s6701_s3 + $0x148] sm:$0xff] }
 0x1d9   :  { %v5156_v61 = vpop.f32.mrb[29].mxu1  ;;  %v5137_v62 = vpop.f32.mrb[31].mxu0  ;;  %v3015_v57 = vld [vmem:[%s6701_s3 + $0x1c8] sm:$0xff] }
 0x1da   :  { %v2910_v63 = vadd.f32 %v5135_v59, %v2870_v55  ;;  %v5157_v0 = vadd.f32 %v5156_v61, %v5155_v58  ;;  %v5158_v1 = vpop.f32.mrb[30].mxu1  ;;  %v3014_v55 = vld [vmem:[%s6701_s3 + $0x1c0] sm:$0xff]  ;;  %v4729_v58 = vcombine.low %v2966_v46, %v2982_v47  ;;  %v4731_v59 = vcombine.low %v2967_v48, %v2983_v49  ;;  %v2968_v62 = vld [vmem:[%s6701_s3 + $0x50] sm:$0xff] }
 0x1db   :  { %v5159_v3 = vpop.f32.mrb[31].mxu1  ;;  %v4762_v60 = vcombine.high %v2998_v54, %v3014_v55  ;;  %v4764_v61 = vcombine.high %v2999_v56, %v3015_v57  ;;  %v2985_v1 = vld [vmem:[%s6701_s3 + $0xd8] sm:$0xff]  ;;  %v4761_v2 = vcombine.low %v2998_v54, %v3014_v55 }
 0x1dc   :  { %v2950_v7 = vadd.f32 %v5157_v0, %v2910_v63  ;;  %v2984_v63 = vld [vmem:[%s6701_s3 + $0xd0] sm:$0xff]  ;;  %v2969_v0 = vld [vmem:[%s6701_s3 + $0x58] sm:$0xff]  ;;  %v4763_v3 = vcombine.low %v2999_v56, %v3015_v57 }
 0x1dd   :  { %v4734_v4 = vcombine.high %v2968_v62, %v2984_v63  ;;  %v4736_v5 = vcombine.high %v2969_v0, %v2985_v1 }
 0x1de   :  { %v6384_v8 = vpack.c.bf16 %v2950_v7, %v2950_v7  ;;  %2956 = vst.msk [vmem:[#allocation2] sm:$0x3] %vm2955_vm0, %v2950_v7  ;;  %v3016_v7 = vld [vmem:[%s6701_s3 + $0x1d0] sm:$0xff] }
 0x1df   :  { %v4766_v20 = vcombine.high %v3000_v6, %v3016_v7 }
 0x1e0   :  { %4777 = vmatmul.mubr.msk.bf16.vlgmr.msra.gmra.mrb[32].mxu0 %vm3510_vm1, %v6384_v8  ;;  %4778 = vmatmul.mubr.msk.bf16.vlgmr.msra.gmra.mrb[32].mxu1 %vm3510_vm1, %v6384_v8 }
 0x1e1   :  { %3597 = vmatpush1.bf16.msra.mxu0 %v4717_v12  ;;  %3638 = vmatpush1.bf16.msra.mxu1 %v4719_v16  ;;  %v4721_v12 = vcombine.low %v2962_v18, %v2978_v19  ;;  %v4754_v16 = vcombine.high %v2994_v27, %v3010_v9  ;;  %v4733_v18 = vcombine.low %v2968_v62, %v2984_v63 }
 0x1e2   :  { %3598 = vmatprep.subr.bf16.mxu0 %v4750_v13  ;;  %3639 = vmatprep.subr.bf16.mxu1 %v4752_v17  ;;  %v3001_v13 = vld [vmem:[%s6701_s3 + $0x158] sm:$0xff]  ;;  %v4735_v19 = vcombine.low %v2969_v0, %v2985_v1  ;;  %v4765_v27 = vcombine.low %v3000_v6, %v3016_v7 }
 0x1e3   :  { %3628 = vmatprep.mubr.bf16.mxu0 %v5449_v15  ;;  %3669 = vmatprep.mubr.bf16.mxu1 %v5449_v15  ;;  %v3017_v17 = vld [vmem:[%s6701_s3 + $0x1d8] sm:$0xff] }
 0x1e4   :  { %v4768_v21 = vcombine.high %v3001_v13, %v3017_v17  ;;  %v4767_v9 = vcombine.low %v3001_v13, %v3017_v17 }
 0x1e5   :  { %3599 = vmatpush1.bf16.msra.mxu0 %v4749_v23  ;;  %3640 = vmatpush1.bf16.msra.mxu1 %v4751_v24  ;;  %v2970_v23 = vld [vmem:[%s6701_s3 + $0x60] sm:$0xff] }
 0x1e6   :  { %3678 = vmatprep.subr.bf16.mxu0 %v4722_v25  ;;  %3719 = vmatprep.subr.bf16.mxu1 %v4724_v26  ;;  %v2986_v24 = vld [vmem:[%s6701_s3 + $0xe0] sm:$0xff]  ;;  %v2971_v25 = vld [vmem:[%s6701_s3 + $0x68] sm:$0xff] }
 0x1e7   :  { %v2987_v26 = vld [vmem:[%s6701_s3 + $0xe8] sm:$0xff]  ;;  %v4738_v10 = vcombine.high %v2970_v23, %v2986_v24  ;;  %v4737_v28 = vcombine.low %v2970_v23, %v2986_v24 }
 0x1e8   :  { %4779 = vmatmul.mubr.msk.bf16.vlgmr.msra.gmra.mrb[36].mxu0 %vm3510_vm1, %v6384_v8  ;;  %4780 = vmatmul.mubr.msk.bf16.vlgmr.msra.gmra.mrb[36].mxu1 %vm3510_vm1, %v6384_v8  ;;  %v4740_v11 = vcombine.high %v2971_v25, %v2987_v26  ;;  %v4739_v29 = vcombine.low %v2971_v25, %v2987_v26 }
 0x1e9   :  { %3679 = vmatpush1.bf16.msra.mxu0 %v4721_v12  ;;  %3720 = vmatpush1.bf16.msra.mxu1 %v4723_v14  ;;  %v3002_v12 = vld [vmem:[%s6701_s3 + $0x160] sm:$0xff] }
 0x1ea   :  { %3680 = vmatprep.subr.bf16.mxu0 %v4754_v16  ;;  %3721 = vmatprep.subr.bf16.mxu1 %v4756_v22  ;;  %v3018_v14 = vld [vmem:[%s6701_s3 + $0x1e0] sm:$0xff]  ;;  %v3003_v16 = vld [vmem:[%s6701_s3 + $0x168] sm:$0xff] }
 0x1eb   :  { %3710 = vmatprep.mubr.bf16.mxu0 %v5449_v15  ;;  %3751 = vmatprep.mubr.bf16.mxu1 %v5449_v15  ;;  %v3019_v22 = vld [vmem:[%s6701_s3 + $0x1e8] sm:$0xff]  ;;  %v4770_v30 = vcombine.high %v3002_v12, %v3018_v14  ;;  %v4769_v37 = vcombine.low %v3002_v12, %v3018_v14 }
 0x1ec   :  { %v4772_v31 = vcombine.high %v3003_v16, %v3019_v22  ;;  %v4771_v38 = vcombine.low %v3003_v16, %v3019_v22 }
 0x1ed   :  { %3681 = vmatpush1.bf16.msra.mxu0 %v4753_v32  ;;  %3722 = vmatpush1.bf16.msra.mxu1 %v4755_v34  ;;  %v2972_v32 = vld [vmem:[%s6701_s3 + $0x70] sm:$0xff] }
 0x1ee   :  { %3760 = vmatprep.subr.bf16.mxu0 %v4726_v35  ;;  %3801 = vmatprep.subr.bf16.mxu1 %v4728_v36  ;;  %v2988_v34 = vld [vmem:[%s6701_s3 + $0xf0] sm:$0xff]  ;;  %v2973_v35 = vld [vmem:[%s6701_s3 + $0x78] sm:$0xff] }
 0x1ef   :  { %v2989_v36 = vld [vmem:[%s6701_s3 + $0xf8] sm:$0xff]  ;;  %v4742_v39 = vcombine.high %v2972_v32, %v2988_v34  ;;  %v4741_v46 = vcombine.low %v2972_v32, %v2988_v34 }
 0x1f0   :  { %4781 = vmatmul.mubr.msk.bf16.vlgmr.msra.gmra.mrb[40].mxu0 %vm3510_vm1, %v6384_v8  ;;  %4782 = vmatmul.mubr.msk.bf16.vlgmr.msra.gmra.mrb[40].mxu1 %vm3510_vm1, %v6384_v8  ;;  %v4744_v40 = vcombine.high %v2973_v35, %v2989_v36  ;;  %v4743_v47 = vcombine.low %v2973_v35, %v2989_v36 }
 0x1f1   :  { %3761 = vmatpush1.bf16.msra.mxu0 %v4725_v42  ;;  %3802 = vmatpush1.bf16.msra.mxu1 %v4727_v43  ;;  %v3004_v42 = vld [vmem:[%s6701_s3 + $0x170] sm:$0xff] }
 0x1f2   :  { %3762 = vmatprep.subr.bf16.mxu0 %v4758_v44  ;;  %3803 = vmatprep.subr.bf16.mxu1 %v4760_v45  ;;  %v3020_v43 = vld [vmem:[%s6701_s3 + $0x1f0] sm:$0xff]  ;;  %v3005_v44 = vld [vmem:[%s6701_s3 + $0x178] sm:$0xff] }
 0x1f3   :  { %3792 = vmatprep.mubr.bf16.mxu0 %v5449_v15  ;;  %3833 = vmatprep.mubr.bf16.mxu1 %v5449_v15  ;;  %v3021_v45 = vld [vmem:[%s6701_s3 + $0x1f8] sm:$0xff]  ;;  %v4774_v48 = vcombine.high %v3004_v42, %v3020_v43  ;;  %s5450_s3 = smov [#allocation2]  }
 0x1f4   :  { %v4776_v49 = vcombine.high %v3005_v44, %v3021_v45  ;;  %s4444_s28 = sshll.u32 %s5450_s3, 4  ;;  %s4445_s28 = int_to_ptr.vmem [resolvable:$true] %s4444_s28 }
 0x1f5   :  { %3763 = vmatpush1.bf16.msra.mxu0 %v4757_v50  ;;  %3804 = vmatpush1.bf16.msra.mxu1 %v4759_v51  ;;  %v4773_v50 = vcombine.low %v3004_v42, %v3020_v43  ;;  %v4775_v51 = vcombine.low %v3005_v44, %v3021_v45  ;;  %s5424_s29 = scalar_lea.vmem %s4445_s28, 32  ;;  %p5429_p1 = scmp.lt.s32.totalorder %s4445_s28, %s4445_s28 }
 0x1f6   :  { %3842 = vmatprep.subr.bf16.mxu0 %v4730_v52  ;;  %3883 = vmatprep.subr.bf16.mxu1 %v4732_v53  ;;  %p5425_p0 = scmp.ne.s32.totalorder %s4445_s28, %s5424_s29  ;;  %p5430_p2 = scmp.lt.s32.totalorder %s5424_s29, %s5424_s29 }
 0x1f8   :  { %4783 = vmatmul.mubr.msk.bf16.vlgmr.msra.gmra.mrb[44].mxu0 %vm3510_vm1, %v6384_v8  ;;  %4784 = vmatmul.mubr.msk.bf16.vlgmr.msra.gmra.mrb[44].mxu1 %vm3510_vm1, %v6384_v8  ;;  %p5431_p3 = por %p5430_p2, %p5429_p1 }
 0x1f9   :  { %3843 = vmatpush1.bf16.msra.mxu0 %v4729_v58  ;;  %3884 = vmatpush1.bf16.msra.mxu1 %v4731_v59 }
 0x1fa   :  { %3844 = vmatprep.subr.bf16.mxu0 %v4762_v60  ;;  %3885 = vmatprep.subr.bf16.mxu1 %v4764_v61  ;;  %p5432_p4 = pnand %p5431_p3, %p5425_p0 }
 0x1fb   :  { %3874 = vmatprep.mubr.bf16.mxu0 %v5449_v15  ;;  %3915 = vmatprep.mubr.bf16.mxu1 %v5449_v15 }
 0x1fd   :  { %3845 = vmatpush1.bf16.msra.mxu0 %v4761_v2  ;;  %3886 = vmatpush1.bf16.msra.mxu1 %v4763_v3 }
 0x1fe   :  { %3924 = vmatprep.subr.bf16.mxu0 %v4734_v4  ;;  %3965 = vmatprep.subr.bf16.mxu1 %v4736_v5 }
 0x200   :  { %4785 = vmatmul.mubr.msk.bf16.vlgmr.msra.gmra.mrb[48].mxu0 %vm3510_vm1, %v6384_v8  ;;  %4786 = vmatmul.mubr.msk.bf16.vlgmr.msra.gmra.mrb[48].mxu1 %vm3510_vm1, %v6384_v8 }
 0x201   :  { %3925 = vmatpush1.bf16.msra.mxu0 %v4733_v18  ;;  %3966 = vmatpush1.bf16.msra.mxu1 %v4735_v19 }
 0x202   :  { %3926 = vmatprep.subr.bf16.mxu0 %v4766_v20  ;;  %3967 = vmatprep.subr.bf16.mxu1 %v4768_v21 }
 0x203   :  { %3956 = vmatprep.mubr.bf16.mxu0 %v5449_v15  ;;  %3997 = vmatprep.mubr.bf16.mxu1 %v5449_v15 }
 0x205   :  { %3927 = vmatpush1.bf16.msra.mxu0 %v4765_v27  ;;  %3968 = vmatpush1.bf16.msra.mxu1 %v4767_v9 }
 0x206   :  { %4006 = vmatprep.subr.bf16.mxu0 %v4738_v10  ;;  %4047 = vmatprep.subr.bf16.mxu1 %v4740_v11 }
 0x208   :  { %4787 = vmatmul.mubr.msk.bf16.vlgmr.msra.gmra.mrb[52].mxu0 %vm3510_vm1, %v6384_v8  ;;  %4788 = vmatmul.mubr.msk.bf16.vlgmr.msra.gmra.mrb[52].mxu1 %vm3510_vm1, %v6384_v8 }
 0x209   :  { %4007 = vmatpush1.bf16.msra.mxu0 %v4737_v28  ;;  %4048 = vmatpush1.bf16.msra.mxu1 %v4739_v29 }
 0x20a   :  { %4008 = vmatprep.subr.bf16.mxu0 %v4770_v30  ;;  %4049 = vmatprep.subr.bf16.mxu1 %v4772_v31 }
 0x20b   :  { %4038 = vmatprep.mubr.bf16.mxu0 %v5449_v15  ;;  %4079 = vmatprep.mubr.bf16.mxu1 %v5449_v15 }
 0x20d   :  { %4009 = vmatpush1.bf16.msra.mxu0 %v4769_v37  ;;  %4050 = vmatpush1.bf16.msra.mxu1 %v4771_v38 }
 0x20e   :  { %4088 = vmatprep.subr.bf16.mxu0 %v4742_v39  ;;  %4129 = vmatprep.subr.bf16.mxu1 %v4744_v40 }
 0x210   :  { %4789 = vmatmul.mubr.msk.bf16.vlgmr.msra.gmra.mrb[56].mxu0 %vm3510_vm1, %v6384_v8  ;;  %4790 = vmatmul.mubr.msk.bf16.vlgmr.msra.gmra.mrb[56].mxu1 %vm3510_vm1, %v6384_v8 }
 0x211   :  { %4089 = vmatpush1.bf16.msra.mxu0 %v4741_v46  ;;  %4130 = vmatpush1.bf16.msra.mxu1 %v4743_v47 }
 0x212   :  { %4090 = vmatprep.subr.bf16.mxu0 %v4774_v48  ;;  %4131 = vmatprep.subr.bf16.mxu1 %v4776_v49 }
 0x213   :  { %4120 = vmatprep.mubr.bf16.mxu0 %v5449_v15  ;;  %4161 = vmatprep.mubr.bf16.mxu1 %v5449_v15 }
 0x215   :  { %4091 = vmatpush1.bf16.msra.mxu0 %v4773_v50  ;;  %4132 = vmatpush1.bf16.msra.mxu1 %v4775_v51 }
 0x218   :  { %4791 = vmatmul.mubr.msk.bf16.vlgmr.msra.gmra.mrb[60].mxu0 %vm3510_vm1, %v6384_v8  ;;  %4792 = vmatmul.mubr.msk.bf16.vlgmr.msra.gmra.mrb[60].mxu1 %vm3510_vm1, %v6384_v8 }
 0x219   :  { %5435 = shalt.err (!%p5432_p4)
}
 0x21a   :  { %s5436_s8 = scalar_lea.hbm %s6703_s5, 32 }
 0x21b   :  { %p5437_p5 = scmp.ne.s32.totalorder %s6703_s5, %s5436_s8  ;;  %p5440_p6 = scmp.lt.u32.totalorder %s5436_s8, %s6703_s5 }
 0x21d   :  { %p5442_p7 = pnand %p5440_p6, %p5437_p5 }
 0x21f   :  { %5445 = shalt.err (!%p5442_p7)
}
 0x220   :  { %4447 = dma.vmem_to_hbm [thread:$0]  %s4445_s28, 32, %s6703_s5, [#allocation3]   ;;  %v6595_v15 = vsub.s32 0, %v5582_v33  ;;  %v6598_v8 = vsub.s32 2, %v5582_v33  ;;  %v3022_v52 = vld [vmem:[%s6702_s4] sm:$0xff]  ;;  %v6604_v53 = vsub.s32 1, %v5582_v33 }
 0x221   :  { %v6607_v54 = vsub.s32 3, %v5582_v33  ;;  %v6614_v1 = vsub.s32 4, %v5582_v33  ;;  %v6617_v2 = vsub.s32 6, %v5582_v33  ;;  %v6620_v7 = vsub.s32 5, %v5582_v33  ;;  %v3023_v31 = vld [vmem:[%s6702_s4 + $0x8] sm:$0xff] }
 0x222   :  { %v3033_v55 = vrot.slane %v3022_v52, %v6595_v15  ;;  %v3041_v56 = vrot.slane %v3022_v52, %v6598_v8  ;;  %v3037_v57 = vrot.slane %v3022_v52, %v6604_v53  ;;  %v6623_v13 = vsub.s32 7, %v5582_v33 }
 0x223   :  { %v3045_v58 = vrot.slane %v3022_v52, %v6607_v54  ;;  %v3049_v21 = vrot.slane %v3022_v52, %v6614_v1  ;;  %v3057_v23 = vrot.slane %v3022_v52, %v6617_v2  ;;  %v3053_v26 = vrot.slane %v3022_v52, %v6620_v7 }
 0x224   :  { %v3061_v27 = vrot.slane %v3022_v52, %v6623_v13  ;;  %v3065_v37 = vrot.slane %v3023_v31, %v6595_v15  ;;  %v3073_v38 = vrot.slane %v3023_v31, %v6598_v8  ;;  %v3069_v42 = vrot.slane %v3023_v31, %v6604_v53 }
 0x225   :  { %v3077_v43 = vrot.slane %v3023_v31, %v6607_v54 }
 0x2b3   :  { %v3548_v59 = vpop.f32.mrb[32].mxu0  ;;  %v3589_v60 = vpop.f32.mrb[32].mxu1 }
 0x2b4   :  { %v3549_v61 = vadd.f32 %v3548_v59, %v3033_v55  ;;  %v3590_v62 = vadd.f32 %v3589_v60, %v3041_v56  ;;  %v3550_v63 = vpop.f32.mrb[33].mxu0  ;;  %v3591_v0 = vpop.f32.mrb[33].mxu1 }
 0x2b5   :  { %v3551_v3 = vadd.f32 %v3550_v63, %v3037_v57  ;;  %v3592_v4 = vadd.f32 %v3591_v0, %v3045_v58  ;;  %v3552_v5 = vpop.f32.mrb[34].mxu0  ;;  %v3593_v6 = vpop.f32.mrb[34].mxu1  ;;  %v3081_v0 = vrot.slane %v3023_v31, %v6614_v1 }
 0x2b6   :  { %v3553_v17 = vpop.f32.mrb[35].mxu0  ;;  %v3594_v18 = vpop.f32.mrb[35].mxu1  ;;  %v3085_v6 = vrot.slane %v3023_v31, %v6620_v7 }
 0x2b7   :  { %v4793_v19 = vpack.c.bf16 %v3551_v3, %v3549_v61  ;;  %v4794_v20 = vpack.c.bf16 %v3592_v4, %v3590_v62  ;;  %v3089_v3 = vrot.slane %v3023_v31, %v6617_v2  ;;  %v3093_v17 = vrot.slane %v3023_v31, %v6623_v13 }
 0x2b9   :  { %v4244_v24 = vrot.slane %v4793_v19, %v5594_v41  ;;  %v4251_v25 = vrot.slane %v4794_v20, %v5594_v41 }
 0x2bb   :  { %v4266_v9 = vcombine.low %v4244_v24, %v4251_v25  ;;  %v3630_v10 = vpop.f32.mrb[36].mxu0  ;;  %v3671_v33 = vpop.f32.mrb[36].mxu1 }
 0x2bc   :  { %v3631_v11 = vadd.f32 %v3630_v10, %v3049_v21  ;;  %v3672_v12 = vadd.f32 %v3671_v33, %v3057_v23  ;;  %v3632_v14 = vpop.f32.mrb[37].mxu0  ;;  %v3673_v16 = vpop.f32.mrb[37].mxu1  ;;  %v3024_v33 = vld [vmem:[%s6702_s4 + $0x10] sm:$0xff] }
 0x2bd   :  { %v3633_v22 = vadd.f32 %v3632_v14, %v3053_v26  ;;  %v3674_v28 = vadd.f32 %v3673_v16, %v3061_v27  ;;  %v3634_v29 = vpop.f32.mrb[38].mxu0  ;;  %v3675_v30 = vpop.f32.mrb[38].mxu1  ;;  %v4274_v51 = vrot.slane %v4266_v9, %v5594_v41  ;;  %v3101_v31 = vrot.slane %v3024_v33, %v6604_v53 }
 0x2be   :  { %v3635_v32 = vpop.f32.mrb[39].mxu0  ;;  %v3676_v34 = vpop.f32.mrb[39].mxu1 }
 0x2bf   :  { %v4795_v35 = vpack.c.bf16 %v3633_v22, %v3631_v11  ;;  %v4796_v36 = vpack.c.bf16 %v3674_v28, %v3672_v12  ;;  %v3097_v22 = vrot.slane %v3024_v33, %v6595_v15  ;;  %v3105_v28 = vrot.slane %v3024_v33, %v6598_v8 }
 0x2c0   :  { %v3109_v32 = vrot.slane %v3024_v33, %v6607_v54 }
 0x2c1   :  { %v4258_v39 = vrot.slane %v4795_v35, %v5594_v41  ;;  %v4265_v40 = vrot.slane %v4796_v36, %v5594_v41 }
 0x2c3   :  { %v4267_v44 = vcombine.low %v4258_v39, %v4265_v40  ;;  %v3712_v45 = vpop.f32.mrb[40].mxu0  ;;  %v3753_v46 = vpop.f32.mrb[40].mxu1 }
 0x2c4   :  { %v3713_v47 = vadd.f32 %v3712_v45, %v3065_v37  ;;  %v3754_v48 = vadd.f32 %v3753_v46, %v3073_v38  ;;  %v3714_v49 = vpop.f32.mrb[41].mxu0  ;;  %v3755_v50 = vpop.f32.mrb[41].mxu1 }
 0x2c5   :  { %v4281_v52 = vrot.slane %v4267_v44, %v5594_v41  ;;  %v3715_v55 = vadd.f32 %v3714_v49, %v3069_v42  ;;  %v3756_v56 = vadd.f32 %v3755_v50, %v3077_v43  ;;  %v3716_v57 = vpop.f32.mrb[42].mxu0  ;;  %v3757_v58 = vpop.f32.mrb[42].mxu1 }
 0x2c6   :  { %v3717_v59 = vpop.f32.mrb[43].mxu0  ;;  %v3758_v60 = vpop.f32.mrb[43].mxu1 }
 0x2c7   :  { %v4282_v61 = vcombine.low %v4274_v51, %v4281_v52  ;;  %v4797_v62 = vpack.c.bf16 %v3715_v55, %v3713_v47  ;;  %v4798_v63 = vpack.c.bf16 %v3756_v56, %v3754_v48  ;;  %v3113_v55 = vrot.slane %v3024_v33, %v6614_v1 }
 0x2c8   :  { %v3121_v56 = vrot.slane %v3024_v33, %v6617_v2  ;;  %v3117_v59 = vrot.slane %v3024_v33, %v6620_v7  ;;  %v3125_v60 = vrot.slane %v3024_v33, %v6623_v13 }
 0x2c9   :  { %4434 = vst [vmem:[%s6704_s6] sm:$0xff] %v4282_v61  ;;  %v4293_v4 = vrot.slane %v4797_v62, %v5594_v41  ;;  %v4300_v5 = vrot.slane %v4798_v63, %v5594_v41 }
 0x2cb   :  { %v4315_v18 = vcombine.low %v4293_v4, %v4300_v5  ;;  %v3794_v19 = vpop.f32.mrb[44].mxu0  ;;  %v3835_v20 = vpop.f32.mrb[44].mxu1 }
 0x2cc   :  { %v3795_v21 = vadd.f32 %v3794_v19, %v3081_v0  ;;  %v3836_v23 = vadd.f32 %v3835_v20, %v3089_v3  ;;  %v3796_v24 = vpop.f32.mrb[45].mxu0  ;;  %v3837_v25 = vpop.f32.mrb[45].mxu1  ;;  %v3025_v20 = vld [vmem:[%s6702_s4 + $0x18] sm:$0xff] }
 0x2cd   :  { %v3797_v26 = vadd.f32 %v3796_v24, %v3085_v6  ;;  %v3838_v27 = vadd.f32 %v3837_v25, %v3093_v17  ;;  %v3798_v9 = vpop.f32.mrb[46].mxu0  ;;  %v3839_v10 = vpop.f32.mrb[46].mxu1  ;;  %v4323_v42 = vrot.slane %v4315_v18, %v5594_v41  ;;  %v3133_v33 = vrot.slane %v3025_v20, %v6604_v53 }
 0x2ce   :  { %v3799_v11 = vpop.f32.mrb[47].mxu0  ;;  %v3840_v12 = vpop.f32.mrb[47].mxu1 }
 0x2cf   :  { %v4799_v14 = vpack.c.bf16 %v3797_v26, %v3795_v21  ;;  %v4800_v16 = vpack.c.bf16 %v3838_v27, %v3836_v23  ;;  %v3129_v26 = vrot.slane %v3025_v20, %v6595_v15  ;;  %v3137_v27 = vrot.slane %v3025_v20, %v6598_v8 }
 0x2d0   :  { %v3141_v11 = vrot.slane %v3025_v20, %v6607_v54 }
 0x2d1   :  { %v4307_v29 = vrot.slane %v4799_v14, %v5594_v41  ;;  %v4314_v30 = vrot.slane %v4800_v16, %v5594_v41 }
 0x2d3   :  { %v4316_v34 = vcombine.low %v4307_v29, %v4314_v30  ;;  %v3876_v35 = vpop.f32.mrb[48].mxu0  ;;  %v3917_v36 = vpop.f32.mrb[48].mxu1 }
 0x2d4   :  { %v3877_v37 = vadd.f32 %v3876_v35, %v3097_v22  ;;  %v3918_v38 = vadd.f32 %v3917_v36, %v3105_v28  ;;  %v3878_v39 = vpop.f32.mrb[49].mxu0  ;;  %v3919_v40 = vpop.f32.mrb[49].mxu1 }
 0x2d5   :  { %v4330_v43 = vrot.slane %v4316_v34, %v5594_v41  ;;  %v3879_v44 = vadd.f32 %v3878_v39, %v3101_v31  ;;  %v3920_v45 = vadd.f32 %v3919_v40, %v3109_v32  ;;  %v3880_v46 = vpop.f32.mrb[50].mxu0  ;;  %v3921_v47 = vpop.f32.mrb[50].mxu1  ;;  %v3145_v39 = vrot.slane %v3025_v20, %v6614_v1 }
 0x2d6   :  { %v3881_v48 = vpop.f32.mrb[51].mxu0  ;;  %v3922_v49 = vpop.f32.mrb[51].mxu1  ;;  %v3153_v40 = vrot.slane %v3025_v20, %v6617_v2 }
 0x2d7   :  { %v4331_v50 = vcombine.low %v4323_v42, %v4330_v43  ;;  %v4801_v51 = vpack.c.bf16 %v3879_v44, %v3877_v37  ;;  %v4802_v52 = vpack.c.bf16 %v3920_v45, %v3918_v38  ;;  %v3149_v44 = vrot.slane %v3025_v20, %v6620_v7 }
 0x2d8   :  { %v3157_v45 = vrot.slane %v3025_v20, %v6623_v13 }
 0x2d9   :  { %4435 = vst [vmem:[%s6704_s6 + $0x8] sm:$0xff] %v4331_v50  ;;  %v4342_v57 = vrot.slane %v4801_v51, %v5594_v41  ;;  %v4349_v58 = vrot.slane %v4802_v52, %v5594_v41 }
 0x2db   :  { %v4364_v61 = vcombine.low %v4342_v57, %v4349_v58  ;;  %v3958_v62 = vpop.f32.mrb[52].mxu0  ;;  %v3999_v63 = vpop.f32.mrb[52].mxu1 }
 0x2dc   :  { %v3959_v0 = vadd.f32 %v3958_v62, %v3113_v55  ;;  %v4000_v3 = vadd.f32 %v3999_v63, %v3121_v56  ;;  %v3960_v4 = vpop.f32.mrb[53].mxu0  ;;  %v4001_v5 = vpop.f32.mrb[53].mxu1 }
 0x2dd   :  { %v3961_v6 = vadd.f32 %v3960_v4, %v3117_v59  ;;  %v4002_v17 = vadd.f32 %v4001_v5, %v3125_v60  ;;  %v3962_v18 = vpop.f32.mrb[54].mxu0  ;;  %v4003_v19 = vpop.f32.mrb[54].mxu1  ;;  %v4372_v31 = vrot.slane %v4364_v61, %v5594_v41 }
 0x2de   :  { %v3963_v21 = vpop.f32.mrb[55].mxu0  ;;  %v4004_v23 = vpop.f32.mrb[55].mxu1 }
 0x2df   :  { %v4803_v24 = vpack.c.bf16 %v3961_v6, %v3959_v0  ;;  %v4804_v25 = vpack.c.bf16 %v4002_v17, %v4000_v3 }
 0x2e1   :  { %v4356_v9 = vrot.slane %v4803_v24, %v5594_v41  ;;  %v4363_v10 = vrot.slane %v4804_v25, %v5594_v41 }
 0x2e3   :  { %v4365_v12 = vcombine.low %v4356_v9, %v4363_v10  ;;  %v4040_v14 = vpop.f32.mrb[56].mxu0  ;;  %v4081_v16 = vpop.f32.mrb[56].mxu1 }
 0x2e4   :  { %v4041_v22 = vadd.f32 %v4040_v14, %v3129_v26  ;;  %v4082_v28 = vadd.f32 %v4081_v16, %v3137_v27  ;;  %v4042_v29 = vpop.f32.mrb[57].mxu0  ;;  %v4083_v30 = vpop.f32.mrb[57].mxu1 }
 0x2e5   :  { %v4379_v15 = vrot.slane %v4365_v12, %v5594_v41  ;;  %v4043_v8 = vadd.f32 %v4042_v29, %v3133_v33  ;;  %v4084_v32 = vadd.f32 %v4083_v30, %v3141_v11  ;;  %v4044_v34 = vpop.f32.mrb[58].mxu0  ;;  %v4085_v35 = vpop.f32.mrb[58].mxu1 }
 0x2e6   :  { %v4045_v36 = vpop.f32.mrb[59].mxu0  ;;  %v4086_v37 = vpop.f32.mrb[59].mxu1 }
 0x2e7   :  { %v4380_v53 = vcombine.low %v4372_v31, %v4379_v15  ;;  %v4805_v38 = vpack.c.bf16 %v4043_v8, %v4041_v22  ;;  %v4806_v54 = vpack.c.bf16 %v4084_v32, %v4082_v28 }
 0x2e9   :  { %4436 = vst [vmem:[%s6704_s6 + $0x10] sm:$0xff] %v4380_v53  ;;  %v4391_v42 = vrot.slane %v4805_v38, %v5594_v41  ;;  %v4398_v43 = vrot.slane %v4806_v54, %v5594_v41 }
 0x2eb   :  { %v4413_v46 = vcombine.low %v4391_v42, %v4398_v43  ;;  %v4122_v47 = vpop.f32.mrb[60].mxu0  ;;  %v4163_v48 = vpop.f32.mrb[60].mxu1 }
 0x2ec   :  { %v4123_v49 = vadd.f32 %v4122_v47, %v3145_v39  ;;  %v4164_v50 = vadd.f32 %v4163_v48, %v3153_v40  ;;  %v4124_v1 = vpop.f32.mrb[61].mxu0  ;;  %v4165_v51 = vpop.f32.mrb[61].mxu1 }
 0x2ed   :  { %v4125_v2 = vadd.f32 %v4124_v1, %v3149_v44  ;;  %v4166_v52 = vadd.f32 %v4165_v51, %v3157_v45  ;;  %v4126_v55 = vpop.f32.mrb[62].mxu0  ;;  %v4167_v56 = vpop.f32.mrb[62].mxu1  ;;  %v4421_v62 = vrot.slane %v4413_v46, %v5594_v41 }
 0x2ee   :  { %v4127_v57 = vpop.f32.mrb[63].mxu0  ;;  %v4168_v58 = vpop.f32.mrb[63].mxu1 }
 0x2ef   :  { %v4807_v59 = vpack.c.bf16 %v4125_v2, %v4123_v49  ;;  %v4808_v60 = vpack.c.bf16 %v4166_v52, %v4164_v50 }
 0x2f1   :  { %v4405_v61 = vrot.slane %v4807_v59, %v5594_v41  ;;  %v4412_v7 = vrot.slane %v4808_v60, %v5594_v41 }
 0x2f3   :  { %v4414_v13 = vcombine.low %v4405_v61, %v4412_v7 }
 0x2f5   :  { %v4428_v63 = vrot.slane %v4414_v13, %v5594_v41 }
 0x2f7   :  { %v4429_v0 = vcombine.low %v4421_v62, %v4428_v63 }
 0x2f9   :  { %4437 = vst [vmem:[%s6704_s6 + $0x18] sm:$0xff] %v4429_v0 }
 0x2fa   :  { %5446 = dma.done.wait [#allocation3], 32  }
 0x2fb   :  { %5447 = vsyncadd [#allocation3], 4294967264 }
 0x2fc   :  { %4455 = vsyncpa [#allocation3], 1 }

// kernel: _lambda_.8
= control target key start
LH: loop header
LB: loop body
LE: loop exit
PB: predicated region body
PF: predicated region fallthrough
CT: control target
= control target key end

     0   :  { %v913_v1 = vmov 0   ;;  %vm703_vm0 = vcmask 1043456   ;;  %vm704_vm1 = vcmask 277508   ;;  %s1237_s1 = inlined_call_operand.vmem [shape: bf16[256,162], index: 1, kind: input, shape index: {}]   ;;  %s1238_s0 = inlined_call_operand.vmem [shape: bf16[128,256], index: 0, kind: input, shape index: {}]   ;;  %s1239_s2 = inlined_call_operand.vmem [shape: f32[128,1], index: 2, kind: input, shape index: {}]   ;;  %s1240_s3 = inlined_call_operand.vmem [shape: bf16[128,162], index: 3, kind: output, shape index: {}]  }
   0x1   :  { %v841_v0 = vld [vmem:[%s1237_s1 + $0x4] ss:$8 sps:$4 sm:$0xff]   ;;  %840 = vset.pattern.permute.xlu1 %v913_v1  ;;  %839 = vset.pattern.permute.xlu0 %v913_v1  ;;  %v843_v2 = vld [vmem:[%s1237_s1] ss:$8 sps:$4 sm:$0xff]   ;;  %v844_v3 = vld [vmem:[%s1237_s1 + $0x14] ss:$8 sps:$4 sm:$0xff]  }
   0x2   :  { %398 = vmatprep.subr.bf16.mxu0 %v841_v0  ;;  %806 = vmatprep.subr.bf16.mxu1 %v841_v0  ;;  %v846_v4 = vld [vmem:[%s1237_s1 + $0x10] ss:$8 sps:$4 sm:$0xff]   ;;  %v847_v5 = vld [vmem:[%s1237_s1 + $0x24] ss:$8 sps:$4 sm:$0xff]   ;;  %v849_v6 = vld [vmem:[%s1237_s1 + $0x20] ss:$8 sps:$4 sm:$0xff]  }
   0x3   :  { %399 = vmatpush1.bf16.msra.mxu0 %v843_v2  ;;  %822 = vmatpush1.bf16.msra.mxu1 %v843_v2  ;;  %v850_v7 = vld [vmem:[%s1237_s1 + $0x34] ss:$8 sps:$4 sm:$0xff]   ;;  %v852_v8 = vld [vmem:[%s1237_s1 + $0x30] ss:$8 sps:$4 sm:$0xff]   ;;  %v853_v9 = vld [vmem:[%s1237_s1 + $0x44] ss:$8 sps:$4 sm:$0xff]  }
   0x4   :  { %400 = vmatprep.subr.bf16.mxu0 %v844_v3  ;;  %807 = vmatprep.subr.bf16.mxu1 %v844_v3  ;;  %v855_v10 = vld [vmem:[%s1237_s1 + $0x40] ss:$8 sps:$4 sm:$0xff]   ;;  %v856_v11 = vld [vmem:[%s1237_s1 + $0x54] ss:$8 sps:$4 sm:$0xff]   ;;  %v858_v12 = vld [vmem:[%s1237_s1 + $0x50] ss:$8 sps:$4 sm:$0xff]  }
   0x5   :  { %v859_v13 = vld [vmem:[%s1237_s1 + $0x64] ss:$8 sps:$4 sm:$0xff]   ;;  %v861_v15 = vld [vmem:[%s1237_s1 + $0x60] ss:$8 sps:$4 sm:$0xff]   ;;  %v862_v17 = vld [vmem:[%s1237_s1 + $0x74] ss:$8 sps:$4 sm:$0xff]  }
   0x6   :  { %v891_v14 = vld [vmem:[%s1238_s0 + $0x4] ss:$8 sps:$4 sm:$0xff]   ;;  %v864_v18 = vld [vmem:[%s1237_s1 + $0x70] ss:$8 sps:$4 sm:$0xff]   ;;  %v867_v20 = vld [vmem:[%s1237_s1 + $0x80] ss:$8 sps:$4 sm:$0xff]  }
   0x7   :  { %401 = vmatpush1.bf16.msra.mxu0 %v846_v4  ;;  %823 = vmatpush1.bf16.msra.mxu1 %v846_v4  ;;  %v894_v16 = vld [vmem:[%s1238_s0 + $0x44] ss:$8 sps:$4 sm:$0xff]   ;;  %v868_v21 = vld [vmem:[%s1237_s1 + $0x94] ss:$8 sps:$4 sm:$0xff]   ;;  %v870_v26 = vld [vmem:[%s1237_s1 + $0x90] ss:$8 sps:$4 sm:$0xff]  }
   0x8   :  { %402 = vmatprep.subr.bf16.mxu0 %v847_v5  ;;  %808 = vmatprep.subr.bf16.mxu1 %v847_v5  ;;  %v865_v19 = vld [vmem:[%s1237_s1 + $0x84] ss:$8 sps:$4 sm:$0xff]   ;;  %v64_v22 = vld [vmem:[%s1239_s2 + $0x10] sm:$0xff]  ;;  %v65_v24 = vld [vmem:[%s1239_s2 + $0x18] sm:$0xff] }
   0x9   :  { %430 = vmatprep.mubr.bf16.mxu0 %v891_v14  ;;  %470 = vmatprep.mubr.bf16.mxu1 %v894_v16  ;;  %v62_v23 = vld [vmem:[%s1239_s2] sm:$0xff]  ;;  %v63_v25 = vld [vmem:[%s1239_s2 + $0x8] sm:$0xff]  ;;  %v874_v31 = vld [vmem:[%s1237_s1 + $0xb4] ss:$8 sps:$4 sm:$0xff]  }
   0xa   :  { %90 = vperm.xlu1 %840, %v64_v22   ;;  %80 = vperm.xlu0 %839, %v62_v23   ;;  %v871_v27 = vld [vmem:[%s1237_s1 + $0xa4] ss:$8 sps:$4 sm:$0xff]   ;;  %v873_v30 = vld [vmem:[%s1237_s1 + $0xa0] ss:$8 sps:$4 sm:$0xff]   ;;  %v69_v32 = vld [vmem:[%s1239_s2 + $0x38] sm:$0xff] }
   0xb   :  { %403 = vmatpush1.bf16.msra.mxu0 %v849_v6  ;;  %824 = vmatpush1.bf16.msra.mxu1 %v849_v6  ;;  %v67_v28 = vld [vmem:[%s1239_s2 + $0x28] sm:$0xff]  ;;  %v66_v29 = vld [vmem:[%s1239_s2 + $0x20] sm:$0xff]  ;;  %v68_v33 = vld [vmem:[%s1239_s2 + $0x30] sm:$0xff] }
   0xc   :  { %404 = vmatprep.subr.bf16.mxu0 %v850_v7  ;;  %809 = vmatprep.subr.bf16.mxu1 %v850_v7  ;;  %v876_v34 = vld [vmem:[%s1237_s1 + $0xb0] ss:$8 sps:$4 sm:$0xff]   ;;  %v877_v35 = vld [vmem:[%s1237_s1 + $0xc4] ss:$8 sps:$4 sm:$0xff]   ;;  %v879_v38 = vld [vmem:[%s1237_s1 + $0xc0] ss:$8 sps:$4 sm:$0xff]  }
   0xd   :  { %v71_v36 = vld [vmem:[%s1239_s2 + $0x48] sm:$0xff]  ;;  %v70_v37 = vld [vmem:[%s1239_s2 + $0x40] sm:$0xff]  ;;  %v880_v39 = vld [vmem:[%s1237_s1 + $0xd4] ss:$8 sps:$4 sm:$0xff]  }
   0xe   :  { %95 = vperm.xlu1 %840, %v65_v24   ;;  %85 = vperm.xlu0 %839, %v63_v25   ;;  %v73_v40 = vld [vmem:[%s1239_s2 + $0x58] sm:$0xff]  ;;  %v72_v41 = vld [vmem:[%s1239_s2 + $0x50] sm:$0xff]  ;;  %v883_v43 = vld [vmem:[%s1237_s1 + $0xe4] ss:$8 sps:$4 sm:$0xff]  }
   0xf   :  { %405 = vmatpush1.bf16.msra.mxu0 %v852_v8  ;;  %825 = vmatpush1.bf16.msra.mxu1 %v852_v8  ;;  %v882_v42 = vld [vmem:[%s1237_s1 + $0xd0] ss:$8 sps:$4 sm:$0xff]   ;;  %v75_v44 = vld [vmem:[%s1239_s2 + $0x68] sm:$0xff]  ;;  %v74_v45 = vld [vmem:[%s1239_s2 + $0x60] sm:$0xff] }
  0x10   :  { %406 = vmatprep.subr.bf16.mxu0 %v853_v9  ;;  %810 = vmatprep.subr.bf16.mxu1 %v853_v9  ;;  %v885_v46 = vld [vmem:[%s1237_s1 + $0xe0] ss:$8 sps:$4 sm:$0xff]   ;;  %v886_v47 = vld [vmem:[%s1237_s1 + $0xf4] ss:$8 sps:$4 sm:$0xff]   ;;  %v888_v50 = vld [vmem:[%s1237_s1 + $0xf0] ss:$8 sps:$4 sm:$0xff]  }
  0x11   :  { %v77_v48 = vld [vmem:[%s1239_s2 + $0x78] sm:$0xff]  ;;  %v76_v49 = vld [vmem:[%s1239_s2 + $0x70] sm:$0xff]  ;;  %v889_v51 = vld [vmem:[%s1238_s0] ss:$8 sps:$4 sm:$0xff]  }
  0x12   :  { %105 = vperm.xlu1 %840, %v67_v28   ;;  %100 = vperm.xlu0 %839, %v66_v29   ;;  %v892_v52 = vld [vmem:[%s1238_s0 + $0x40] ss:$8 sps:$4 sm:$0xff]   ;;  %v895_v53 = vld [vmem:[%s1238_s0 + $0x14] ss:$8 sps:$4 sm:$0xff]   ;;  %v899_v55 = vld [vmem:[%s1238_s0 + $0x10] ss:$8 sps:$4 sm:$0xff]  }
  0x13   :  { %407 = vmatpush1.bf16.msra.mxu0 %v855_v10  ;;  %826 = vmatpush1.bf16.msra.mxu1 %v855_v10  ;;  %v897_v54 = vld [vmem:[%s1238_s0 + $0x54] ss:$8 sps:$4 sm:$0xff]   ;;  %v900_v56 = vld [vmem:[%s1238_s0 + $0x50] ss:$8 sps:$4 sm:$0xff]   ;;  %v901_v57 = vld [vmem:[%s1238_s0 + $0x24] ss:$8 sps:$4 sm:$0xff]  }
  0x14   :  { %408 = vmatprep.subr.bf16.mxu0 %v856_v11  ;;  %811 = vmatprep.subr.bf16.mxu1 %v856_v11  ;;  %v903_v58 = vld [vmem:[%s1238_s0 + $0x64] ss:$8 sps:$4 sm:$0xff]   ;;  %v905_v59 = vld [vmem:[%s1238_s0 + $0x20] ss:$8 sps:$4 sm:$0xff]   ;;  %v907_v61 = vld [vmem:[%s1238_s0 + $0x34] ss:$8 sps:$4 sm:$0xff]  }
  0x15   :  { %v906_v60 = vld [vmem:[%s1238_s0 + $0x60] ss:$8 sps:$4 sm:$0xff]   ;;  %v909_v62 = vld [vmem:[%s1238_s0 + $0x74] ss:$8 sps:$4 sm:$0xff]   ;;  %v911_v63 = vld [vmem:[%s1238_s0 + $0x30] ss:$8 sps:$4 sm:$0xff]  }
  0x16   :  { %115 = vperm.xlu1 %840, %v69_v32   ;;  %110 = vperm.xlu0 %839, %v68_v33   ;;  %v912_v0 = vld [vmem:[%s1238_s0 + $0x70] ss:$8 sps:$4 sm:$0xff]   ;;  %vm1140_vm6 = vmor %vm704_vm1, %vm703_vm0 }
  0x17   :  { %409 = vmatpush1.bf16.msra.mxu0 %v858_v12  ;;  %827 = vmatpush1.bf16.msra.mxu1 %v858_v12 }
  0x18   :  { %410 = vmatprep.subr.bf16.mxu0 %v859_v13  ;;  %812 = vmatprep.subr.bf16.mxu1 %v859_v13 }
  0x1a   :  { %125 = vperm.xlu1 %840, %v71_v36   ;;  %120 = vperm.xlu0 %839, %v70_v37  }
  0x1b   :  { %411 = vmatpush1.bf16.msra.mxu0 %v861_v15  ;;  %828 = vmatpush1.bf16.msra.mxu1 %v861_v15 }
  0x1c   :  { %412 = vmatprep.subr.bf16.mxu0 %v862_v17  ;;  %813 = vmatprep.subr.bf16.mxu1 %v862_v17 }
  0x1e   :  { %135 = vperm.xlu1 %840, %v73_v40   ;;  %130 = vperm.xlu0 %839, %v72_v41  }
  0x1f   :  { %413 = vmatpush1.bf16.msra.mxu0 %v864_v18  ;;  %829 = vmatpush1.bf16.msra.mxu1 %v864_v18 }
  0x20   :  { %414 = vmatprep.subr.bf16.mxu0 %v865_v19  ;;  %814 = vmatprep.subr.bf16.mxu1 %v865_v19 }
  0x22   :  { %145 = vperm.xlu1 %840, %v75_v44   ;;  %140 = vperm.xlu0 %839, %v74_v45  }
  0x23   :  { %415 = vmatpush1.bf16.msra.mxu0 %v867_v20  ;;  %830 = vmatpush1.bf16.msra.mxu1 %v867_v20 }
  0x24   :  { %416 = vmatprep.subr.bf16.mxu0 %v868_v21  ;;  %815 = vmatprep.subr.bf16.mxu1 %v868_v21 }
  0x26   :  { %155 = vperm.xlu1 %840, %v77_v48   ;;  %150 = vperm.xlu0 %839, %v76_v49  }
  0x27   :  { %417 = vmatpush1.bf16.msra.mxu0 %v870_v26  ;;  %831 = vmatpush1.bf16.msra.mxu1 %v870_v26 }
  0x28   :  { %418 = vmatprep.subr.bf16.mxu0 %v871_v27  ;;  %816 = vmatprep.subr.bf16.mxu1 %v871_v27 }
  0x2b   :  { %419 = vmatpush1.bf16.msra.mxu0 %v873_v30  ;;  %832 = vmatpush1.bf16.msra.mxu1 %v873_v30 }
  0x2c   :  { %420 = vmatprep.subr.bf16.mxu0 %v874_v31  ;;  %817 = vmatprep.subr.bf16.mxu1 %v874_v31 }
  0x2f   :  { %421 = vmatpush1.bf16.msra.mxu0 %v876_v34  ;;  %833 = vmatpush1.bf16.msra.mxu1 %v876_v34 }
  0x30   :  { %422 = vmatprep.subr.bf16.mxu0 %v877_v35  ;;  %818 = vmatprep.subr.bf16.mxu1 %v877_v35 }
  0x33   :  { %423 = vmatpush1.bf16.msra.mxu0 %v879_v38  ;;  %834 = vmatpush1.bf16.msra.mxu1 %v879_v38 }
  0x34   :  { %424 = vmatprep.subr.bf16.mxu0 %v880_v39  ;;  %819 = vmatprep.subr.bf16.mxu1 %v880_v39 }
  0x37   :  { %425 = vmatpush1.bf16.msra.mxu0 %v882_v42  ;;  %835 = vmatpush1.bf16.msra.mxu1 %v882_v42 }
  0x38   :  { %426 = vmatprep.subr.bf16.mxu0 %v883_v43  ;;  %820 = vmatprep.subr.bf16.mxu1 %v883_v43 }
  0x3b   :  { %427 = vmatpush1.bf16.msra.mxu0 %v885_v46  ;;  %836 = vmatpush1.bf16.msra.mxu1 %v885_v46 }
  0x3c   :  { %428 = vmatprep.subr.bf16.mxu0 %v886_v47  ;;  %821 = vmatprep.subr.bf16.mxu1 %v886_v47 }
  0x3f   :  { %429 = vmatpush1.bf16.msra.mxu0 %v888_v50  ;;  %837 = vmatpush1.bf16.msra.mxu1 %v888_v50 }
  0x42   :  { %431 = vmatmul.mubr.bf16.vlgmr.msra.gmra.mrb[0].mxu0 %v889_v51  ;;  %471 = vmatmul.mubr.bf16.vlgmr.msra.gmra.mrb[0].mxu1 %v892_v52 }
  0x43   :  { %440 = vmatprep.mubr.bf16.mxu0 %v895_v53  ;;  %480 = vmatprep.mubr.bf16.mxu1 %v897_v54 }
  0x4a   :  { %441 = vmatmul.mubr.bf16.gmra.mrb[4].mxu0 %v899_v55  ;;  %481 = vmatmul.mubr.bf16.gmra.mrb[4].mxu1 %v900_v56 }
  0x4b   :  { %450 = vmatprep.mubr.bf16.mxu0 %v901_v57  ;;  %490 = vmatprep.mubr.bf16.mxu1 %v903_v58 }
  0x52   :  { %451 = vmatmul.mubr.bf16.gmra.mrb[8].mxu0 %v905_v59  ;;  %491 = vmatmul.mubr.bf16.gmra.mrb[8].mxu1 %v906_v60 }
  0x53   :  { %460 = vmatprep.mubr.bf16.mxu0 %v907_v61  ;;  %500 = vmatprep.mubr.bf16.mxu1 %v909_v62 }
  0x5a   :  { %461 = vmatmul.mubr.bf16.gmra.mrb[12].mxu0 %v911_v63  ;;  %501 = vmatmul.mubr.bf16.gmra.mrb[12].mxu1 %v912_v0 }
  0x89   :  { %v81_v1 = vpop.permute.xlu0 %80  ;;  %v1126_v2 = vpop.permute.xlu1 %90 }
  0x8d   :  { %v86_v3 = vpop.permute.xlu0 %85  ;;  %v1128_v4 = vpop.permute.xlu1 %95 }
  0x91   :  { %v1130_v5 = vpop.permute.xlu0 %100  ;;  %v1132_v6 = vpop.permute.xlu1 %105 }
  0x95   :  { %v1134_v7 = vpop.permute.xlu0 %110  ;;  %v1136_v8 = vpop.permute.xlu1 %115 }
  0x99   :  { %v121_v9 = vpop.permute.xlu0 %120  ;;  %v126_v22 = vpop.permute.xlu1 %125 }
  0x9d   :  { %v131_v39 = vpop.permute.xlu0 %130  ;;  %v136_v62 = vpop.permute.xlu1 %135 }
 0x115   :  { %v432_v10 = vpop.f32.mrb[0].mxu0  ;;  %v472_v11 = vpop.f32.mrb[0].mxu1 }
 0x116   :  { %v433_v12 = vadd.f32 %v432_v10, %v81_v1  ;;  %v473_v13 = vadd.f32 %v472_v11, %v121_v9  ;;  %v434_v14 = vpop.f32.mrb[1].mxu0  ;;  %v474_v15 = vpop.f32.mrb[1].mxu1 }
 0x117   :  { %v435_v16 = vadd.f32 %v434_v14, %v81_v1  ;;  %v475_v17 = vadd.f32 %v474_v15, %v121_v9  ;;  %v436_v18 = vpop.f32.mrb[2].mxu0  ;;  %v476_v19 = vpop.f32.mrb[2].mxu1 }
 0x118   :  { %vm511_vm2 = vcmp.gt.f32.partialorder %v433_v12, 0.0  ;;  %v543_v20 = vmul.f32 0.01, %v433_v12  ;;  %vm527_vm3 = vcmp.gt.f32.partialorder %v473_v13, 0.0  ;;  %v559_v21 = vmul.f32 0.01, %v473_v13 }
 0x119   :  { %vm512_vm4 = vcmp.gt.f32.partialorder %v435_v16, 0.0  ;;  %v544_v23 = vmul.f32 0.01, %v435_v16  ;;  %vm528_vm5 = vcmp.gt.f32.partialorder %v475_v17, 0.0  ;;  %v560_v24 = vmul.f32 0.01, %v475_v17 }
 0x11a   :  { %v575_v25 = vsel %vm511_vm2, %v433_v12, %v543_v20  ;;  %v591_v26 = vsel %vm527_vm3, %v473_v13, %v559_v21  ;;  %v437_v27 = vadd.f32 %v436_v18, %v86_v3  ;;  %v477_v28 = vadd.f32 %v476_v19, %v126_v22  ;;  %v438_v29 = vpop.f32.mrb[3].mxu0  ;;  %v478_v30 = vpop.f32.mrb[3].mxu1 }
 0x11b   :  { %v576_v31 = vsel %vm512_vm4, %v435_v16, %v544_v23  ;;  %v592_v33 = vsel %vm528_vm5, %v475_v17, %v560_v24  ;;  %v439_v34 = vadd.f32 %v438_v29, %v86_v3  ;;  %v479_v35 = vadd.f32 %v478_v30, %v126_v22  ;;  %v141_v23 = vpop.permute.xlu0 %140 }
 0x11c   :  { %v790_v36 = vpack.c.bf16 %v576_v31, %v575_v25  ;;  %v798_v37 = vpack.c.bf16 %v592_v33, %v591_v26  ;;  %vm513_vm7 = vcmp.gt.f32.partialorder %v437_v27, 0.0  ;;  %v545_v38 = vmul.f32 0.01, %v437_v27 }
 0x11d   :  { %vm529_vm8 = vcmp.gt.f32.partialorder %v477_v28, 0.0  ;;  %v561_v40 = vmul.f32 0.01, %v477_v28  ;;  %vm514_vm9 = vcmp.gt.f32.partialorder %v439_v34, 0.0  ;;  %v546_v41 = vmul.f32 0.01, %v439_v34 }
 0x11e   :  { %706 = vst.msk [vmem:[%s1240_s3] sm:$0xff] %vm1140_vm6, %v790_v36  ;;  %714 = vst.msk [vmem:[%s1240_s3 + $0x40] sm:$0xff] %vm1140_vm6, %v798_v37  ;;  %v577_v42 = vsel %vm513_vm7, %v437_v27, %v545_v38  ;;  %vm530_vm10 = vcmp.gt.f32.partialorder %v479_v35, 0.0  ;;  %v562_v43 = vmul.f32 0.01, %v479_v35  ;;  %v442_v44 = vpop.f32.mrb[4].mxu0 }
 0x11f   :  { %v482_v45 = vpop.f32.mrb[4].mxu1  ;;  %v593_v46 = vsel %vm529_vm8, %v477_v28, %v561_v40  ;;  %v578_v47 = vsel %vm514_vm9, %v439_v34, %v546_v41  ;;  %v443_v48 = vadd.f32 %v442_v44, %v1126_v2  ;;  %v444_v50 = vpop.f32.mrb[5].mxu0 }
 0x120   :  { %v483_v49 = vadd.f32 %v482_v45, %v131_v39  ;;  %v484_v51 = vpop.f32.mrb[5].mxu1  ;;  %v791_v52 = vpack.c.bf16 %v578_v47, %v577_v42  ;;  %v594_v53 = vsel %vm530_vm10, %v479_v35, %v562_v43  ;;  %v445_v54 = vadd.f32 %v444_v50, %v1126_v2  ;;  %v446_v56 = vpop.f32.mrb[6].mxu0 }
 0x121   :  { %v485_v55 = vadd.f32 %v484_v51, %v131_v39  ;;  %v486_v57 = vpop.f32.mrb[6].mxu1  ;;  %v799_v58 = vpack.c.bf16 %v594_v53, %v593_v46  ;;  %vm515_vm11 = vcmp.gt.f32.partialorder %v443_v48, 0.0  ;;  %v547_v59 = vmul.f32 0.01, %v443_v48  ;;  %v448_v60 = vpop.f32.mrb[7].mxu0 }
 0x122   :  { %vm531_vm12 = vcmp.gt.f32.partialorder %v483_v49, 0.0  ;;  %v488_v61 = vpop.f32.mrb[7].mxu1  ;;  %707 = vst.msk [vmem:[%s1240_s3 + $0x8] sm:$0xff] %vm1140_vm6, %v791_v52  ;;  %v563_v63 = vmul.f32 0.01, %v483_v49  ;;  %vm516_vm13 = vcmp.gt.f32.partialorder %v445_v54, 0.0  ;;  %v447_v3 = vadd.f32 %v446_v56, %v1128_v4  ;;  %v146_v44 = vpop.permute.xlu1 %145 }
 0x123   :  { %v548_v0 = vmul.f32 0.01, %v445_v54  ;;  %vm532_vm14 = vcmp.gt.f32.partialorder %v485_v55, 0.0  ;;  %715 = vst.msk [vmem:[%s1240_s3 + $0x48] sm:$0xff] %vm1140_vm6, %v799_v58  ;;  %v579_v1 = vsel %vm515_vm11, %v443_v48, %v547_v59  ;;  %v564_v2 = vmul.f32 0.01, %v485_v55 }
 0x124   :  { %v487_v9 = vadd.f32 %v486_v57, %v136_v62  ;;  %v595_v10 = vsel %vm531_vm12, %v483_v49, %v563_v63  ;;  %v449_v12 = vadd.f32 %v448_v60, %v1128_v4  ;;  %v489_v13 = vadd.f32 %v488_v61, %v136_v62  ;;  %v151_v63 = vpop.permute.xlu0 %150 }
 0x125   :  { %v580_v11 = vsel %vm516_vm13, %v445_v54, %v548_v0  ;;  %v596_v15 = vsel %vm532_vm14, %v485_v55, %v564_v2  ;;  %vm517_vm15 = vcmp.gt.f32.partialorder %v447_v3, 0.0  ;;  %v549_v16 = vmul.f32 0.01, %v447_v3  ;;  %v452_v17 = vpop.f32.mrb[8].mxu0  ;;  %v492_v18 = vpop.f32.mrb[8].mxu1 }
 0x126   :  { %v792_v14 = vpack.c.bf16 %v580_v11, %v579_v1  ;;  %v800_v19 = vpack.c.bf16 %v596_v15, %v595_v10  ;;  %vm533_vm0 = vcmp.gt.f32.partialorder %v487_v9, 0.0  ;;  %v565_v20 = vmul.f32 0.01, %v487_v9  ;;  %v454_v21 = vpop.f32.mrb[9].mxu0  ;;  %v494_v22 = vpop.f32.mrb[9].mxu1 }
 0x127   :  { %vm518_vm1 = vcmp.gt.f32.partialorder %v449_v12, 0.0  ;;  %v581_v4 = vsel %vm517_vm15, %v447_v3, %v549_v16  ;;  %v550_v24 = vmul.f32 0.01, %v449_v12  ;;  %vm534_vm2 = vcmp.gt.f32.partialorder %v489_v13, 0.0  ;;  %v456_v26 = vpop.f32.mrb[10].mxu0  ;;  %v496_v31 = vpop.f32.mrb[10].mxu1 }
 0x128   :  { %708 = vst.msk [vmem:[%s1240_s3 + $0x10] sm:$0xff] %vm1140_vm6, %v792_v14  ;;  %v566_v25 = vmul.f32 0.01, %v489_v13  ;;  %716 = vst.msk [vmem:[%s1240_s3 + $0x50] sm:$0xff] %vm1140_vm6, %v800_v19  ;;  %v597_v27 = vsel %vm533_vm0, %v487_v9, %v565_v20  ;;  %v453_v28 = vadd.f32 %v452_v17, %v1130_v5  ;;  %v493_v29 = vadd.f32 %v492_v18, %v141_v23  ;;  %v458_v33 = vpop.f32.mrb[11].mxu0  ;;  %v498_v38 = vpop.f32.mrb[11].mxu1 }
 0x129   :  { %v455_v30 = vadd.f32 %v454_v21, %v1130_v5  ;;  %v582_v34 = vsel %vm518_vm1, %v449_v12, %v550_v24  ;;  %v495_v36 = vadd.f32 %v494_v22, %v141_v23  ;;  %v457_v37 = vadd.f32 %v456_v26, %v1132_v6  ;;  %v156_v21 = vpop.permute.xlu1 %155 }
 0x12a   :  { %v598_v35 = vsel %vm534_vm2, %v489_v13, %v566_v25  ;;  %v793_v39 = vpack.c.bf16 %v582_v34, %v581_v4  ;;  %vm519_vm3 = vcmp.gt.f32.partialorder %v453_v28, 0.0  ;;  %v551_v41 = vmul.f32 0.01, %v453_v28 }
 0x12b   :  { %v801_v40 = vpack.c.bf16 %v598_v35, %v597_v27  ;;  %vm535_vm4 = vcmp.gt.f32.partialorder %v493_v29, 0.0  ;;  %v567_v42 = vmul.f32 0.01, %v493_v29  ;;  %vm520_vm5 = vcmp.gt.f32.partialorder %v455_v30, 0.0 }
 0x12c   :  { %v552_v43 = vmul.f32 0.01, %v455_v30  ;;  %709 = vst.msk [vmem:[%s1240_s3 + $0x18] sm:$0xff] %vm1140_vm6, %v793_v39  ;;  %v583_v5 = vsel %vm519_vm3, %v453_v28, %v551_v41  ;;  %vm536_vm7 = vcmp.gt.f32.partialorder %v495_v36, 0.0  ;;  %v568_v45 = vmul.f32 0.01, %v495_v36 }
 0x12d   :  { %717 = vst.msk [vmem:[%s1240_s3 + $0x58] sm:$0xff] %vm1140_vm6, %v801_v40  ;;  %vm521_vm8 = vcmp.gt.f32.partialorder %v457_v37, 0.0  ;;  %v599_v46 = vsel %vm535_vm4, %v493_v29, %v567_v42  ;;  %v553_v48 = vmul.f32 0.01, %v457_v37  ;;  %v497_v49 = vadd.f32 %v496_v31, %v146_v44  ;;  %v462_v50 = vpop.f32.mrb[12].mxu0  ;;  %v502_v51 = vpop.f32.mrb[12].mxu1 }
 0x12e   :  { %v584_v47 = vsel %vm520_vm5, %v455_v30, %v552_v43  ;;  %v600_v53 = vsel %vm536_vm7, %v495_v36, %v568_v45  ;;  %v459_v54 = vadd.f32 %v458_v33, %v1132_v6  ;;  %v499_v55 = vadd.f32 %v498_v38, %v146_v44  ;;  %v464_v56 = vpop.f32.mrb[13].mxu0  ;;  %v504_v57 = vpop.f32.mrb[13].mxu1 }
 0x12f   :  { %v794_v52 = vpack.c.bf16 %v584_v47, %v583_v5  ;;  %v802_v58 = vpack.c.bf16 %v600_v53, %v599_v46  ;;  %v585_v59 = vsel %vm521_vm8, %v457_v37, %v553_v48  ;;  %vm537_vm9 = vcmp.gt.f32.partialorder %v497_v49, 0.0  ;;  %v466_v61 = vpop.f32.mrb[14].mxu0  ;;  %v506_v62 = vpop.f32.mrb[14].mxu1 }
 0x130   :  { %v569_v60 = vmul.f32 0.01, %v497_v49  ;;  %vm522_vm10 = vcmp.gt.f32.partialorder %v459_v54, 0.0  ;;  %v554_v0 = vmul.f32 0.01, %v459_v54  ;;  %vm538_vm11 = vcmp.gt.f32.partialorder %v499_v55, 0.0 }
 0x131   :  { %710 = vst.msk [vmem:[%s1240_s3 + $0x20] sm:$0xff] %vm1140_vm6, %v794_v52  ;;  %v570_v6 = vmul.f32 0.01, %v499_v55  ;;  %718 = vst.msk [vmem:[%s1240_s3 + $0x60] sm:$0xff] %vm1140_vm6, %v802_v58  ;;  %v463_v2 = vadd.f32 %v462_v50, %v1134_v7  ;;  %v503_v3 = vadd.f32 %v502_v51, %v151_v63  ;;  %v465_v9 = vadd.f32 %v464_v56, %v1134_v7  ;;  %v468_v10 = vpop.f32.mrb[15].mxu0  ;;  %v508_v11 = vpop.f32.mrb[15].mxu1 }
 0x132   :  { %v601_v1 = vsel %vm537_vm9, %v497_v49, %v569_v60  ;;  %v586_v12 = vsel %vm522_vm10, %v459_v54, %v554_v0  ;;  %v505_v14 = vadd.f32 %v504_v57, %v151_v63  ;;  %v467_v15 = vadd.f32 %v466_v61, %v1136_v8 }
 0x133   :  { %v602_v13 = vsel %vm538_vm11, %v499_v55, %v570_v6  ;;  %v795_v16 = vpack.c.bf16 %v586_v12, %v585_v59  ;;  %vm523_vm12 = vcmp.gt.f32.partialorder %v463_v2, 0.0  ;;  %v555_v18 = vmul.f32 0.01, %v463_v2 }
 0x134   :  { %v803_v17 = vpack.c.bf16 %v602_v13, %v601_v1  ;;  %vm539_vm13 = vcmp.gt.f32.partialorder %v503_v3, 0.0  ;;  %v571_v19 = vmul.f32 0.01, %v503_v3  ;;  %vm524_vm14 = vcmp.gt.f32.partialorder %v465_v9, 0.0 }
 0x135   :  { %v556_v20 = vmul.f32 0.01, %v465_v9  ;;  %711 = vst.msk [vmem:[%s1240_s3 + $0x28] sm:$0xff] %vm1140_vm6, %v795_v16  ;;  %v587_v7 = vsel %vm523_vm12, %v463_v2, %v555_v18  ;;  %vm540_vm15 = vcmp.gt.f32.partialorder %v505_v14, 0.0  ;;  %v572_v22 = vmul.f32 0.01, %v505_v14 }
 0x136   :  { %719 = vst.msk [vmem:[%s1240_s3 + $0x68] sm:$0xff] %vm1140_vm6, %v803_v17  ;;  %vm525_vm0 = vcmp.gt.f32.partialorder %v467_v15, 0.0  ;;  %v603_v23 = vsel %vm539_vm13, %v503_v3, %v571_v19  ;;  %v557_v24 = vmul.f32 0.01, %v467_v15  ;;  %v507_v25 = vadd.f32 %v506_v62, %v156_v21 }
 0x137   :  { %v588_v4 = vsel %vm524_vm14, %v465_v9, %v556_v20  ;;  %v604_v27 = vsel %vm540_vm15, %v505_v14, %v572_v22  ;;  %v469_v28 = vadd.f32 %v468_v10, %v1136_v8  ;;  %v509_v29 = vadd.f32 %v508_v11, %v156_v21 }
 0x138   :  { %v796_v26 = vpack.c.bf16 %v588_v4, %v587_v7  ;;  %v804_v30 = vpack.c.bf16 %v604_v27, %v603_v23  ;;  %v589_v31 = vsel %vm525_vm0, %v467_v15, %v557_v24  ;;  %vm541_vm1 = vcmp.gt.f32.partialorder %v507_v25, 0.0 }
 0x139   :  { %v573_v33 = vmul.f32 0.01, %v507_v25  ;;  %vm526_vm2 = vcmp.gt.f32.partialorder %v469_v28, 0.0  ;;  %v558_v34 = vmul.f32 0.01, %v469_v28  ;;  %vm542_vm3 = vcmp.gt.f32.partialorder %v509_v29, 0.0 }
 0x13a   :  { %712 = vst.msk [vmem:[%s1240_s3 + $0x30] sm:$0xff] %vm1140_vm6, %v796_v26  ;;  %v574_v35 = vmul.f32 0.01, %v509_v29  ;;  %720 = vst.msk [vmem:[%s1240_s3 + $0x70] sm:$0xff] %vm1140_vm6, %v804_v30 }
 0x13b   :  { %v605_v8 = vsel %vm541_vm1, %v507_v25, %v573_v33  ;;  %v590_v36 = vsel %vm526_vm2, %v469_v28, %v558_v34 }
 0x13c   :  { %v606_v37 = vsel %vm542_vm3, %v509_v29, %v574_v35  ;;  %v797_v38 = vpack.c.bf16 %v590_v36, %v589_v31 }
 0x13d   :  { %v805_v39 = vpack.c.bf16 %v606_v37, %v605_v8 }
 0x13e   :  { %713 = vst.msk [vmem:[%s1240_s3 + $0x38] sm:$0xff] %vm1140_vm6, %v797_v38 }
 0x13f   :  { %721 = vst.msk [vmem:[%s1240_s3 + $0x78] sm:$0xff] %vm1140_vm6, %v805_v39 }

// kernel: _lambda_.9
= control target key start
LH: loop header
LB: loop body
LE: loop exit
PB: predicated region body
PF: predicated region fallthrough
CT: control target
= control target key end

     0   :  { %v655_v1 = vmov 0   ;;  %v656_v33 = vmov 0.0   ;;  %vm657_vm0 = vmmov 0   ;;  %vm472_vm1 = vcmask 539648   ;;  %s851_s1 = inlined_call_operand.vmem [shape: bf16[128,578], index: 1, kind: input, shape index: {}]   ;;  %s852_s0 = inlined_call_operand.vmem [shape: bf16[12,128], index: 0, kind: input, shape index: {}]   ;;  %s853_s2 = inlined_call_operand.vmem [shape: f32[12,1], index: 2, kind: input, shape index: {}]   ;;  %s854_s3 = inlined_call_operand.vmem [shape: f32[12,578], index: 3, kind: output, shape index: {}]  }
   0x1   :  { %v558_v0 = vld [vmem:[%s851_s1 + $0x4] ss:$20 sps:$4 sm:$0xff]   ;;  %323 = vmatprep.mubr.bf16.mxu0 %v655_v1  ;;  %366 = vmatprep.mubr.bf16.mxu1 %v655_v1  ;;  %v560_v2 = vld [vmem:[%s851_s1] ss:$20 sps:$4 sm:$0xff]   ;;  %v563_v4 = vld [vmem:[%s851_s1 + $0x28] ss:$20 sps:$4 sm:$0xff]  }
   0x2   :  { %557 = vset.pattern.permute.xlu0 %v655_v1  ;;  %291 = vmatprep.subr.bf16.mxu0 %v558_v0  ;;  %v561_v3 = vld [vmem:[%s851_s1 + $0x2c] ss:$20 sps:$4 sm:$0xff]   ;;  %v564_v5 = vld [vmem:[%s851_s1 + $0x54] ss:$20 sps:$4 sm:$0xff]   ;;  %v566_v6 = vld [vmem:[%s851_s1 + $0x50] ss:$20 sps:$4 sm:$0xff]  }
   0x3   :  { %292 = vmatpush1.bf16.msra.mxu0 %v560_v2  ;;  %v567_v7 = vld [vmem:[%s851_s1 + $0x7c] ss:$20 sps:$4 sm:$0xff]   ;;  %v579_v8 = vld [vmem:[%s851_s1 + $0xc] ss:$20 sps:$4 sm:$0xff]   ;;  %v570_v10 = vld [vmem:[%s851_s1 + $0xa4] ss:$20 sps:$4 sm:$0xff]  }
   0x4   :  { %293 = vmatprep.subr.bf16.mxu0 %v561_v3  ;;  %v569_v9 = vld [vmem:[%s851_s1 + $0x78] ss:$20 sps:$4 sm:$0xff]   ;;  %v583_v11 = vld [vmem:[%s851_s1 + $0x8] ss:$20 sps:$4 sm:$0xff]   ;;  %334 = vmatprep.subr.bf16.mxu1 %v579_v8  ;;  %v588_v13 = vld [vmem:[%s851_s1 + $0x30] ss:$20 sps:$4 sm:$0xff]  }
   0x5   :  { %v585_v12 = vld [vmem:[%s851_s1 + $0x34] ss:$20 sps:$4 sm:$0xff]   ;;  %335 = vmatpush1.bf16.msra.mxu1 %v583_v11  ;;  %v573_v15 = vld [vmem:[%s851_s1 + $0xcc] ss:$20 sps:$4 sm:$0xff]   ;;  %v590_v16 = vld [vmem:[%s851_s1 + $0x5c] ss:$20 sps:$4 sm:$0xff]  }
   0x6   :  { %336 = vmatprep.subr.bf16.mxu1 %v585_v12  ;;  %v572_v14 = vld [vmem:[%s851_s1 + $0xa0] ss:$20 sps:$4 sm:$0xff]   ;;  %v592_v17 = vld [vmem:[%s851_s1 + $0x58] ss:$20 sps:$4 sm:$0xff]   ;;  %v575_v19 = vld [vmem:[%s851_s1 + $0xc8] ss:$20 sps:$4 sm:$0xff]  }
   0x7   :  { %294 = vmatpush1.bf16.msra.mxu0 %v563_v4  ;;  %v594_v18 = vld [vmem:[%s851_s1 + $0x84] ss:$20 sps:$4 sm:$0xff]   ;;  %v576_v20 = vld [vmem:[%s851_s1 + $0xf4] ss:$20 sps:$4 sm:$0xff]   ;;  %v598_v22 = vld [vmem:[%s851_s1 + $0xac] ss:$20 sps:$4 sm:$0xff]  }
   0x8   :  { %295 = vmatprep.subr.bf16.mxu0 %v564_v5  ;;  %v596_v21 = vld [vmem:[%s851_s1 + $0x80] ss:$20 sps:$4 sm:$0xff]   ;;  %v578_v23 = vld [vmem:[%s851_s1 + $0xf0] ss:$20 sps:$4 sm:$0xff]   ;;  %v600_v25 = vld [vmem:[%s851_s1 + $0xa8] ss:$20 sps:$4 sm:$0xff]  }
   0x9   :  { %337 = vmatpush1.bf16.msra.mxu1 %v588_v13  ;;  %v581_v24 = vld [vmem:[%s851_s1 + $0x11c] ss:$20 sps:$4 sm:$0xff]   ;;  %v602_v26 = vld [vmem:[%s851_s1 + $0xd4] ss:$20 sps:$4 sm:$0xff]   ;;  %v584_v27 = vld [vmem:[%s851_s1 + $0x118] ss:$20 sps:$4 sm:$0xff]  }
   0xa   :  { %338 = vmatprep.subr.bf16.mxu1 %v590_v16  ;;  %v604_v28 = vld [vmem:[%s851_s1 + $0xd0] ss:$20 sps:$4 sm:$0xff]   ;;  %v608_v34 = vld [vmem:[%s851_s1 + $0xf8] ss:$20 sps:$4 sm:$0xff]   ;;  %v66_v35 = vld [vmem:[%s853_s2 + $0x8] sm:$0xf] }
   0xb   :  { %296 = vmatpush1.bf16.msra.mxu0 %v566_v6  ;;  %v587_v29 = vld [vmem:[%s852_s0] sm:$0x3f]   ;;  %v606_v30 = vld [vmem:[%s851_s1 + $0xfc] ss:$20 sps:$4 sm:$0xff]   ;;  %v593_v37 = vld [vmem:[%s851_s1 + $0x38] ss:$20 sps:$4 sm:$0xff]  }
   0xc   :  { %297 = vmatprep.subr.bf16.mxu0 %v567_v7  ;;  %v65_v31 = vld [vmem:[%s853_s2] sm:$0xff]  ;;  %v601_v40 = vld [vmem:[%s851_s1 + $0x88] ss:$20 sps:$4 sm:$0xff]   ;;  %v609_v42 = vld [vmem:[%s851_s1 + $0xd8] ss:$20 sps:$4 sm:$0xff]   ;;  %vm478_vm2 = vcmask 535552  }
   0xd   :  { %339 = vmatpush1.bf16.msra.mxu1 %v592_v17  ;;  %v589_v32 = vld [vmem:[%s851_s1 + $0x10] ss:$20 sps:$4 sm:$0xff]   ;;  %69 = vperm.xlu0 %557, %v65_v31   ;;  %v612_v38 = vld [vmem:[%s851_s1 + $0x120] ss:$20 sps:$4 sm:$0xff]   ;;  %v614_v44 = vld [vmem:[%s851_s1 + $0x128] ss:$20 sps:$4 sm:$0xff]  }
   0xe   :  { %340 = vmatprep.subr.bf16.mxu1 %v594_v18  ;;  %v610_v36 = vld [vmem:[%s851_s1 + $0x124] ss:$20 sps:$4 sm:$0xff]   ;;  %v597_v39 = vld [vmem:[%s851_s1 + $0x60] ss:$20 sps:$4 sm:$0xff]  }
   0xf   :  { %298 = vmatpush1.bf16.msra.mxu0 %v569_v9  ;;  %v605_v41 = vld [vmem:[%s851_s1 + $0xb0] ss:$20 sps:$4 sm:$0xff]   ;;  %v613_v43 = vld [vmem:[%s851_s1 + $0x100] ss:$20 sps:$4 sm:$0xff]  }
  0x10   :  { %299 = vmatprep.subr.bf16.mxu0 %v570_v10 }
  0x11   :  { %341 = vmatpush1.bf16.msra.mxu1 %v596_v21  ;;  %74 = vperm.xlu0 %557, %v66_v35  }
  0x12   :  { %342 = vmatprep.subr.bf16.mxu1 %v598_v22 }
  0x13   :  { %300 = vmatpush1.bf16.msra.mxu0 %v572_v14 }
  0x14   :  { %301 = vmatprep.subr.bf16.mxu0 %v573_v15 }
  0x15   :  { %343 = vmatpush1.bf16.msra.mxu1 %v600_v25 }
  0x16   :  { %344 = vmatprep.subr.bf16.mxu1 %v602_v26 }
  0x17   :  { %302 = vmatpush1.bf16.msra.mxu0 %v575_v19 }
  0x18   :  { %303 = vmatprep.subr.bf16.mxu0 %v576_v20 }
  0x19   :  { %345 = vmatpush1.bf16.msra.mxu1 %v604_v28 }
  0x1a   :  { %346 = vmatprep.subr.bf16.mxu1 %v606_v30 }
  0x1b   :  { %304 = vmatpush1.bf16.msra.mxu0 %v578_v23 }
  0x1c   :  { %305 = vmatprep.subr.bf16.mxu0 %v581_v24 }
  0x1d   :  { %347 = vmatpush1.bf16.msra.mxu1 %v608_v34 }
  0x1e   :  { %348 = vmatprep.subr.bf16.mxu1 %v610_v36 }
  0x1f   :  { %306 = vmatpush1.bf16.msra.mxu0 %v584_v27 }
  0x20   :  { %534 = vmatprep.subr.bf16.mxu0 %v656_v33 }
  0x21   :  { %349 = vmatpush1.bf16.msra.mxu1 %v612_v38 }
  0x22   :  { %324 = vmatmul.mubr.bf16.vlgmr.msra.gmra.mrb[0].mxu0 %v587_v29 }
  0x23   :  { %535 = vmatpush3.bf16.msra.mxu0 %v589_v32  ;;  %550 = vmatprep.mubr.msk.bf16.mxu0 %vm657_vm0, %v656_v33 }
  0x24   :  { %536 = vmatprep.subr.bf16.mxu0 %v656_v33  ;;  %367 = vmatmul.mubr.bf16.vlgmr.msra.gmra.mrb[0].mxu1 %v587_v29 }
  0x27   :  { %537 = vmatpush3.bf16.msra.mxu0 %v593_v37 }
  0x28   :  { %538 = vmatprep.subr.bf16.mxu0 %v656_v33 }
  0x2b   :  { %539 = vmatpush3.bf16.msra.mxu0 %v597_v39 }
  0x2c   :  { %540 = vmatprep.subr.bf16.mxu0 %v656_v33 }
  0x2f   :  { %541 = vmatpush3.bf16.msra.mxu0 %v601_v40 }
  0x30   :  { %542 = vmatprep.subr.bf16.mxu0 %v656_v33 }
  0x33   :  { %543 = vmatpush3.bf16.msra.mxu0 %v605_v41 }
  0x34   :  { %544 = vmatprep.subr.bf16.mxu0 %v656_v33 }
  0x37   :  { %545 = vmatpush3.bf16.msra.mxu0 %v609_v42 }
  0x38   :  { %546 = vmatprep.subr.bf16.mxu0 %v656_v33 }
  0x3b   :  { %547 = vmatpush3.bf16.msra.mxu0 %v613_v43 }
  0x3c   :  { %548 = vmatprep.subr.bf16.mxu0 %v656_v33 }
  0x3f   :  { %549 = vmatpush3.bf16.msra.mxu0 %v614_v44 }
  0x42   :  { %551 = vmatmul.mubr.bf16.vlgmr.msra.gmra.mrb[4].mxu0 %v587_v29 }
  0x8c   :  { %v807_v45 = vpop.permute.xlu0 %69 }
  0x90   :  { %v809_v47 = vpop.permute.xlu0 %74 }
  0xf5   :  { %v325_v46 = vpop.f32.mrb[0].mxu0 }
  0xf6   :  { %v326_v48 = vadd.f32 %v325_v46, %v807_v45  ;;  %v327_v49 = vpop.f32.mrb[1].mxu0 }
  0xf7   :  { %v328_v50 = vadd.f32 %v327_v49, %v807_v45  ;;  %v329_v51 = vpop.f32.mrb[2].mxu0  ;;  %v368_v63 = vpop.f32.mrb[0].mxu1 }
  0xf8   :  { %v418_v52 = vsub.f32 0.0, %v326_v48  ;;  %v330_v53 = vadd.f32 %v329_v51, %v809_v47  ;;  %v331_v54 = vpop.f32.mrb[3].mxu0  ;;  %v369_v0 = vadd.f32 %v368_v63, %v807_v45  ;;  %v370_v1 = vpop.f32.mrb[1].mxu1 }
  0xf9   :  { %v419_v55 = vsub.f32 0.0, %v328_v50  ;;  %v332_v56 = vadd.f32 %v331_v54, %v809_v47  ;;  %v371_v2 = vadd.f32 %v370_v1, %v807_v45  ;;  %v372_v3 = vpop.f32.mrb[2].mxu1 }
  0xfa   :  { %v428_v57 = vmul.f32 1.442695, %v418_v52  ;;  %v423_v58 = vsub.f32 0.0, %v330_v53  ;;  %v420_v4 = vsub.f32 0.0, %v369_v0  ;;  %v373_v5 = vadd.f32 %v372_v3, %v809_v47  ;;  %v374_v6 = vpop.f32.mrb[3].mxu1 }
  0xfb   :  { %v430_v59 = vmul.f32 1.442695, %v419_v55  ;;  %v424_v60 = vsub.f32 0.0, %v332_v56  ;;  %v421_v7 = vsub.f32 0.0, %v371_v2  ;;  %v375_v8 = vadd.f32 %v374_v6, %v809_v47 }
  0xfc   :  { %615 = vpow2.f32 %v428_v57  ;;  %v438_v61 = vmul.f32 1.442695, %v423_v58  ;;  %v432_v9 = vmul.f32 1.442695, %v420_v4  ;;  %v425_v10 = vsub.f32 0.0, %v373_v5 }
  0xfd   :  { %617 = vpow2.f32 %v430_v59  ;;  %v440_v62 = vmul.f32 1.442695, %v424_v60  ;;  %v434_v11 = vmul.f32 1.442695, %v421_v7  ;;  %v426_v12 = vsub.f32 0.0, %v375_v8 }
  0xfe   :  { %619 = vpow2.f32 %v438_v61  ;;  %v442_v14 = vmul.f32 1.442695, %v425_v10 }
  0xff   :  { %621 = vpow2.f32 %v440_v62  ;;  %v444_v21 = vmul.f32 1.442695, %v426_v12 }
 0x100   :  { %623 = vpow2.f32 %v432_v9 }
 0x101   :  { %625 = vpow2.f32 %v434_v11 }
 0x102   :  { %627 = vpow2.f32 %v442_v14 }
 0x106   :  { %v616_v13 = vpop.eup %615 }
 0x107   :  { %v618_v15 = vpop.eup %617  ;;  %v448_v16 = vadd.f32 1.0, %v616_v13 }
 0x108   :  { %v620_v17 = vpop.eup %619  ;;  %v449_v18 = vadd.f32 1.0, %v618_v15 }
 0x109   :  { %v622_v19 = vpop.eup %621  ;;  %629 = vrcp.f32 %v448_v16  ;;  %v453_v20 = vadd.f32 1.0, %v620_v17 }
 0x10a   :  { %631 = vrcp.f32 %v449_v18  ;;  %v454_v22 = vadd.f32 1.0, %v622_v19  ;;  %v624_v23 = vpop.eup %623 }
 0x10b   :  { %633 = vrcp.f32 %v453_v20  ;;  %v626_v24 = vpop.eup %625  ;;  %v450_v25 = vadd.f32 1.0, %v624_v23 }
 0x10c   :  { %635 = vrcp.f32 %v454_v22  ;;  %v628_v26 = vpop.eup %627  ;;  %v451_v27 = vadd.f32 1.0, %v626_v24 }
 0x10d   :  { %637 = vpow2.f32 %v444_v21  ;;  %v455_v29 = vadd.f32 1.0, %v628_v26 }
 0x10e   :  { %639 = vrcp.f32 %v450_v25 }
 0x10f   :  { %641 = vrcp.f32 %v451_v27 }
 0x110   :  { %643 = vrcp.f32 %v455_v29 }
 0x113   :  { %v630_v28 = vpop.eup %629 }
 0x114   :  { %v632_v30 = vpop.eup %631  ;;  %468 = vst [vmem:[%s854_s3] sm:$0xff] %v630_v28 }
 0x115   :  { %v634_v31 = vpop.eup %633  ;;  %469 = vst [vmem:[%s854_s3 + $0x8] sm:$0xff] %v632_v30  ;;  %v411_v32 = vpop.f32.mrb[4].mxu0 }
 0x116   :  { %v636_v33 = vpop.eup %635  ;;  %474 = vst [vmem:[%s854_s3 + $0x28] sm:$0xf] %v634_v31  ;;  %v412_v34 = vadd.f32 %v411_v32, %v807_v45  ;;  %v552_v35 = vpop.f32.mrb[5].mxu0 }
 0x117   :  { %v638_v36 = vpop.eup %637  ;;  %475 = vst [vmem:[%s854_s3 + $0x30] sm:$0xf] %v636_v33  ;;  %v414_v37 = vpop.f32.mrb[6].mxu0 }
 0x118   :  { %v456_v38 = vadd.f32 1.0, %v638_v36  ;;  %v422_v39 = vsub.f32 0.0, %v412_v34  ;;  %v415_v40 = vadd.f32 %v414_v37, %v809_v47  ;;  %v553_v41 = vpop.f32.mrb[7].mxu0  ;;  %v640_v46 = vpop.eup %639 }
 0x119   :  { %v642_v48 = vpop.eup %641  ;;  %470 = vst [vmem:[%s854_s3 + $0x10] sm:$0xff] %v640_v46 }
 0x11a   :  { %645 = vrcp.f32 %v456_v38  ;;  %v436_v42 = vmul.f32 1.442695, %v422_v39  ;;  %v427_v43 = vsub.f32 0.0, %v415_v40  ;;  %v644_v45 = vpop.eup %643  ;;  %471 = vst [vmem:[%s854_s3 + $0x18] sm:$0xff] %v642_v48 }
 0x11b   :  { %476 = vst [vmem:[%s854_s3 + $0x38] sm:$0xf] %v644_v45 }
 0x11c   :  { %647 = vpow2.f32 %v436_v42  ;;  %v446_v44 = vmul.f32 1.442695, %v427_v43 }
 0x11e   :  { %649 = vpow2.f32 %v446_v44 }
 0x124   :  { %v646_v47 = vpop.eup %645 }
 0x125   :  { %477 = vst [vmem:[%s854_s3 + $0x40] sm:$0xf] %v646_v47 }
 0x126   :  { %v648_v49 = vpop.eup %647 }
 0x127   :  { %v452_v50 = vadd.f32 1.0, %v648_v49 }
 0x128   :  { %v650_v51 = vpop.eup %649 }
 0x129   :  { %651 = vrcp.f32 %v452_v50  ;;  %v457_v52 = vadd.f32 1.0, %v650_v51 }
 0x12b   :  { %653 = vrcp.f32 %v457_v52 }
 0x133   :  { %v652_v53 = vpop.eup %651 }
 0x134   :  { %473 = vst.msk [vmem:[%s854_s3 + $0x20] sm:$0xff] %vm472_vm1, %v652_v53 }
 0x135   :  { %v654_v54 = vpop.eup %653 }
 0x136   :  { %479 = vst.msk [vmem:[%s854_s3 + $0x48] sm:$0xf] %vm478_vm2, %v654_v54 }

</bundles_post_ra>
